<compile_context>
chip_gen: v6e
topology: v6e:2x2x1
jax: 0.10.0
libtpu: 0.0.40
codegen_flags: <defaults>
</compile_context>

<pallas_src>
import jax
import jax.numpy as jnp
import numpy as np
from jax.experimental import pallas as pl
from jax.experimental.pallas import tpu as pltpu


_VMEM_LIMIT = 32 * 1024 * 1024            # safe scoped limit on v5e/v6e/v7x
_QUADS = ((0, 0), (0, 1), (1, 0), (1, 1))  # (p, q) pool-quadrant enumeration


# ---------------------------------------------------------------------------
# Fused kernel: conv1+pool -> conv2+pool -> fc1 -> fc2 for one batch tile
# ---------------------------------------------------------------------------

def _lenet_fused_kernel(p1_ref, w1_ref, b1_ref, w2_ref, b2_ref,
                        fw1_ref, fb1_ref, fw2_ref, fb2_ref, o_ref):
    """p1 (16, TB, 192) bf16 input bands -> o (TB, 84) f32 features."""
    tb = o_ref.shape[0]

    # ---- conv1 + bias + relu + 2x2 maxpool (band-Toeplitz matmul) ----------
    # rows = (pooled row U, image b); output lanes = 4 quadrant blocks of 128,
    # each holding (V, co) at lane V*6+co (lanes >= 84 are zero).
    p1 = p1_ref[...].reshape(16 * tb, 192)                 # leading-dim merge
    y = jnp.dot(p1, w1_ref[...], preferred_element_type=jnp.float32)  # (16tb,512)
    m = jnp.maximum(jnp.maximum(y[:, 0:128], y[:, 128:256]),
                    jnp.maximum(y[:, 256:384], y[:, 384:512]))
    y1 = jnp.maximum(m + b1_ref[...], 0.0)                 # (16tb, 128) f32
    y1 = y1.reshape(8, 2, tb, 128)                         # rows (U,b)->(U//2,U%2,b)

    # ---- conv2 + bias + relu + 2x2 maxpool: 6 accumulated band matmuls -----
    # output rows = (pooled row i, image b); for band offset r, the needed y1
    # rows U = 2i + r are a contiguous slice on the leading (untiled) dims.
    z = None
    for r in range(6):
        a = y1[r // 2: r // 2 + 5, r % 2]                  # (5, tb, 128)
        a = a.reshape(5 * tb, 128).astype(jnp.bfloat16)
        t = jnp.dot(a, w2_ref[r], preferred_element_type=jnp.float32)  # (5tb,512)
        z = t if z is None else z + t
    m2 = jnp.maximum(jnp.maximum(z[:, 0:128], z[:, 128:256]),
                     jnp.maximum(z[:, 256:384], z[:, 384:512]))
    y2 = jnp.maximum(m2 + b2_ref[...], 0.0)                # (5tb, 128) f32
    y2 = y2.reshape(5, tb, 128)                            # rows (i, b)

    # ---- fc1 (+relu): torch flatten folded into the weight layout ----------
    h = None
    for i in range(5):
        t = jnp.dot(y2[i].astype(jnp.bfloat16), fw1_ref[i],
                    preferred_element_type=jnp.float32)    # (tb, 120)
        h = t if h is None else h + t
    h = jnp.maximum(h + fb1_ref[...], 0.0)

    # ---- fc2 (+relu) --------------------------------------------------------
    o = jnp.dot(h.astype(jnp.bfloat16), fw2_ref[...],
                preferred_element_type=jnp.float32)
    o_ref[...] = jnp.maximum(o + fb2_ref[...], 0.0).astype(o_ref.dtype)


# ---------------------------------------------------------------------------
# pallas_call wrapper
# ---------------------------------------------------------------------------

def _fused_stage(p1, prep, tb):
    b_pad = p1.shape[1]
    n_out = prep["fw2"].shape[1]
    grid = (b_pad // tb,)
    flops = 2 * b_pad * (16 * 192 * 512 + 6 * 5 * 128 * 512
                         + 5 * 128 * 120 + 120 * 84)
    weight_bytes = 2 * (prep["w1b"].size + prep["w2b"].size
                        + prep["fw1"].size + prep["fw2"].size)
    bytes_accessed = p1.size * 2 + b_pad * n_out * 4 + weight_bytes
    return pl.pallas_call(
        _lenet_fused_kernel,
        out_shape=jax.ShapeDtypeStruct((b_pad, n_out), jnp.float32),
        grid=grid,
        in_specs=[
            pl.BlockSpec((16, tb, 192), lambda i: (0, i, 0)),   # input bands
            pl.BlockSpec((192, 512), lambda i: (0, 0)),         # conv1 weight (resident)
            pl.BlockSpec((1, 128), lambda i: (0, 0)),           # conv1 bias row
            pl.BlockSpec((6, 128, 512), lambda i: (0, 0, 0)),   # conv2 band weights
            pl.BlockSpec((1, 128), lambda i: (0, 0)),           # conv2 bias row
            pl.BlockSpec((5, 128, 120), lambda i: (0, 0, 0)),   # fc1 weights
            pl.BlockSpec((1, 120), lambda i: (0, 0)),           # fc1 bias
            pl.BlockSpec((120, n_out), lambda i: (0, 0)),       # fc2 weights
            pl.BlockSpec((1, n_out), lambda i: (0, 0)),         # fc2 bias
        ],
        out_specs=pl.BlockSpec((tb, n_out), lambda i: (i, 0)),
        compiler_params=pltpu.CompilerParams(
            dimension_semantics=("parallel",),
            vmem_limit_bytes=_VMEM_LIMIT),
        cost_estimate=pl.CostEstimate(
            flops=flops, transcendentals=0, bytes_accessed=int(bytes_accessed)),
    )(p1, prep["w1b"], prep["b1r"], prep["w2b"], prep["b2r"],
      prep["fw1"], prep["fb1"], prep["fw2"], prep["fb2"])


# ---------------------------------------------------------------------------
# XLA glue: per-pooled-row input bands (tiny, bf16)
# ---------------------------------------------------------------------------

def _build_input_bands(x2d, b_pad):
    """x2d (B_pad, 32, 32) bf16 -> (16, B_pad, 192); band U = x[:, 2U:2U+6, :]."""
    bands = jnp.stack([x2d[:, 2 * u:2 * u + 6, :] for u in range(14)], axis=0)
    bands = bands.reshape(14, b_pad, 6 * 32)
    return jnp.pad(bands, ((0, 2), (0, 0), (0, 0)))        # pad U to 16


# ---------------------------------------------------------------------------
# Parameters
# ---------------------------------------------------------------------------

def init_params(key):
    ks = jax.random.split(key, 8)

    def u(k, shape, fan_in):
        bound = 1.0 / jnp.sqrt(fan_in)
        return jax.random.uniform(k, shape, jnp.float32, -bound, bound)

    return {
        "w1": u(ks[0], (6, 1, 5, 5), 25),
        "b1": u(ks[1], (6,), 25),
        "w2": u(ks[2], (16, 6, 5, 5), 150),
        "b2": u(ks[3], (16,), 150),
        "fc1_w": u(ks[4], (120, 400), 400),
        "fc1_b": u(ks[5], (120,), 400),
        "fc2_w": u(ks[6], (84, 120), 120),
        "fc2_b": u(ks[7], (84,), 120),
    }


def prepare_params(params):
    """One-time host-side weight restructuring (hoisted out of the forward)."""
    w1 = np.asarray(params["w1"], np.float32)       # (6, 1, 5, 5)
    b1 = np.asarray(params["b1"], np.float32)
    w2 = np.asarray(params["w2"], np.float32)       # (16, 6, 5, 5)
    b2 = np.asarray(params["b2"], np.float32)
    fc1w = np.asarray(params["fc1_w"], np.float32)  # (120, 400)
    fc1b = np.asarray(params["fc1_b"], np.float32)
    fc2w = np.asarray(params["fc2_w"], np.float32)  # (84, 120)
    fc2b = np.asarray(params["fc2_b"], np.float32)

    # conv1 band-Toeplitz weight (192, 512).
    # rows: (r, c) of the 6x32 input band for pooled row U (input row 2U+r, col c)
    # cols: quadrant block pq*128 + V*6 + co   (p,q = pool quadrant, V = pooled col)
    w1b = np.zeros((192, 512), np.float32)
    b1r = np.zeros((1, 128), np.float32)
    for pq, (p, q) in enumerate(_QUADS):
        for V in range(14):
            for di in range(5):
                for dj in range(5):
                    row = (p + di) * 32 + (2 * V + q + dj)
                    w1b[row, pq * 128 + V * 6: pq * 128 + V * 6 + 6] = w1[:, 0, di, dj]
    for V in range(14):
        b1r[0, V * 6: V * 6 + 6] = b1

    # conv2 band weights (6, 128, 512): band offset r means y1 row U = 2i + r.
    # rows: V*6 + ci (y1 lane layout); cols: pq*128 + j*16 + co2.
    w2b = np.zeros((6, 128, 512), np.float32)
    b2r = np.zeros((1, 128), np.float32)
    for r in range(6):
        for pq, (p, q) in enumerate(_QUADS):
            di = r - p
            if di < 0 or di > 4:
                continue
            for j in range(5):
                for dj in range(5):
                    V = 2 * j + q + dj
                    w2b[r, V * 6: V * 6 + 6,
                        pq * 128 + j * 16: pq * 128 + j * 16 + 16] = w2[:, :, di, dj].T
    for j in range(5):
        b2r[0, j * 16: j * 16 + 16] = b2

    # fc1 weights (5, 128, 120): per pooled row i, rows = j*16 + co2 (y2 lane
    # layout, rows >= 80 zero), matching torch's (c, h, w) flatten order.
    fw1 = np.zeros((5, 128, 120), np.float32)
    for i in range(5):
        for j in range(5):
            for co2 in range(16):
                fw1[i, j * 16 + co2, :] = fc1w[:, co2 * 25 + i * 5 + j]

    return {
        "w1b": jnp.asarray(w1b, jnp.bfloat16),
        "b1r": jnp.asarray(b1r, jnp.float32),
        "w2b": jnp.asarray(w2b, jnp.bfloat16),
        "b2r": jnp.asarray(b2r, jnp.float32),
        "fw1": jnp.asarray(fw1, jnp.bfloat16),
        "fb1": jnp.asarray(fc1b.reshape(1, 120), jnp.float32),
        "fw2": jnp.asarray(np.ascontiguousarray(fc2w.T), jnp.bfloat16),
        "fb2": jnp.asarray(fc2b.reshape(1, 84), jnp.float32),
    }


# ---------------------------------------------------------------------------
# LeNet_Pre forward
# ---------------------------------------------------------------------------

def lenet_pre_forward(x, prep):
    """x: NCHW (B, 1, 32, 32) f32 -> features (B, 84) f32."""
    b = x.shape[0]
    # tb is a multiple of 16 (bf16 sublane tile) so in-kernel leading-dim
    # reshapes stay layout-preserving; b >= 32 gives >= 2 grid steps (v7x TCs).
    tb = 32 if b >= 64 else 16
    b_pad = ((b + tb - 1) // tb) * tb

    x2d = x.reshape(b, 32, 32).astype(jnp.bfloat16)
    if b_pad != b:
        x2d = jnp.pad(x2d, ((0, b_pad - b), (0, 0), (0, 0)))

    p1 = _build_input_bands(x2d, b_pad)                    # (16, B_pad, 192) bf16
    feats = _fused_stage(p1, prep, tb)                     # (B_pad, 84) f32
    return feats[:b]


# ---------------------------------------------------------------------------
# Pure-JAX reference (true f32 semantics of the PyTorch module)
# ---------------------------------------------------------------------------

def lenet_pre_reference(x, params):
    b = x.shape[0]
    xh = jnp.transpose(x.astype(jnp.float32), (0, 2, 3, 1))             # NHWC
    w1 = jnp.transpose(params["w1"], (2, 3, 1, 0))                      # HWIO
    y = jax.lax.conv_general_dilated(xh, w1, (1, 1), "VALID",
                                     dimension_numbers=("NHWC", "HWIO", "NHWC"))
    y = jax.nn.relu(y + params["b1"])
    y = jax.lax.reduce_window(y, -jnp.inf, jax.lax.max,
                              (1, 2, 2, 1), (1, 2, 2, 1), "VALID")
    w2 = jnp.transpose(params["w2"], (2, 3, 1, 0))
    y = jax.lax.conv_general_dilated(y, w2, (1, 1), "VALID",
                                     dimension_numbers=("NHWC", "HWIO", "NHWC"))
    y = jax.nn.relu(y + params["b2"])
    y = jax.lax.reduce_window(y, -jnp.inf, jax.lax.max,
                              (1, 2, 2, 1), (1, 2, 2, 1), "VALID")
    flat = jnp.transpose(y, (0, 3, 1, 2)).reshape(b, 400)               # torch (c,h,w)
    h = jax.nn.relu(flat @ params["fc1_w"].T + params["fc1_b"])
    return jax.nn.relu(h @ params["fc2_w"].T + params["fc2_b"])


if __name__ == "__main__":
    key = jax.random.PRNGKey(0)
    k_param, k_x1, k_x2 = jax.random.split(key, 3)
    params = init_params(k_param)
    prep = prepare_params(params)

    fwd = jax.jit(lenet_pre_forward)
    ref_fn = jax.jit(lenet_pre_reference)

    # Small batch (single grid step).
    x = jax.random.normal(k_x1, (2, 1, 32, 32), jnp.float32)
    feats = jax.block_until_ready(fwd(x, prep))
    ref = jax.block_until_ready(ref_fn(x, params))
    assert feats.shape == (2, 84) and feats.dtype == jnp.float32
    assert bool(jnp.all(feats >= 0.0))                                  # final relu
    # bf16 matmul inputs with f32 accumulation -> loose tolerance vs f32 reference.
    assert bool(jnp.allclose(feats, ref, rtol=0.1, atol=0.05)), (
        "max abs diff %f" % float(jnp.max(jnp.abs(feats - ref))))

    # Odd batch exercising multiple grid steps + padding slice-off.
    x2 = jax.random.normal(k_x2, (19, 1, 32, 32), jnp.float32)
    feats2 = jax.block_until_ready(fwd(x2, prep))
    ref2 = jax.block_until_ready(ref_fn(x2, params))
    assert feats2.shape == (19, 84)
    assert bool(jnp.allclose(feats2, ref2, rtol=0.1, atol=0.05)), (
        "max abs diff %f" % float(jnp.max(jnp.abs(feats2 - ref2))))

    print("KERNEL_OK")
</pallas_src>

<mosaic_0001>
module attributes {stable_mosaic.version = 11 : i64} {
  func.func @_lenet_fused_kernel(%arg0: i32, %arg1: memref<16x16x192xbf16, #tpu.memory_space<vmem>>, %arg2: memref<192x512xbf16, #tpu.memory_space<vmem>>, %arg3: memref<1x128xf32, #tpu.memory_space<vmem>>, %arg4: memref<6x128x512xbf16, #tpu.memory_space<vmem>>, %arg5: memref<1x128xf32, #tpu.memory_space<vmem>>, %arg6: memref<5x128x120xbf16, #tpu.memory_space<vmem>>, %arg7: memref<1x120xf32, #tpu.memory_space<vmem>>, %arg8: memref<120x84xbf16, #tpu.memory_space<vmem>>, %arg9: memref<1x84xf32, #tpu.memory_space<vmem>>, %arg10: memref<16x84xf32, #tpu.memory_space<vmem>>) attributes {dimension_semantics = [#tpu.dimension_semantics<parallel>], iteration_bounds = array<i64: 1>, scalar_prefetch = 0 : i64, scratch_operands = 0 : i64, tpu.core_type = #tpu.core_type<tc>, window_params = [{transform_indices = @transform_0, window_bounds = array<i64: 16, 16, 192>}, {pipeline_mode = #tpu.pipeline_mode<synchronous>, transform_indices = @transform_1, window_bounds = array<i64: 192, 512>}, {pipeline_mode = #tpu.pipeline_mode<synchronous>, transform_indices = @transform_2, window_bounds = array<i64: 1, 128>}, {pipeline_mode = #tpu.pipeline_mode<synchronous>, transform_indices = @transform_3, window_bounds = array<i64: 6, 128, 512>}, {pipeline_mode = #tpu.pipeline_mode<synchronous>, transform_indices = @transform_4, window_bounds = array<i64: 1, 128>}, {pipeline_mode = #tpu.pipeline_mode<synchronous>, transform_indices = @transform_5, window_bounds = array<i64: 5, 128, 120>}, {pipeline_mode = #tpu.pipeline_mode<synchronous>, transform_indices = @transform_6, window_bounds = array<i64: 1, 120>}, {pipeline_mode = #tpu.pipeline_mode<synchronous>, transform_indices = @transform_7, window_bounds = array<i64: 120, 84>}, {pipeline_mode = #tpu.pipeline_mode<synchronous>, transform_indices = @transform_8, window_bounds = array<i64: 1, 84>}, {transform_indices = @transform_9, window_bounds = array<i64: 16, 84>}]} {
    %c0 = arith.constant 0 : index
    %c0_0 = arith.constant 0 : index
    %c0_1 = arith.constant 0 : index
    %0 = vector.load %arg1[%c0, %c0_0, %c0_1] : memref<16x16x192xbf16, #tpu.memory_space<vmem>>, vector<16x16x192xbf16>
    %1 = vector.shape_cast %0 : vector<16x16x192xbf16> to vector<256x192xbf16>
    %c0_2 = arith.constant 0 : index
    %c0_3 = arith.constant 0 : index
    %2 = vector.load %arg2[%c0_2, %c0_3] : memref<192x512xbf16, #tpu.memory_space<vmem>>, vector<192x512xbf16>
    %cst = arith.constant dense<0.000000e+00> : vector<256x512xf32>
    %3 = tpu.matmul %1, %2, %cst {dimension_numbers = #tpu.dot_dimension_numbers<[1], [0], [0], [1], [0, 0, 1, 1], [], []>} : vector<256x192xbf16>, vector<192x512xbf16>, vector<256x512xf32> -> vector<256x512xf32>
    %4 = vector.extract_strided_slice %3 {offsets = [0, 0], sizes = [256, 128], strides = [1, 1]} : vector<256x512xf32> to vector<256x128xf32>
    %5 = vector.extract_strided_slice %3 {offsets = [0, 128], sizes = [256, 128], strides = [1, 1]} : vector<256x512xf32> to vector<256x128xf32>
    %6 = arith.maximumf %4, %5 : vector<256x128xf32>
    %7 = vector.extract_strided_slice %3 {offsets = [0, 256], sizes = [256, 128], strides = [1, 1]} : vector<256x512xf32> to vector<256x128xf32>
    %8 = vector.extract_strided_slice %3 {offsets = [0, 384], sizes = [256, 128], strides = [1, 1]} : vector<256x512xf32> to vector<256x128xf32>
    %9 = arith.maximumf %7, %8 : vector<256x128xf32>
    %10 = arith.maximumf %6, %9 : vector<256x128xf32>
    %c0_4 = arith.constant 0 : index
    %c0_5 = arith.constant 0 : index
    %11 = vector.load %arg3[%c0_4, %c0_5] : memref<1x128xf32, #tpu.memory_space<vmem>>, vector<1x128xf32>
    %12 = vector.broadcast %11 : vector<1x128xf32> to vector<256x128xf32>
    %13 = arith.addf %10, %12 : vector<256x128xf32>
    %cst_6 = arith.constant 0.000000e+00 : f32
    %14 = vector.broadcast %cst_6 : f32 to vector<256x128xf32>
    %15 = arith.maximumf %13, %14 : vector<256x128xf32>
    %16 = vector.shape_cast %15 : vector<256x128xf32> to vector<8x2x16x128xf32>
    %17 = vector.extract_strided_slice %16 {offsets = [0, 0, 0, 0], sizes = [5, 1, 16, 128], strides = [1, 1, 1, 1]} : vector<8x2x16x128xf32> to vector<5x1x16x128xf32>
    %18 = vector.shape_cast %17 : vector<5x1x16x128xf32> to vector<5x16x128xf32>
    %19 = vector.shape_cast %18 : vector<5x16x128xf32> to vector<80x128xf32>
    %20 = arith.truncf %19 : vector<80x128xf32> to vector<80x128xbf16>
    %c0_7 = arith.constant 0 : index
    %c0_8 = arith.constant 0 : index
    %c0_9 = arith.constant 0 : index
    %21 = vector.load %arg4[%c0_7, %c0_8, %c0_9] : memref<6x128x512xbf16, #tpu.memory_space<vmem>>, vector<1x128x512xbf16>
    %22 = vector.shape_cast %21 : vector<1x128x512xbf16> to vector<128x512xbf16>
    %cst_10 = arith.constant dense<0.000000e+00> : vector<80x512xf32>
    %23 = tpu.matmul %20, %22, %cst_10 {dimension_numbers = #tpu.dot_dimension_numbers<[1], [0], [0], [1], [0, 0, 1, 1], [], []>} : vector<80x128xbf16>, vector<128x512xbf16>, vector<80x512xf32> -> vector<80x512xf32>
    %24 = vector.extract_strided_slice %16 {offsets = [0, 1, 0, 0], sizes = [5, 1, 16, 128], strides = [1, 1, 1, 1]} : vector<8x2x16x128xf32> to vector<5x1x16x128xf32>
    %25 = vector.shape_cast %24 : vector<5x1x16x128xf32> to vector<5x16x128xf32>
    %26 = vector.shape_cast %25 : vector<5x16x128xf32> to vector<80x128xf32>
    %27 = arith.truncf %26 : vector<80x128xf32> to vector<80x128xbf16>
    %c1 = arith.constant 1 : index
    %c0_11 = arith.constant 0 : index
    %c0_12 = arith.constant 0 : index
    %28 = vector.load %arg4[%c1, %c0_11, %c0_12] : memref<6x128x512xbf16, #tpu.memory_space<vmem>>, vector<1x128x512xbf16>
    %29 = vector.shape_cast %28 : vector<1x128x512xbf16> to vector<128x512xbf16>
    %cst_13 = arith.constant dense<0.000000e+00> : vector<80x512xf32>
    %30 = tpu.matmul %27, %29, %cst_13 {dimension_numbers = #tpu.dot_dimension_numbers<[1], [0], [0], [1], [0, 0, 1, 1], [], []>} : vector<80x128xbf16>, vector<128x512xbf16>, vector<80x512xf32> -> vector<80x512xf32>
    %31 = arith.addf %23, %30 : vector<80x512xf32>
    %32 = vector.extract_strided_slice %16 {offsets = [1, 0, 0, 0], sizes = [5, 1, 16, 128], strides = [1, 1, 1, 1]} : vector<8x2x16x128xf32> to vector<5x1x16x128xf32>
    %33 = vector.shape_cast %32 : vector<5x1x16x128xf32> to vector<5x16x128xf32>
    %34 = vector.shape_cast %33 : vector<5x16x128xf32> to vector<80x128xf32>
    %35 = arith.truncf %34 : vector<80x128xf32> to vector<80x128xbf16>
    %c2 = arith.constant 2 : index
    %c0_14 = arith.constant 0 : index
    %c0_15 = arith.constant 0 : index
    %36 = vector.load %arg4[%c2, %c0_14, %c0_15] : memref<6x128x512xbf16, #tpu.memory_space<vmem>>, vector<1x128x512xbf16>
    %37 = vector.shape_cast %36 : vector<1x128x512xbf16> to vector<128x512xbf16>
    %cst_16 = arith.constant dense<0.000000e+00> : vector<80x512xf32>
    %38 = tpu.matmul %35, %37, %cst_16 {dimension_numbers = #tpu.dot_dimension_numbers<[1], [0], [0], [1], [0, 0, 1, 1], [], []>} : vector<80x128xbf16>, vector<128x512xbf16>, vector<80x512xf32> -> vector<80x512xf32>
    %39 = arith.addf %31, %38 : vector<80x512xf32>
    %40 = vector.extract_strided_slice %16 {offsets = [1, 1, 0, 0], sizes = [5, 1, 16, 128], strides = [1, 1, 1, 1]} : vector<8x2x16x128xf32> to vector<5x1x16x128xf32>
    %41 = vector.shape_cast %40 : vector<5x1x16x128xf32> to vector<5x16x128xf32>
    %42 = vector.shape_cast %41 : vector<5x16x128xf32> to vector<80x128xf32>
    %43 = arith.truncf %42 : vector<80x128xf32> to vector<80x128xbf16>
    %c3 = arith.constant 3 : index
    %c0_17 = arith.constant 0 : index
    %c0_18 = arith.constant 0 : index
    %44 = vector.load %arg4[%c3, %c0_17, %c0_18] : memref<6x128x512xbf16, #tpu.memory_space<vmem>>, vector<1x128x512xbf16>
    %45 = vector.shape_cast %44 : vector<1x128x512xbf16> to vector<128x512xbf16>
    %cst_19 = arith.constant dense<0.000000e+00> : vector<80x512xf32>
    %46 = tpu.matmul %43, %45, %cst_19 {dimension_numbers = #tpu.dot_dimension_numbers<[1], [0], [0], [1], [0, 0, 1, 1], [], []>} : vector<80x128xbf16>, vector<128x512xbf16>, vector<80x512xf32> -> vector<80x512xf32>
    %47 = arith.addf %39, %46 : vector<80x512xf32>
    %48 = vector.extract_strided_slice %16 {offsets = [2, 0, 0, 0], sizes = [5, 1, 16, 128], strides = [1, 1, 1, 1]} : vector<8x2x16x128xf32> to vector<5x1x16x128xf32>
    %49 = vector.shape_cast %48 : vector<5x1x16x128xf32> to vector<5x16x128xf32>
    %50 = vector.shape_cast %49 : vector<5x16x128xf32> to vector<80x128xf32>
    %51 = arith.truncf %50 : vector<80x128xf32> to vector<80x128xbf16>
    %c4 = arith.constant 4 : index
    %c0_20 = arith.constant 0 : index
    %c0_21 = arith.constant 0 : index
    %52 = vector.load %arg4[%c4, %c0_20, %c0_21] : memref<6x128x512xbf16, #tpu.memory_space<vmem>>, vector<1x128x512xbf16>
    %53 = vector.shape_cast %52 : vector<1x128x512xbf16> to vector<128x512xbf16>
    %cst_22 = arith.constant dense<0.000000e+00> : vector<80x512xf32>
    %54 = tpu.matmul %51, %53, %cst_22 {dimension_numbers = #tpu.dot_dimension_numbers<[1], [0], [0], [1], [0, 0, 1, 1], [], []>} : vector<80x128xbf16>, vector<128x512xbf16>, vector<80x512xf32> -> vector<80x512xf32>
    %55 = arith.addf %47, %54 : vector<80x512xf32>
    %56 = vector.extract_strided_slice %16 {offsets = [2, 1, 0, 0], sizes = [5, 1, 16, 128], strides = [1, 1, 1, 1]} : vector<8x2x16x128xf32> to vector<5x1x16x128xf32>
    %57 = vector.shape_cast %56 : vector<5x1x16x128xf32> to vector<5x16x128xf32>
    %58 = vector.shape_cast %57 : vector<5x16x128xf32> to vector<80x128xf32>
    %59 = arith.truncf %58 : vector<80x128xf32> to vector<80x128xbf16>
    %c5 = arith.constant 5 : index
    %c0_23 = arith.constant 0 : index
    %c0_24 = arith.constant 0 : index
    %60 = vector.load %arg4[%c5, %c0_23, %c0_24] : memref<6x128x512xbf16, #tpu.memory_space<vmem>>, vector<1x128x512xbf16>
    %61 = vector.shape_cast %60 : vector<1x128x512xbf16> to vector<128x512xbf16>
    %cst_25 = arith.constant dense<0.000000e+00> : vector<80x512xf32>
    %62 = tpu.matmul %59, %61, %cst_25 {dimension_numbers = #tpu.dot_dimension_numbers<[1], [0], [0], [1], [0, 0, 1, 1], [], []>} : vector<80x128xbf16>, vector<128x512xbf16>, vector<80x512xf32> -> vector<80x512xf32>
    %63 = arith.addf %55, %62 : vector<80x512xf32>
    %64 = vector.extract_strided_slice %63 {offsets = [0, 0], sizes = [80, 128], strides = [1, 1]} : vector<80x512xf32> to vector<80x128xf32>
    %65 = vector.extract_strided_slice %63 {offsets = [0, 128], sizes = [80, 128], strides = [1, 1]} : vector<80x512xf32> to vector<80x128xf32>
    %66 = arith.maximumf %64, %65 : vector<80x128xf32>
    %67 = vector.extract_strided_slice %63 {offsets = [0, 256], sizes = [80, 128], strides = [1, 1]} : vector<80x512xf32> to vector<80x128xf32>
    %68 = vector.extract_strided_slice %63 {offsets = [0, 384], sizes = [80, 128], strides = [1, 1]} : vector<80x512xf32> to vector<80x128xf32>
    %69 = arith.maximumf %67, %68 : vector<80x128xf32>
    %70 = arith.maximumf %66, %69 : vector<80x128xf32>
    %c0_26 = arith.constant 0 : index
    %c0_27 = arith.constant 0 : index
    %71 = vector.load %arg5[%c0_26, %c0_27] : memref<1x128xf32, #tpu.memory_space<vmem>>, vector<1x128xf32>
    %72 = vector.broadcast %71 : vector<1x128xf32> to vector<80x128xf32>
    %73 = arith.addf %70, %72 : vector<80x128xf32>
    %cst_28 = arith.constant 0.000000e+00 : f32
    %74 = vector.broadcast %cst_28 : f32 to vector<80x128xf32>
    %75 = arith.maximumf %73, %74 : vector<80x128xf32>
    %76 = vector.shape_cast %75 : vector<80x128xf32> to vector<5x16x128xf32>
    %77 = vector.extract_strided_slice %76 {offsets = [0, 0, 0], sizes = [1, 16, 128], strides = [1, 1, 1]} : vector<5x16x128xf32> to vector<1x16x128xf32>
    %78 = vector.shape_cast %77 : vector<1x16x128xf32> to vector<16x128xf32>
    %79 = arith.truncf %78 : vector<16x128xf32> to vector<16x128xbf16>
    %c0_29 = arith.constant 0 : index
    %c0_30 = arith.constant 0 : index
    %c0_31 = arith.constant 0 : index
    %80 = vector.load %arg6[%c0_29, %c0_30, %c0_31] : memref<5x128x120xbf16, #tpu.memory_space<vmem>>, vector<1x128x120xbf16>
    %81 = vector.shape_cast %80 : vector<1x128x120xbf16> to vector<128x120xbf16>
    %cst_32 = arith.constant dense<0.000000e+00> : vector<16x120xf32>
    %82 = tpu.matmul %79, %81, %cst_32 {dimension_numbers = #tpu.dot_dimension_numbers<[1], [0], [0], [1], [0, 0, 1, 1], [], []>} : vector<16x128xbf16>, vector<128x120xbf16>, vector<16x120xf32> -> vector<16x120xf32>
    %83 = vector.extract_strided_slice %76 {offsets = [1, 0, 0], sizes = [1, 16, 128], strides = [1, 1, 1]} : vector<5x16x128xf32> to vector<1x16x128xf32>
    %84 = vector.shape_cast %83 : vector<1x16x128xf32> to vector<16x128xf32>
    %85 = arith.truncf %84 : vector<16x128xf32> to vector<16x128xbf16>
    %c1_33 = arith.constant 1 : index
    %c0_34 = arith.constant 0 : index
    %c0_35 = arith.constant 0 : index
    %86 = vector.load %arg6[%c1_33, %c0_34, %c0_35] : memref<5x128x120xbf16, #tpu.memory_space<vmem>>, vector<1x128x120xbf16>
    %87 = vector.shape_cast %86 : vector<1x128x120xbf16> to vector<128x120xbf16>
    %cst_36 = arith.constant dense<0.000000e+00> : vector<16x120xf32>
    %88 = tpu.matmul %85, %87, %cst_36 {dimension_numbers = #tpu.dot_dimension_numbers<[1], [0], [0], [1], [0, 0, 1, 1], [], []>} : vector<16x128xbf16>, vector<128x120xbf16>, vector<16x120xf32> -> vector<16x120xf32>
    %89 = arith.addf %82, %88 : vector<16x120xf32>
    %90 = vector.extract_strided_slice %76 {offsets = [2, 0, 0], sizes = [1, 16, 128], strides = [1, 1, 1]} : vector<5x16x128xf32> to vector<1x16x128xf32>
    %91 = vector.shape_cast %90 : vector<1x16x128xf32> to vector<16x128xf32>
    %92 = arith.truncf %91 : vector<16x128xf32> to vector<16x128xbf16>
    %c2_37 = arith.constant 2 : index
    %c0_38 = arith.constant 0 : index
    %c0_39 = arith.constant 0 : index
    %93 = vector.load %arg6[%c2_37, %c0_38, %c0_39] : memref<5x128x120xbf16, #tpu.memory_space<vmem>>, vector<1x128x120xbf16>
    %94 = vector.shape_cast %93 : vector<1x128x120xbf16> to vector<128x120xbf16>
    %cst_40 = arith.constant dense<0.000000e+00> : vector<16x120xf32>
    %95 = tpu.matmul %92, %94, %cst_40 {dimension_numbers = #tpu.dot_dimension_numbers<[1], [0], [0], [1], [0, 0, 1, 1], [], []>} : vector<16x128xbf16>, vector<128x120xbf16>, vector<16x120xf32> -> vector<16x120xf32>
    %96 = arith.addf %89, %95 : vector<16x120xf32>
    %97 = vector.extract_strided_slice %76 {offsets = [3, 0, 0], sizes = [1, 16, 128], strides = [1, 1, 1]} : vector<5x16x128xf32> to vector<1x16x128xf32>
    %98 = vector.shape_cast %97 : vector<1x16x128xf32> to vector<16x128xf32>
    %99 = arith.truncf %98 : vector<16x128xf32> to vector<16x128xbf16>
    %c3_41 = arith.constant 3 : index
    %c0_42 = arith.constant 0 : index
    %c0_43 = arith.constant 0 : index
    %100 = vector.load %arg6[%c3_41, %c0_42, %c0_43] : memref<5x128x120xbf16, #tpu.memory_space<vmem>>, vector<1x128x120xbf16>
    %101 = vector.shape_cast %100 : vector<1x128x120xbf16> to vector<128x120xbf16>
    %cst_44 = arith.constant dense<0.000000e+00> : vector<16x120xf32>
    %102 = tpu.matmul %99, %101, %cst_44 {dimension_numbers = #tpu.dot_dimension_numbers<[1], [0], [0], [1], [0, 0, 1, 1], [], []>} : vector<16x128xbf16>, vector<128x120xbf16>, vector<16x120xf32> -> vector<16x120xf32>
    %103 = arith.addf %96, %102 : vector<16x120xf32>
    %104 = vector.extract_strided_slice %76 {offsets = [4, 0, 0], sizes = [1, 16, 128], strides = [1, 1, 1]} : vector<5x16x128xf32> to vector<1x16x128xf32>
    %105 = vector.shape_cast %104 : vector<1x16x128xf32> to vector<16x128xf32>
    %106 = arith.truncf %105 : vector<16x128xf32> to vector<16x128xbf16>
    %c4_45 = arith.constant 4 : index
    %c0_46 = arith.constant 0 : index
    %c0_47 = arith.constant 0 : index
    %107 = vector.load %arg6[%c4_45, %c0_46, %c0_47] : memref<5x128x120xbf16, #tpu.memory_space<vmem>>, vector<1x128x120xbf16>
    %108 = vector.shape_cast %107 : vector<1x128x120xbf16> to vector<128x120xbf16>
    %cst_48 = arith.constant dense<0.000000e+00> : vector<16x120xf32>
    %109 = tpu.matmul %106, %108, %cst_48 {dimension_numbers = #tpu.dot_dimension_numbers<[1], [0], [0], [1], [0, 0, 1, 1], [], []>} : vector<16x128xbf16>, vector<128x120xbf16>, vector<16x120xf32> -> vector<16x120xf32>
    %110 = arith.addf %103, %109 : vector<16x120xf32>
    %c0_49 = arith.constant 0 : index
    %c0_50 = arith.constant 0 : index
    %111 = vector.load %arg7[%c0_49, %c0_50] : memref<1x120xf32, #tpu.memory_space<vmem>>, vector<1x120xf32>
    %112 = vector.broadcast %111 : vector<1x120xf32> to vector<16x120xf32>
    %113 = arith.addf %110, %112 : vector<16x120xf32>
    %cst_51 = arith.constant 0.000000e+00 : f32
    %114 = vector.broadcast %cst_51 : f32 to vector<16x120xf32>
    %115 = arith.maximumf %113, %114 : vector<16x120xf32>
    %116 = arith.truncf %115 : vector<16x120xf32> to vector<16x120xbf16>
    %c0_52 = arith.constant 0 : index
    %c0_53 = arith.constant 0 : index
    %117 = vector.load %arg8[%c0_52, %c0_53] : memref<120x84xbf16, #tpu.memory_space<vmem>>, vector<120x84xbf16>
    %cst_54 = arith.constant dense<0.000000e+00> : vector<16x84xf32>
    %118 = tpu.matmul %116, %117, %cst_54 {dimension_numbers = #tpu.dot_dimension_numbers<[1], [0], [0], [1], [0, 0, 1, 1], [], []>} : vector<16x120xbf16>, vector<120x84xbf16>, vector<16x84xf32> -> vector<16x84xf32>
    %c0_55 = arith.constant 0 : index
    %c0_56 = arith.constant 0 : index
    %119 = vector.load %arg9[%c0_55, %c0_56] : memref<1x84xf32, #tpu.memory_space<vmem>>, vector<1x84xf32>
    %120 = vector.broadcast %119 : vector<1x84xf32> to vector<16x84xf32>
    %121 = arith.addf %118, %120 : vector<16x84xf32>
    %cst_57 = arith.constant 0.000000e+00 : f32
    %122 = vector.broadcast %cst_57 : f32 to vector<16x84xf32>
    %123 = arith.maximumf %121, %122 : vector<16x84xf32>
    %c0_58 = arith.constant 0 : index
    %c0_59 = arith.constant 0 : index
    %124 = vector.load %arg10[%c0_58, %c0_59] : memref<16x84xf32, #tpu.memory_space<vmem>>, vector<16x84xf32>
    tpu.vector_store %arg10[%c0_58, %c0_59], %123 {strides = array<i32>} : memref<16x84xf32, #tpu.memory_space<vmem>>, vector<16x84xf32>,
    return
  }
  func.func @transform_0(%arg0: i32) -> (i32, i32, i32) {
    %c0_i32 = arith.constant 0 : i32
    %c0_i32_0 = arith.constant 0 : i32
    %c0_i32_1 = arith.constant 0 : i32
    return %c0_i32, %arg0, %c0_i32_0 : i32, i32, i32
  }
  func.func @transform_1(%arg0: i32) -> (i32, i32) {
    %c0_i32 = arith.constant 0 : i32
    %c0_i32_0 = arith.constant 0 : i32
    %c0_i32_1 = arith.constant 0 : i32
    return %c0_i32, %c0_i32_0 : i32, i32
  }
  func.func @transform_2(%arg0: i32) -> (i32, i32) {
    %c0_i32 = arith.constant 0 : i32
    %c0_i32_0 = arith.constant 0 : i32
    %c0_i32_1 = arith.constant 0 : i32
    return %c0_i32, %c0_i32_0 : i32, i32
  }
  func.func @transform_3(%arg0: i32) -> (i32, i32, i32) {
    %c0_i32 = arith.constant 0 : i32
    %c0_i32_0 = arith.constant 0 : i32
    %c0_i32_1 = arith.constant 0 : i32
    %c0_i32_2 = arith.constant 0 : i32
    return %c0_i32, %c0_i32_0, %c0_i32_1 : i32, i32, i32
  }
  func.func @transform_4(%arg0: i32) -> (i32, i32) {
    %c0_i32 = arith.constant 0 : i32
    %c0_i32_0 = arith.constant 0 : i32
    %c0_i32_1 = arith.constant 0 : i32
    return %c0_i32, %c0_i32_0 : i32, i32
  }
  func.func @transform_5(%arg0: i32) -> (i32, i32, i32) {
    %c0_i32 = arith.constant 0 : i32
    %c0_i32_0 = arith.constant 0 : i32
    %c0_i32_1 = arith.constant 0 : i32
    %c0_i32_2 = arith.constant 0 : i32
    return %c0_i32, %c0_i32_0, %c0_i32_1 : i32, i32, i32
  }
  func.func @transform_6(%arg0: i32) -> (i32, i32) {
    %c0_i32 = arith.constant 0 : i32
    %c0_i32_0 = arith.constant 0 : i32
    %c0_i32_1 = arith.constant 0 : i32
    return %c0_i32, %c0_i32_0 : i32, i32
  }
  func.func @transform_7(%arg0: i32) -> (i32, i32) {
    %c0_i32 = arith.constant 0 : i32
    %c0_i32_0 = arith.constant 0 : i32
    %c0_i32_1 = arith.constant 0 : i32
    return %c0_i32, %c0_i32_0 : i32, i32
  }
  func.func @transform_8(%arg0: i32) -> (i32, i32) {
    %c0_i32 = arith.constant 0 : i32
    %c0_i32_0 = arith.constant 0 : i32
    %c0_i32_1 = arith.constant 0 : i32
    return %c0_i32, %c0_i32_0 : i32, i32
  }
  func.func @transform_9(%arg0: i32) -> (i32, i32) {
    %c0_i32 = arith.constant 0 : i32
    %c0_i32_0 = arith.constant 0 : i32
    return %arg0, %c0_i32 : i32, i32
  }
}

</mosaic_0001>

<bundles_post_ra>
// kernel: lenet_pre_forward.1
= control target key start
LH: loop header
LB: loop body
LE: loop exit
PB: predicated region body
PF: predicated region fallthrough
CT: control target
= control target key end

     0   :  { %vm497_vm0 = vcmask 523264   ;;  %vm5340_vm1 = vmmov 0   ;;  %vm4070_vm2 = vcmask 1043456   ;;  %vm4066_vm3 = vcmask 982016   ;;  %s7256_s1 = inlined_call_operand.vmem [shape: bf16[192,512], index: 1, kind: input, shape index: {}]   ;;  %s7257_s0 = inlined_call_operand.vmem [shape: bf16[16,16,192], index: 0, kind: input, shape index: {}]   ;;  %s7258_s3 = inlined_call_operand.vmem [shape: bf16[6,128,512], index: 3, kind: input, shape index: {}]   ;;  %s7259_s2 = inlined_call_operand.vmem [shape: f32[1,128], index: 2, kind: input, shape index: {}]   ;;  %s7260_s5 = inlined_call_operand.vmem [shape: bf16[5,128,120], index: 5, kind: input, shape index: {}]   ;;  %s7261_s4 = inlined_call_operand.vmem [shape: f32[1,128], index: 4, kind: input, shape index: {}]   ;;  %s7262_s7 = inlined_call_operand.vmem [shape: bf16[120,84], index: 7, kind: input, shape index: {}]   ;;  %s7263_s6 = inlined_call_operand.vmem [shape: f32[1,120], index: 6, kind: input, shape index: {}]   ;;  %s7264_s8 = inlined_call_operand.vmem [shape: f32[1,84], index: 8, kind: input, shape index: {}]   ;;  %s7265_s9 = inlined_call_operand.vmem [shape: f32[16,84], index: 9, kind: output, shape index: {}]  }
   0x1   :  { %v4882_v0 = vld [vmem:[%s7256_s1 + $0xe4] ss:$16 sps:$4 sm:$0xff]   ;;  %v4884_v1 = vld [vmem:[%s7256_s1 + $0xec] ss:$16 sps:$4 sm:$0xff]   ;;  %v4886_v2 = vld [vmem:[%s7256_s1 + $0xe0] ss:$16 sps:$4 sm:$0xff]  }
   0x2   :  { %546 = vmatprep.subr.bf16.mxu0 %v4882_v0  ;;  %v4887_v3 = vld [vmem:[%s7256_s1 + $0xe8] ss:$16 sps:$4 sm:$0xff]   ;;  %731 = vmatprep.subr.bf16.mxu1 %v4884_v1  ;;  %v4888_v4 = vld [vmem:[%s7256_s1 + $0xc4] ss:$16 sps:$4 sm:$0xff]   ;;  %v4890_v5 = vld [vmem:[%s7256_s1 + $0xcc] ss:$16 sps:$4 sm:$0xff]  }
   0x3   :  { %547 = vmatpush1.bf16.msra.mxu0 %v4886_v2  ;;  %732 = vmatpush1.bf16.msra.mxu1 %v4887_v3  ;;  %v4892_v6 = vld [vmem:[%s7256_s1 + $0xc0] ss:$16 sps:$4 sm:$0xff]   ;;  %v4893_v7 = vld [vmem:[%s7256_s1 + $0xc8] ss:$16 sps:$4 sm:$0xff]   ;;  %v4894_v8 = vld [vmem:[%s7256_s1 + $0xa4] ss:$16 sps:$4 sm:$0xff]  }
   0x4   :  { %548 = vmatprep.subr.bf16.mxu0 %v4888_v4  ;;  %733 = vmatprep.subr.bf16.mxu1 %v4890_v5  ;;  %v4896_v9 = vld [vmem:[%s7256_s1 + $0xac] ss:$16 sps:$4 sm:$0xff]   ;;  %v4898_v10 = vld [vmem:[%s7256_s1 + $0xa0] ss:$16 sps:$4 sm:$0xff]   ;;  %v4899_v11 = vld [vmem:[%s7256_s1 + $0xa8] ss:$16 sps:$4 sm:$0xff]  }
   0x5   :  { %v4900_v12 = vld [vmem:[%s7256_s1 + $0x84] ss:$16 sps:$4 sm:$0xff]   ;;  %v4902_v13 = vld [vmem:[%s7256_s1 + $0x8c] ss:$16 sps:$4 sm:$0xff]   ;;  %v4904_v14 = vld [vmem:[%s7256_s1 + $0x80] ss:$16 sps:$4 sm:$0xff]  }
   0x6   :  { %v4905_v15 = vld [vmem:[%s7256_s1 + $0x88] ss:$16 sps:$4 sm:$0xff]   ;;  %v4906_v16 = vld [vmem:[%s7256_s1 + $0x64] ss:$16 sps:$4 sm:$0xff]   ;;  %v4908_v17 = vld [vmem:[%s7256_s1 + $0x6c] ss:$16 sps:$4 sm:$0xff]  }
   0x7   :  { %549 = vmatpush1.bf16.msra.mxu0 %v4892_v6  ;;  %734 = vmatpush1.bf16.msra.mxu1 %v4893_v7  ;;  %v4910_v18 = vld [vmem:[%s7256_s1 + $0x60] ss:$16 sps:$4 sm:$0xff]   ;;  %v4911_v19 = vld [vmem:[%s7256_s1 + $0x68] ss:$16 sps:$4 sm:$0xff]   ;;  %v4912_v20 = vld [vmem:[%s7256_s1 + $0x44] ss:$16 sps:$4 sm:$0xff]  }
   0x8   :  { %550 = vmatprep.subr.bf16.mxu0 %v4894_v8  ;;  %735 = vmatprep.subr.bf16.mxu1 %v4896_v9  ;;  %v4914_v21 = vld [vmem:[%s7256_s1 + $0x4c] ss:$16 sps:$4 sm:$0xff]   ;;  %v4916_v22 = vld [vmem:[%s7256_s1 + $0x40] ss:$16 sps:$4 sm:$0xff]   ;;  %v4917_v23 = vld [vmem:[%s7256_s1 + $0x48] ss:$16 sps:$4 sm:$0xff]  }
   0x9   :  { %v4918_v24 = vld [vmem:[%s7256_s1 + $0x24] ss:$16 sps:$4 sm:$0xff]   ;;  %v4920_v25 = vld [vmem:[%s7256_s1 + $0x2c] ss:$16 sps:$4 sm:$0xff]   ;;  %v4922_v26 = vld [vmem:[%s7256_s1 + $0x20] ss:$16 sps:$4 sm:$0xff]  }
   0xa   :  { %v4923_v27 = vld [vmem:[%s7256_s1 + $0x28] ss:$16 sps:$4 sm:$0xff]   ;;  %v4924_v28 = vld [vmem:[%s7256_s1 + $0x4] ss:$16 sps:$4 sm:$0xff]   ;;  %v4926_v29 = vld [vmem:[%s7256_s1 + $0xc] ss:$16 sps:$4 sm:$0xff]  }
   0xb   :  { %551 = vmatpush1.bf16.msra.mxu0 %v4898_v10  ;;  %736 = vmatpush1.bf16.msra.mxu1 %v4899_v11  ;;  %v4928_v30 = vld [vmem:[%s7256_s1] ss:$16 sps:$4 sm:$0xff]   ;;  %v4929_v31 = vld [vmem:[%s7256_s1 + $0x8] ss:$16 sps:$4 sm:$0xff]   ;;  %v4930_v32 = vld [vmem:[%s7256_s1 + $0x164] ss:$16 sps:$4 sm:$0xff]  }
   0xc   :  { %552 = vmatprep.subr.bf16.mxu0 %v4900_v12  ;;  %737 = vmatprep.subr.bf16.mxu1 %v4902_v13  ;;  %v4932_v33 = vld [vmem:[%s7256_s1 + $0x16c] ss:$16 sps:$4 sm:$0xff]   ;;  %v4934_v34 = vld [vmem:[%s7256_s1 + $0x160] ss:$16 sps:$4 sm:$0xff]   ;;  %v4935_v35 = vld [vmem:[%s7256_s1 + $0x168] ss:$16 sps:$4 sm:$0xff]  }
   0xd   :  { %v4936_v36 = vld [vmem:[%s7256_s1 + $0x144] ss:$16 sps:$4 sm:$0xff]   ;;  %v4938_v37 = vld [vmem:[%s7256_s1 + $0x14c] ss:$16 sps:$4 sm:$0xff]   ;;  %v4940_v39 = vld [vmem:[%s7256_s1 + $0x140] ss:$16 sps:$4 sm:$0xff]  }
   0xe   :  { %v4956_v38 = vld [vmem:[%s7257_s0 + $0x4] ss:$8 sps:$4 sm:$0xff]   ;;  %v4941_v40 = vld [vmem:[%s7256_s1 + $0x148] ss:$16 sps:$4 sm:$0xff]   ;;  %v4946_v43 = vld [vmem:[%s7256_s1 + $0x120] ss:$16 sps:$4 sm:$0xff]  }
   0xf   :  { %553 = vmatpush1.bf16.msra.mxu0 %v4904_v14  ;;  %738 = vmatpush1.bf16.msra.mxu1 %v4905_v15  ;;  %v4942_v41 = vld [vmem:[%s7256_s1 + $0x124] ss:$16 sps:$4 sm:$0xff]   ;;  %v4944_v42 = vld [vmem:[%s7256_s1 + $0x12c] ss:$16 sps:$4 sm:$0xff]   ;;  %v4947_v44 = vld [vmem:[%s7256_s1 + $0x128] ss:$16 sps:$4 sm:$0xff]  }
  0x10   :  { %554 = vmatprep.subr.bf16.mxu0 %v4906_v16  ;;  %739 = vmatprep.subr.bf16.mxu1 %v4908_v17  ;;  %v4948_v45 = vld [vmem:[%s7256_s1 + $0x104] ss:$16 sps:$4 sm:$0xff]   ;;  %v4950_v46 = vld [vmem:[%s7256_s1 + $0x10c] ss:$16 sps:$4 sm:$0xff]   ;;  %v4952_v47 = vld [vmem:[%s7256_s1 + $0x100] ss:$16 sps:$4 sm:$0xff]  }
  0x11   :  { %4204 = vmatprep.mubr.msk.bf16.mxu0 %vm497_vm0, %v4956_v38  ;;  %4220 = vmatprep.mubr.msk.bf16.mxu1 %vm497_vm0, %v4956_v38  ;;  %v4953_v48 = vld [vmem:[%s7256_s1 + $0x108] ss:$16 sps:$4 sm:$0xff]   ;;  %v4986_v50 = vld [vmem:[%s7258_s3 + $0x1e4] ss:$16 sps:$4 sm:$0xff]   ;;  %v4989_v52 = vld [vmem:[%s7258_s3 + $0x1ec] ss:$16 sps:$4 sm:$0xff]  }
  0x12   :  { %v4954_v49 = vld [vmem:[%s7257_s0] ss:$8 sps:$4 sm:$0xff]   ;;  %v4957_v51 = vld [vmem:[%s7257_s0 + $0x14] ss:$8 sps:$4 sm:$0xff]   ;;  %v4959_v61 = vld [vmem:[%s7257_s0 + $0x10] ss:$8 sps:$4 sm:$0xff]  }
  0x13   :  { %555 = vmatpush1.bf16.msra.mxu0 %v4910_v18  ;;  %740 = vmatpush1.bf16.msra.mxu1 %v4911_v19  ;;  %v4984_v53 = vld [vmem:[%s7258_s3 + $0x1e0] ss:$16 sps:$4 sm:$0xff]   ;;  %v4987_v54 = vld [vmem:[%s7258_s3 + $0x1e8] ss:$16 sps:$4 sm:$0xff]   ;;  %v4992_v55 = vld [vmem:[%s7258_s3 + $0x1c4] ss:$16 sps:$4 sm:$0xff]  }
  0x14   :  { %556 = vmatprep.subr.bf16.mxu0 %v4912_v20  ;;  %741 = vmatprep.subr.bf16.mxu1 %v4914_v21  ;;  %v4995_v56 = vld [vmem:[%s7258_s3 + $0x1cc] ss:$16 sps:$4 sm:$0xff]   ;;  %v4990_v57 = vld [vmem:[%s7258_s3 + $0x1c0] ss:$16 sps:$4 sm:$0xff]   ;;  %v4993_v58 = vld [vmem:[%s7258_s3 + $0x1c8] ss:$16 sps:$4 sm:$0xff]  }
  0x15   :  { %v5001_v59 = vld [vmem:[%s7258_s3 + $0x1a4] ss:$16 sps:$4 sm:$0xff]   ;;  %v5004_v60 = vld [vmem:[%s7258_s3 + $0x1ac] ss:$16 sps:$4 sm:$0xff]   ;;  %v4999_v63 = vld [vmem:[%s7258_s3 + $0x1a0] ss:$16 sps:$4 sm:$0xff]  }
  0x16   :  { %v4960_v62 = vld [vmem:[%s7257_s0 + $0x24] ss:$8 sps:$4 sm:$0xff]   ;;  %v5002_v0 = vld [vmem:[%s7258_s3 + $0x1a8] ss:$16 sps:$4 sm:$0xff]   ;;  %v5005_v3 = vld [vmem:[%s7258_s3 + $0x180] ss:$16 sps:$4 sm:$0xff]  }
  0x17   :  { %557 = vmatpush1.bf16.msra.mxu0 %v4916_v22  ;;  %742 = vmatpush1.bf16.msra.mxu1 %v4917_v23  ;;  %v5007_v1 = vld [vmem:[%s7258_s3 + $0x184] ss:$16 sps:$4 sm:$0xff]   ;;  %v5010_v2 = vld [vmem:[%s7258_s3 + $0x18c] ss:$16 sps:$4 sm:$0xff]   ;;  %v4962_v4 = vld [vmem:[%s7257_s0 + $0x20] ss:$8 sps:$4 sm:$0xff]  }
  0x18   :  { %558 = vmatprep.subr.bf16.mxu0 %v4918_v24  ;;  %743 = vmatprep.subr.bf16.mxu1 %v4920_v25  ;;  %v5008_v5 = vld [vmem:[%s7258_s3 + $0x188] ss:$16 sps:$4 sm:$0xff]   ;;  %v4963_v6 = vld [vmem:[%s7257_s0 + $0x34] ss:$8 sps:$4 sm:$0xff]   ;;  %v5016_v9 = vld [vmem:[%s7258_s3 + $0x160] ss:$16 sps:$4 sm:$0xff]  }
  0x19   :  { %v5018_v7 = vld [vmem:[%s7258_s3 + $0x164] ss:$16 sps:$4 sm:$0xff]   ;;  %v5021_v8 = vld [vmem:[%s7258_s3 + $0x16c] ss:$16 sps:$4 sm:$0xff]   ;;  %v5019_v10 = vld [vmem:[%s7258_s3 + $0x168] ss:$16 sps:$4 sm:$0xff]  }
  0x1a   :  { %v4965_v11 = vld [vmem:[%s7257_s0 + $0x30] ss:$8 sps:$4 sm:$0xff]   ;;  %v4966_v12 = vld [vmem:[%s7257_s0 + $0x44] ss:$8 sps:$4 sm:$0xff]   ;;  %v4968_v13 = vld [vmem:[%s7257_s0 + $0x40] ss:$8 sps:$4 sm:$0xff]  }
  0x1b   :  { %559 = vmatpush1.bf16.msra.mxu0 %v4922_v26  ;;  %744 = vmatpush1.bf16.msra.mxu1 %v4923_v27  ;;  %v4969_v14 = vld [vmem:[%s7257_s0 + $0x54] ss:$8 sps:$4 sm:$0xff]   ;;  %v4971_v15 = vld [vmem:[%s7257_s0 + $0x50] ss:$8 sps:$4 sm:$0xff]   ;;  %v4972_v16 = vld [vmem:[%s7257_s0 + $0x64] ss:$8 sps:$4 sm:$0xff]  }
  0x1c   :  { %560 = vmatprep.subr.bf16.mxu0 %v4924_v28  ;;  %745 = vmatprep.subr.bf16.mxu1 %v4926_v29  ;;  %v4974_v17 = vld [vmem:[%s7257_s0 + $0x60] ss:$8 sps:$4 sm:$0xff]   ;;  %v4975_v18 = vld [vmem:[%s7257_s0 + $0x74] ss:$8 sps:$4 sm:$0xff]   ;;  %v4977_v19 = vld [vmem:[%s7257_s0 + $0x70] ss:$8 sps:$4 sm:$0xff]  }
  0x1d   :  { %v4978_v20 = vld [vmem:[%s7257_s0 + $0x84] ss:$8 sps:$4 sm:$0xff]   ;;  %v4980_v21 = vld [vmem:[%s7257_s0 + $0x80] ss:$8 sps:$4 sm:$0xff]   ;;  %v4981_v22 = vld [vmem:[%s7257_s0 + $0x94] ss:$8 sps:$4 sm:$0xff]  }
  0x1e   :  { %v4983_v23 = vld [vmem:[%s7257_s0 + $0x90] ss:$8 sps:$4 sm:$0xff]   ;;  %v4996_v24 = vld [vmem:[%s7257_s0 + $0xa4] ss:$8 sps:$4 sm:$0xff]   ;;  %v4998_v27 = vld [vmem:[%s7257_s0 + $0xa0] ss:$8 sps:$4 sm:$0xff]  }
  0x1f   :  { %561 = vmatpush1.bf16.msra.mxu0 %v4928_v30  ;;  %746 = vmatpush1.bf16.msra.mxu1 %v4929_v31  ;;  %v5030_v25 = vld [vmem:[%s7258_s3 + $0x144] ss:$16 sps:$4 sm:$0xff]   ;;  %v5033_v26 = vld [vmem:[%s7258_s3 + $0x14c] ss:$16 sps:$4 sm:$0xff]   ;;  %v5028_v28 = vld [vmem:[%s7258_s3 + $0x140] ss:$16 sps:$4 sm:$0xff]  }
  0x20   :  { %570 = vmatprep.subr.bf16.mxu0 %v4930_v32  ;;  %755 = vmatprep.subr.bf16.mxu1 %v4932_v33  ;;  %v5031_v29 = vld [vmem:[%s7258_s3 + $0x148] ss:$16 sps:$4 sm:$0xff]   ;;  %v5011_v30 = vld [vmem:[%s7257_s0 + $0xb4] ss:$8 sps:$4 sm:$0xff]   ;;  %v5038_v33 = vld [vmem:[%s7258_s3 + $0x120] ss:$16 sps:$4 sm:$0xff]  }
  0x21   :  { %v5040_v31 = vld [vmem:[%s7258_s3 + $0x124] ss:$16 sps:$4 sm:$0xff]   ;;  %v5043_v32 = vld [vmem:[%s7258_s3 + $0x12c] ss:$16 sps:$4 sm:$0xff]   ;;  %v5044_v38 = vld [vmem:[%s7258_s3 + $0x100] ss:$16 sps:$4 sm:$0xff]  }
  0x22   :  { %vm4117_vm4 = vcmask 687104  }
  0x23   :  { %571 = vmatpush2.bf16.msra.mxu0 %v4934_v34  ;;  %756 = vmatpush2.bf16.msra.mxu1 %v4935_v35  ;;  %v5041_v34 = vld [vmem:[%s7258_s3 + $0x128] ss:$16 sps:$4 sm:$0xff]   ;;  %v5046_v35 = vld [vmem:[%s7258_s3 + $0x104] ss:$16 sps:$4 sm:$0xff]  }
  0x24   :  { %572 = vmatprep.subr.bf16.mxu0 %v4936_v36  ;;  %757 = vmatprep.subr.bf16.mxu1 %v4938_v37  ;;  %v5049_v36 = vld [vmem:[%s7258_s3 + $0x10c] ss:$16 sps:$4 sm:$0xff]   ;;  %v5013_v37 = vld [vmem:[%s7257_s0 + $0xb0] ss:$8 sps:$4 sm:$0xff]  }
  0x27   :  { %573 = vmatpush2.bf16.msra.mxu0 %v4940_v39  ;;  %758 = vmatpush2.bf16.msra.mxu1 %v4941_v40  ;;  %v5047_v39 = vld [vmem:[%s7258_s3 + $0x108] ss:$16 sps:$4 sm:$0xff]   ;;  %v5014_v40 = vld [vmem:[%s7257_s0 + $0xc4] ss:$8 sps:$4 sm:$0xff]  }
  0x28   :  { %574 = vmatprep.subr.bf16.mxu0 %v4942_v41  ;;  %759 = vmatprep.subr.bf16.mxu1 %v4944_v42  ;;  %v5022_v41 = vld [vmem:[%s7257_s0 + $0xc0] ss:$8 sps:$4 sm:$0xff]   ;;  %v5023_v42 = vld [vmem:[%s7257_s0 + $0xd4] ss:$8 sps:$4 sm:$0xff]  }
  0x2b   :  { %575 = vmatpush2.bf16.msra.mxu0 %v4946_v43  ;;  %760 = vmatpush2.bf16.msra.mxu1 %v4947_v44  ;;  %v5025_v43 = vld [vmem:[%s7257_s0 + $0xd0] ss:$8 sps:$4 sm:$0xff]   ;;  %v5026_v44 = vld [vmem:[%s7257_s0 + $0xe4] ss:$8 sps:$4 sm:$0xff]  }
  0x2c   :  { %576 = vmatprep.subr.bf16.mxu0 %v4948_v45  ;;  %761 = vmatprep.subr.bf16.mxu1 %v4950_v46  ;;  %v5034_v45 = vld [vmem:[%s7257_s0 + $0xe0] ss:$8 sps:$4 sm:$0xff]   ;;  %v5035_v46 = vld [vmem:[%s7257_s0 + $0xf4] ss:$8 sps:$4 sm:$0xff]  }
  0x2f   :  { %577 = vmatpush2.bf16.msra.mxu0 %v4952_v47  ;;  %762 = vmatpush2.bf16.msra.mxu1 %v4953_v48  ;;  %v5037_v47 = vld [vmem:[%s7257_s0 + $0xf0] ss:$8 sps:$4 sm:$0xff]   ;;  %v5338_v48 = vmov 0  }
  0x30   :  { %1298 = vmatprep.subr.bf16.mxu0 %v4986_v50  ;;  %1381 = vmatprep.subr.bf16.mxu1 %v4989_v52  ;;  %v5055_v50 = vld [vmem:[%s7258_s3 + $0xec] ss:$16 sps:$4 sm:$0xff]  }
  0x32   :  { %579 = vmatmul.mubr.bf16.vlgmr.msra.gmra.mxu0 %v4954_v49  ;;  %764 = vmatmul.mubr.bf16.vlgmr.msra.gmra.mxu1 %v4954_v49  ;;  %v5052_v49 = vld [vmem:[%s7258_s3 + $0xe4] ss:$16 sps:$4 sm:$0xff]  }
  0x33   :  { %4205 = vmatprep.mubr.msk.bf16.mxu0 %vm497_vm0, %v4957_v51  ;;  %4221 = vmatprep.mubr.msk.bf16.mxu1 %vm497_vm0, %v4957_v51 }
  0x34   :  { %1299 = vmatpush1.bf16.msra.mxu0 %v4984_v53  ;;  %1382 = vmatpush1.bf16.msra.mxu1 %v4987_v54 }
  0x35   :  { %1300 = vmatprep.subr.bf16.mxu0 %v4992_v55  ;;  %1383 = vmatprep.subr.bf16.mxu1 %v4995_v56 }
  0x38   :  { %1301 = vmatpush1.bf16.msra.mxu0 %v4990_v57  ;;  %1384 = vmatpush1.bf16.msra.mxu1 %v4993_v58 }
  0x39   :  { %1302 = vmatprep.subr.bf16.mxu0 %v5001_v59  ;;  %1385 = vmatprep.subr.bf16.mxu1 %v5004_v60  ;;  %v5770_v60 = vld [vmem:[%s7259_s2] ss:$0 sm:$0xff] }
  0x3a   :  { %589 = vmatmul.mubr.bf16.gmra.mxu0 %v4959_v61  ;;  %774 = vmatmul.mubr.bf16.gmra.mxu1 %v4959_v61 }
  0x3b   :  { %4206 = vmatprep.mubr.msk.bf16.mxu0 %vm497_vm0, %v4960_v62  ;;  %4222 = vmatprep.mubr.msk.bf16.mxu1 %vm497_vm0, %v4960_v62 }
  0x3c   :  { %1303 = vmatpush1.bf16.msra.mxu0 %v4999_v63  ;;  %1386 = vmatpush1.bf16.msra.mxu1 %v5002_v0 }
  0x3d   :  { %1304 = vmatprep.subr.bf16.mxu0 %v5007_v1  ;;  %1387 = vmatprep.subr.bf16.mxu1 %v5010_v2 }
  0x40   :  { %1305 = vmatpush1.bf16.msra.mxu0 %v5005_v3  ;;  %1388 = vmatpush1.bf16.msra.mxu1 %v5008_v5 }
  0x41   :  { %1306 = vmatprep.subr.bf16.mxu0 %v5018_v7  ;;  %1389 = vmatprep.subr.bf16.mxu1 %v5021_v8 }
  0x42   :  { %599 = vmatmul.mubr.bf16.gmra.mxu0 %v4962_v4  ;;  %784 = vmatmul.mubr.bf16.gmra.mxu1 %v4962_v4 }
  0x43   :  { %4207 = vmatprep.mubr.msk.bf16.mxu0 %vm497_vm0, %v4963_v6  ;;  %4223 = vmatprep.mubr.msk.bf16.mxu1 %vm497_vm0, %v4963_v6 }
  0x44   :  { %1307 = vmatpush1.bf16.msra.mxu0 %v5016_v9  ;;  %1390 = vmatpush1.bf16.msra.mxu1 %v5019_v10 }
  0x45   :  { %1308 = vmatprep.subr.bf16.mxu0 %v5030_v25  ;;  %1391 = vmatprep.subr.bf16.mxu1 %v5033_v26 }
  0x48   :  { %1309 = vmatpush1.bf16.msra.mxu0 %v5028_v28  ;;  %1392 = vmatpush1.bf16.msra.mxu1 %v5031_v29 }
  0x49   :  { %1310 = vmatprep.subr.bf16.mxu0 %v5040_v31  ;;  %1393 = vmatprep.subr.bf16.mxu1 %v5043_v32 }
  0x4a   :  { %609 = vmatmul.mubr.bf16.gmra.mxu0 %v4965_v11  ;;  %794 = vmatmul.mubr.bf16.gmra.mxu1 %v4965_v11 }
  0x4b   :  { %4208 = vmatprep.mubr.msk.bf16.mxu0 %vm497_vm0, %v4966_v12  ;;  %4224 = vmatprep.mubr.msk.bf16.mxu1 %vm497_vm0, %v4966_v12 }
  0x4c   :  { %1311 = vmatpush1.bf16.msra.mxu0 %v5038_v33  ;;  %1394 = vmatpush1.bf16.msra.mxu1 %v5041_v34 }
  0x4d   :  { %1312 = vmatprep.subr.bf16.mxu0 %v5046_v35  ;;  %1395 = vmatprep.subr.bf16.mxu1 %v5049_v36 }
  0x50   :  { %1313 = vmatpush1.bf16.msra.mxu0 %v5044_v38  ;;  %1396 = vmatpush1.bf16.msra.mxu1 %v5047_v39  ;;  %v5050_v39 = vld [vmem:[%s7258_s3 + $0xe0] ss:$16 sps:$4 sm:$0xff]  }
  0x51   :  { %1624 = vmatprep.subr.bf16.mxu0 %v5052_v49  ;;  %1707 = vmatprep.subr.bf16.mxu1 %v5055_v50 }
  0x52   :  { %619 = vmatmul.mubr.bf16.gmra.mxu0 %v4968_v13  ;;  %804 = vmatmul.mubr.bf16.gmra.mxu1 %v4968_v13 }
  0x53   :  { %4209 = vmatprep.mubr.msk.bf16.mxu0 %vm497_vm0, %v4969_v14  ;;  %4225 = vmatprep.mubr.msk.bf16.mxu1 %vm497_vm0, %v4969_v14 }
  0x5a   :  { %629 = vmatmul.mubr.bf16.gmra.mxu0 %v4971_v15  ;;  %814 = vmatmul.mubr.bf16.gmra.mxu1 %v4971_v15 }
  0x5b   :  { %4210 = vmatprep.mubr.msk.bf16.mxu0 %vm497_vm0, %v4972_v16  ;;  %4226 = vmatprep.mubr.msk.bf16.mxu1 %vm497_vm0, %v4972_v16 }
  0x62   :  { %639 = vmatmul.mubr.bf16.gmra.mxu0 %v4974_v17  ;;  %824 = vmatmul.mubr.bf16.gmra.mxu1 %v4974_v17 }
  0x63   :  { %4211 = vmatprep.mubr.msk.bf16.mxu0 %vm497_vm0, %v4975_v18  ;;  %4227 = vmatprep.mubr.msk.bf16.mxu1 %vm497_vm0, %v4975_v18 }
  0x6a   :  { %649 = vmatmul.mubr.bf16.gmra.mxu0 %v4977_v19  ;;  %834 = vmatmul.mubr.bf16.gmra.mxu1 %v4977_v19 }
  0x6b   :  { %4212 = vmatprep.mubr.msk.bf16.mxu0 %vm497_vm0, %v4978_v20  ;;  %4228 = vmatprep.mubr.msk.bf16.mxu1 %vm497_vm0, %v4978_v20 }
  0x72   :  { %659 = vmatmul.mubr.bf16.gmra.mxu0 %v4980_v21  ;;  %844 = vmatmul.mubr.bf16.gmra.mxu1 %v4980_v21 }
  0x73   :  { %4213 = vmatprep.mubr.msk.bf16.mxu0 %vm497_vm0, %v4981_v22  ;;  %4229 = vmatprep.mubr.msk.bf16.mxu1 %vm497_vm0, %v4981_v22 }
  0x7a   :  { %669 = vmatmul.mubr.bf16.gmra.mxu0 %v4983_v23  ;;  %854 = vmatmul.mubr.bf16.gmra.mxu1 %v4983_v23 }
  0x7b   :  { %4214 = vmatprep.mubr.msk.bf16.mxu0 %vm497_vm0, %v4996_v24  ;;  %4230 = vmatprep.mubr.msk.bf16.mxu1 %vm497_vm0, %v4996_v24 }
  0x82   :  { %679 = vmatmul.mubr.bf16.gmra.mxu0 %v4998_v27  ;;  %864 = vmatmul.mubr.bf16.gmra.mxu1 %v4998_v27 }
  0x83   :  { %4215 = vmatprep.mubr.msk.bf16.mxu0 %vm497_vm0, %v5011_v30  ;;  %4231 = vmatprep.mubr.msk.bf16.mxu1 %vm497_vm0, %v5011_v30 }
  0x8a   :  { %689 = vmatmul.mubr.bf16.gmra.mxu0 %v5013_v37  ;;  %874 = vmatmul.mubr.bf16.gmra.mxu1 %v5013_v37 }
  0x8b   :  { %4216 = vmatprep.mubr.msk.bf16.mxu0 %vm497_vm0, %v5014_v40  ;;  %4232 = vmatprep.mubr.msk.bf16.mxu1 %vm497_vm0, %v5014_v40  ;;  %v5053_v40 = vld [vmem:[%s7258_s3 + $0xe8] ss:$16 sps:$4 sm:$0xff]  }
  0x92   :  { %699 = vmatmul.mubr.bf16.gmra.mxu0 %v5022_v41  ;;  %884 = vmatmul.mubr.bf16.gmra.mxu1 %v5022_v41 }
  0x93   :  { %4217 = vmatprep.mubr.msk.bf16.mxu0 %vm497_vm0, %v5023_v42  ;;  %4233 = vmatprep.mubr.msk.bf16.mxu1 %vm497_vm0, %v5023_v42 }
  0x9a   :  { %709 = vmatmul.mubr.bf16.gmra.mxu0 %v5025_v43  ;;  %894 = vmatmul.mubr.bf16.gmra.mxu1 %v5025_v43  ;;  %v5058_v43 = vld [vmem:[%s7258_s3 + $0xc4] ss:$16 sps:$4 sm:$0xff]  }
  0x9b   :  { %4218 = vmatprep.mubr.msk.bf16.mxu0 %vm497_vm0, %v5026_v44  ;;  %4234 = vmatprep.mubr.msk.bf16.mxu1 %vm497_vm0, %v5026_v44  ;;  %v5061_v44 = vld [vmem:[%s7258_s3 + $0xcc] ss:$16 sps:$4 sm:$0xff]  }
  0xa2   :  { %719 = vmatmul.mubr.bf16.gmra.mxu0 %v5034_v45  ;;  %904 = vmatmul.mubr.bf16.gmra.mxu1 %v5034_v45 }
  0xa3   :  { %4219 = vmatprep.mubr.msk.bf16.mxu0 %vm497_vm0, %v5035_v46  ;;  %4235 = vmatprep.mubr.msk.bf16.mxu1 %vm497_vm0, %v5035_v46 }
  0xaa   :  { %725 = vmatmul.mubr.bf16.gmra.mxu0 %v5037_v47  ;;  %910 = vmatmul.mubr.bf16.gmra.mxu1 %v5037_v47 }
  0xab   :  { %1330 = vmatprep.mubr.bf16.mxu0 %v5338_v48  ;;  %1413 = vmatprep.mubr.bf16.mxu1 %v5338_v48 }
  0xf2   :  { %v580_v51 = vpop.f32.mrf.mxu0  ;;  %v765_v52 = vpop.f32.mrf.mxu1 }
  0xf4   :  { %v582_v53 = vpop.f32.mrf.mxu0  ;;  %v767_v54 = vpop.f32.mrf.mxu1 }
  0xf5   :  { %v916_v55 = vmax.f32 %v580_v51, %v582_v53  ;;  %v944_v56 = vmax.f32 %v765_v52, %v767_v54  ;;  %v5056_v53 = vld [vmem:[%s7258_s3 + $0xc0] ss:$16 sps:$4 sm:$0xff]   ;;  %v5059_v54 = vld [vmem:[%s7258_s3 + $0xc8] ss:$16 sps:$4 sm:$0xff]  }
  0xf6   :  { %v584_v57 = vpop.f32.mrf.mxu0  ;;  %v769_v58 = vpop.f32.mrf.mxu1 }
  0xf7   :  { %v972_v59 = vmax.f32 %v916_v55, %v944_v56 }
  0xf8   :  { %v586_v61 = vpop.f32.mrf.mxu0  ;;  %v771_v62 = vpop.f32.mrf.mxu1 }
  0xf9   :  { %v917_v63 = vmax.f32 %v584_v57, %v586_v61  ;;  %v945_v0 = vmax.f32 %v769_v58, %v771_v62  ;;  %v1007_v3 = vadd.f32 %v5770_v60, %v972_v59  ;;  %v5064_v57 = vld [vmem:[%s7258_s3 + $0xa4] ss:$16 sps:$4 sm:$0xff]   ;;  %v5067_v58 = vld [vmem:[%s7258_s3 + $0xac] ss:$16 sps:$4 sm:$0xff]  }
  0xfa   :  { %v590_v1 = vpop.f32.mrf.mxu0  ;;  %v775_v2 = vpop.f32.mrf.mxu1 }
  0xfb   :  { %v973_v4 = vmax.f32 %v917_v63, %v945_v0  ;;  %v1035_v12 = vmax.f32 %v1007_v3, 0.0  ;;  %v5062_v3 = vld [vmem:[%s7258_s3 + $0xa0] ss:$16 sps:$4 sm:$0xff]  }
  0xfc   :  { %v592_v5 = vpop.f32.mrf.mxu0  ;;  %v777_v6 = vpop.f32.mrf.mxu1 }
  0xfd   :  { %v1008_v7 = vadd.f32 %v5770_v60, %v973_v4  ;;  %v918_v8 = vmax.f32 %v590_v1, %v592_v5  ;;  %v946_v9 = vmax.f32 %v775_v2, %v777_v6  ;;  %v5065_v4 = vld [vmem:[%s7258_s3 + $0xa8] ss:$16 sps:$4 sm:$0xff]  }
  0xfe   :  { %v594_v10 = vpop.f32.mrf.mxu0  ;;  %v779_v11 = vpop.f32.mrf.mxu1 }
  0xff   :  { %v1036_v13 = vmax.f32 %v1008_v7, 0.0  ;;  %v974_v14 = vmax.f32 %v918_v8, %v946_v9  ;;  %v5070_v7 = vld [vmem:[%s7258_s3 + $0x84] ss:$16 sps:$4 sm:$0xff]   ;;  %v5073_v8 = vld [vmem:[%s7258_s3 + $0x8c] ss:$16 sps:$4 sm:$0xff]  }
 0x100   :  { %v596_v15 = vpop.f32.mrf.mxu0  ;;  %v781_v16 = vpop.f32.mrf.mxu1 }
 0x101   :  { %v5774_v17 = vpack.c.bf16 %v1036_v13, %v1035_v12  ;;  %v919_v18 = vmax.f32 %v594_v10, %v596_v15  ;;  %v947_v19 = vmax.f32 %v779_v11, %v781_v16  ;;  %v1009_v22 = vadd.f32 %v5770_v60, %v974_v14 }
 0x102   :  { %v600_v20 = vpop.f32.mrf.mxu0  ;;  %v785_v21 = vpop.f32.mrf.mxu1 }
 0x103   :  { %v975_v23 = vmax.f32 %v919_v18, %v947_v19  ;;  %v1037_v31 = vmax.f32 %v1009_v22, 0.0  ;;  %v5068_v18 = vld [vmem:[%s7258_s3 + $0x80] ss:$16 sps:$4 sm:$0xff]   ;;  %v5076_v22 = vld [vmem:[%s7258_s3 + $0x64] ss:$16 sps:$4 sm:$0xff]  }
 0x104   :  { %v602_v24 = vpop.f32.mrf.mxu0  ;;  %v787_v25 = vpop.f32.mrf.mxu1 }
 0x105   :  { %v1010_v26 = vadd.f32 %v5770_v60, %v975_v23  ;;  %v920_v27 = vmax.f32 %v600_v20, %v602_v24  ;;  %v948_v28 = vmax.f32 %v785_v21, %v787_v25  ;;  %v5071_v21 = vld [vmem:[%s7258_s3 + $0x88] ss:$16 sps:$4 sm:$0xff]  }
 0x106   :  { %v604_v29 = vpop.f32.mrf.mxu0  ;;  %v789_v30 = vpop.f32.mrf.mxu1 }
 0x107   :  { %v1038_v32 = vmax.f32 %v1010_v26, 0.0  ;;  %v976_v33 = vmax.f32 %v920_v27, %v948_v28 }
 0x108   :  { %v606_v34 = vpop.f32.mrf.mxu0  ;;  %v791_v35 = vpop.f32.mrf.mxu1 }
 0x109   :  { %v1100_v36 = vpack.c.bf16 %v1038_v32, %v1037_v31  ;;  %v921_v37 = vmax.f32 %v604_v29, %v606_v34  ;;  %v949_v38 = vmax.f32 %v789_v30, %v791_v35  ;;  %v1011_v46 = vadd.f32 %v5770_v60, %v976_v33  ;;  %v5074_v31 = vld [vmem:[%s7258_s3 + $0x60] ss:$16 sps:$4 sm:$0xff]   ;;  %v5079_v32 = vld [vmem:[%s7258_s3 + $0x6c] ss:$16 sps:$4 sm:$0xff]   ;;  %v5077_v35 = vld [vmem:[%s7258_s3 + $0x68] ss:$16 sps:$4 sm:$0xff]  }
 0x10a   :  { %v610_v41 = vpop.f32.mrf.mxu0  ;;  %v795_v42 = vpop.f32.mrf.mxu1 }
 0x10b   :  { %v977_v45 = vmax.f32 %v921_v37, %v949_v38  ;;  %1331 = vmatmul.mubr.bf16.vlgmr.msra.gmra.mxu0 %v1100_v36  ;;  %1414 = vmatmul.mubr.bf16.vlgmr.msra.gmra.mxu1 %v1100_v36  ;;  %v1039_v62 = vmax.f32 %v1011_v46, 0.0  ;;  %v5082_v36 = vld [vmem:[%s7258_s3 + $0x44] ss:$16 sps:$4 sm:$0xff]  }
 0x10c   :  { %v612_v47 = vpop.f32.mrf.mxu0  ;;  %v797_v49 = vpop.f32.mrf.mxu1  ;;  %1340 = vmatprep.mubr.bf16.mxu0 %v5338_v48  ;;  %1423 = vmatprep.mubr.bf16.mxu1 %v5338_v48 }
 0x10d   :  { %v1012_v50 = vadd.f32 %v5770_v60, %v977_v45  ;;  %v922_v51 = vmax.f32 %v610_v41, %v612_v47  ;;  %v950_v52 = vmax.f32 %v795_v42, %v797_v49  ;;  %1625 = vmatpush1.bf16.msra.mxu0 %v5050_v39  ;;  %1708 = vmatpush1.bf16.msra.mxu1 %v5053_v40  ;;  %v5085_v39 = vld [vmem:[%s7258_s3 + $0x4c] ss:$16 sps:$4 sm:$0xff]   ;;  %v5080_v45 = vld [vmem:[%s7258_s3 + $0x40] ss:$16 sps:$4 sm:$0xff]   ;;  %v5083_v49 = vld [vmem:[%s7258_s3 + $0x48] ss:$16 sps:$4 sm:$0xff]  }
 0x10e   :  { %v614_v55 = vpop.f32.mrf.mxu0  ;;  %v799_v56 = vpop.f32.mrf.mxu1  ;;  %1626 = vmatprep.subr.bf16.mxu0 %v5058_v43  ;;  %1709 = vmatprep.subr.bf16.mxu1 %v5061_v44 }
 0x10f   :  { %v1040_v59 = vmax.f32 %v1012_v50, 0.0  ;;  %v978_v61 = vmax.f32 %v922_v51, %v950_v52  ;;  %v5088_v50 = vld [vmem:[%s7258_s3 + $0x24] ss:$16 sps:$4 sm:$0xff]  }
 0x110   :  { %v616_v63 = vpop.f32.mrf.mxu0  ;;  %v801_v0 = vpop.f32.mrf.mxu1 }
 0x111   :  { %v923_v1 = vmax.f32 %v614_v55, %v616_v63  ;;  %v951_v2 = vmax.f32 %v799_v56, %v801_v0  ;;  %1627 = vmatpush1.bf16.msra.mxu0 %v5056_v53  ;;  %1710 = vmatpush1.bf16.msra.mxu1 %v5059_v54  ;;  %v5818_v9 = vpack.c.bf16 %v1040_v59, %v1039_v62  ;;  %v5091_v54 = vld [vmem:[%s7258_s3 + $0x2c] ss:$16 sps:$4 sm:$0xff]   ;;  %v5089_v0 = vld [vmem:[%s7258_s3 + $0x28] ss:$16 sps:$4 sm:$0xff]  }
 0x112   :  { %v620_v5 = vpop.f32.mrf.mxu0  ;;  %v805_v6 = vpop.f32.mrf.mxu1  ;;  %1628 = vmatprep.subr.bf16.mxu0 %v5064_v57  ;;  %1711 = vmatprep.subr.bf16.mxu1 %v5067_v58  ;;  %v1013_v10 = vadd.f32 %v5770_v60, %v978_v61  ;;  %v5086_v61 = vld [vmem:[%s7258_s3 + $0x20] ss:$16 sps:$4 sm:$0xff]  }
 0x113   :  { %v979_v11 = vmax.f32 %v923_v1, %v951_v2  ;;  %v5094_v1 = vld [vmem:[%s7258_s3 + $0x4] ss:$16 sps:$4 sm:$0xff]  }
 0x114   :  { %v622_v12 = vpop.f32.mrf.mxu0  ;;  %v807_v13 = vpop.f32.mrf.mxu1  ;;  %v1041_v23 = vmax.f32 %v1013_v10, 0.0 }
 0x115   :  { %v1014_v14 = vadd.f32 %v5770_v60, %v979_v11  ;;  %v924_v15 = vmax.f32 %v620_v5, %v622_v12  ;;  %v952_v16 = vmax.f32 %v805_v6, %v807_v13  ;;  %1629 = vmatpush1.bf16.msra.mxu0 %v5062_v3  ;;  %1712 = vmatpush1.bf16.msra.mxu1 %v5065_v4  ;;  %v5097_v4 = vld [vmem:[%s7258_s3 + $0xc] ss:$16 sps:$4 sm:$0xff]   ;;  %v5095_v12 = vld [vmem:[%s7258_s3 + $0x8] ss:$16 sps:$4 sm:$0xff]   ;;  %v5100_v13 = vld [vmem:[%s7258_s3 + $0x2e4] ss:$16 sps:$4 sm:$0xff]  }
 0x116   :  { %v624_v19 = vpop.f32.mrf.mxu0  ;;  %v809_v20 = vpop.f32.mrf.mxu1  ;;  %1630 = vmatprep.subr.bf16.mxu0 %v5070_v7  ;;  %1713 = vmatprep.subr.bf16.mxu1 %v5073_v8  ;;  %v5092_v8 = vld [vmem:[%s7258_s3] ss:$16 sps:$4 sm:$0xff]  }
 0x117   :  { %v1042_v24 = vmax.f32 %v1014_v14, 0.0  ;;  %v980_v25 = vmax.f32 %v924_v15, %v952_v16 }
 0x118   :  { %v626_v26 = vpop.f32.mrf.mxu0  ;;  %v811_v27 = vpop.f32.mrf.mxu1 }
 0x119   :  { %v925_v28 = vmax.f32 %v624_v19, %v626_v26  ;;  %v953_v29 = vmax.f32 %v809_v20, %v811_v27  ;;  %v5831_v30 = vpack.c.bf16 %v1042_v24, %v1041_v23  ;;  %1631 = vmatpush1.bf16.msra.mxu0 %v5068_v18  ;;  %1714 = vmatpush1.bf16.msra.mxu1 %v5071_v21  ;;  %v5103_v20 = vld [vmem:[%s7258_s3 + $0x2ec] ss:$16 sps:$4 sm:$0xff]  }
 0x11a   :  { %v630_v33 = vpop.f32.mrf.mxu0  ;;  %v815_v34 = vpop.f32.mrf.mxu1  ;;  %1632 = vmatprep.subr.bf16.mxu0 %v5076_v22  ;;  %v1015_v37 = vadd.f32 %v5770_v60, %v980_v25  ;;  %1715 = vmatprep.subr.bf16.mxu1 %v5079_v32 }
 0x11b   :  { %v981_v38 = vmax.f32 %v925_v28, %v953_v29  ;;  %1341 = vmatmul.mubr.bf16.gmra.mxu0 %v5831_v30  ;;  %1424 = vmatmul.mubr.bf16.gmra.mxu1 %v5831_v30 }
 0x11c   :  { %v632_v40 = vpop.f32.mrf.mxu0  ;;  %v817_v41 = vpop.f32.mrf.mxu1  ;;  %1350 = vmatprep.mubr.bf16.mxu0 %v5338_v48  ;;  %1433 = vmatprep.mubr.bf16.mxu1 %v5338_v48  ;;  %v1043_v51 = vmax.f32 %v1015_v37, 0.0 }
 0x11d   :  { %v1016_v42 = vadd.f32 %v5770_v60, %v981_v38  ;;  %v926_v43 = vmax.f32 %v630_v33, %v632_v40  ;;  %v954_v44 = vmax.f32 %v815_v34, %v817_v41  ;;  %1633 = vmatpush1.bf16.msra.mxu0 %v5074_v31  ;;  %1716 = vmatpush1.bf16.msra.mxu1 %v5077_v35 }
 0x11e   :  { %v634_v46 = vpop.f32.mrf.mxu0  ;;  %v819_v47 = vpop.f32.mrf.mxu1  ;;  %1634 = vmatprep.subr.bf16.mxu0 %v5082_v36  ;;  %1717 = vmatprep.subr.bf16.mxu1 %v5085_v39 }
 0x11f   :  { %v1044_v52 = vmax.f32 %v1016_v42, 0.0  ;;  %v982_v53 = vmax.f32 %v926_v43, %v954_v44 }
 0x120   :  { %v636_v55 = vpop.f32.mrf.mxu0  ;;  %v821_v56 = vpop.f32.mrf.mxu1 }
 0x121   :  { %v5866_v57 = vpack.c.bf16 %v1044_v52, %v1043_v51  ;;  %v927_v58 = vmax.f32 %v634_v46, %v636_v55  ;;  %v955_v59 = vmax.f32 %v819_v47, %v821_v56  ;;  %1635 = vmatpush1.bf16.msra.mxu0 %v5080_v45  ;;  %1718 = vmatpush1.bf16.msra.mxu1 %v5083_v49 }
 0x122   :  { %v5871_v62 = vpop.f32.mrf.mxu0  ;;  %v5873_v63 = vpop.f32.mrf.mxu1  ;;  %1636 = vmatprep.subr.bf16.mxu0 %v5088_v50  ;;  %v1017_v2 = vadd.f32 %v5770_v60, %v982_v53  ;;  %1719 = vmatprep.subr.bf16.mxu1 %v5091_v54 }
 0x123   :  { %v983_v3 = vmax.f32 %v927_v58, %v955_v59 }
 0x124   :  { %v5885_v5 = vpop.f32.mrf.mxu0  ;;  %v5887_v6 = vpop.f32.mrf.mxu1  ;;  %v1045_v14 = vmax.f32 %v1017_v2, 0.0 }
 0x125   :  { %v1018_v7 = vadd.f32 %v5770_v60, %v983_v3  ;;  %1637 = vmatpush1.bf16.msra.mxu0 %v5086_v61  ;;  %1720 = vmatpush1.bf16.msra.mxu1 %v5089_v0 }
 0x126   :  { %v5893_v10 = vpop.f32.mrf.mxu0  ;;  %v5895_v11 = vpop.f32.mrf.mxu1  ;;  %1638 = vmatprep.subr.bf16.mxu0 %v5094_v1  ;;  %1721 = vmatprep.subr.bf16.mxu1 %v5097_v4 }
 0x127   :  { %v1046_v15 = vmax.f32 %v1018_v7, 0.0 }
 0x128   :  { %v5903_v16 = vpop.f32.mrf.mxu0  ;;  %v5905_v18 = vpop.f32.mrf.mxu1 }
 0x129   :  { %v5907_v19 = vpack.c.bf16 %v1046_v15, %v1045_v14  ;;  %1639 = vmatpush1.bf16.msra.mxu0 %v5092_v8  ;;  %1722 = vmatpush1.bf16.msra.mxu1 %v5095_v12 }
 0x12a   :  { %v650_v21 = vpop.f32.mrf.mxu0  ;;  %v835_v22 = vpop.f32.mrf.mxu1  ;;  %1984 = vmatprep.subr.bf16.mxu0 %v5100_v13  ;;  %2067 = vmatprep.subr.bf16.mxu1 %v5103_v20 }
 0x12b   :  { %1351 = vmatmul.mubr.bf16.gmra.mxu0 %v5907_v19  ;;  %1434 = vmatmul.mubr.bf16.gmra.mxu1 %v5907_v19 }
 0x12c   :  { %v652_v23 = vpop.f32.mrf.mxu0  ;;  %v837_v24 = vpop.f32.mrf.mxu1  ;;  %1360 = vmatprep.mubr.bf16.mxu0 %v5338_v48  ;;  %1443 = vmatprep.mubr.bf16.mxu1 %v5338_v48 }
 0x12d   :  { %v930_v25 = vmax.f32 %v650_v21, %v652_v23  ;;  %v958_v26 = vmax.f32 %v835_v22, %v837_v24 }
 0x12e   :  { %v654_v27 = vpop.f32.mrf.mxu0  ;;  %v839_v28 = vpop.f32.mrf.mxu1 }
 0x12f   :  { %v986_v29 = vmax.f32 %v930_v25, %v958_v26 }
 0x130   :  { %v656_v31 = vpop.f32.mrf.mxu0  ;;  %v841_v32 = vpop.f32.mrf.mxu1 }
 0x131   :  { %v931_v33 = vmax.f32 %v654_v27, %v656_v31  ;;  %v959_v34 = vmax.f32 %v839_v28, %v841_v32  ;;  %v1021_v37 = vadd.f32 %v5770_v60, %v986_v29 }
 0x132   :  { %v5916_v35 = vpop.f32.mrf.mxu0  ;;  %v5918_v36 = vpop.f32.mrf.mxu1 }
 0x133   :  { %v987_v38 = vmax.f32 %v931_v33, %v959_v34  ;;  %v1049_v44 = vmax.f32 %v1021_v37, 0.0 }
 0x134   :  { %v5921_v39 = vpop.f32.mrf.mxu0  ;;  %v5923_v40 = vpop.f32.mrf.mxu1 }
 0x135   :  { %v1022_v41 = vadd.f32 %v5770_v60, %v987_v38 }
 0x136   :  { %v5926_v42 = vpop.f32.mrf.mxu0  ;;  %v5928_v43 = vpop.f32.mrf.mxu1 }
 0x137   :  { %v1050_v45 = vmax.f32 %v1022_v41, 0.0 }
 0x138   :  { %v5930_v46 = vpop.f32.mrf.mxu0  ;;  %v5932_v47 = vpop.f32.mrf.mxu1 }
 0x139   :  { %v5934_v49 = vpack.c.bf16 %v1050_v45, %v1049_v44 }
 0x13a   :  { %v670_v50 = vpop.f32.mrf.mxu0  ;;  %v855_v51 = vpop.f32.mrf.mxu1 }
 0x13b   :  { %1361 = vmatmul.mubr.bf16.gmra.mxu0 %v5934_v49  ;;  %1444 = vmatmul.mubr.bf16.gmra.mxu1 %v5934_v49 }
 0x13c   :  { %v672_v52 = vpop.f32.mrf.mxu0  ;;  %v857_v53 = vpop.f32.mrf.mxu1  ;;  %1370 = vmatprep.mubr.bf16.mxu0 %v5338_v48  ;;  %1453 = vmatprep.mubr.bf16.mxu1 %v5338_v48 }
 0x13d   :  { %v934_v54 = vmax.f32 %v670_v50, %v672_v52  ;;  %v962_v55 = vmax.f32 %v855_v51, %v857_v53 }
 0x13e   :  { %v674_v56 = vpop.f32.mrf.mxu0  ;;  %v859_v58 = vpop.f32.mrf.mxu1 }
 0x13f   :  { %v990_v59 = vmax.f32 %v934_v54, %v962_v55 }
 0x140   :  { %v676_v61 = vpop.f32.mrf.mxu0  ;;  %v861_v0 = vpop.f32.mrf.mxu1 }
 0x141   :  { %v935_v1 = vmax.f32 %v674_v56, %v676_v61  ;;  %v963_v2 = vmax.f32 %v859_v58, %v861_v0  ;;  %v1025_v7 = vadd.f32 %v5770_v60, %v990_v59  ;;  %v5098_v56 = vld [vmem:[%s7258_s3 + $0x2e0] ss:$16 sps:$4 sm:$0xff]   ;;  %v5101_v58 = vld [vmem:[%s7258_s3 + $0x2e8] ss:$16 sps:$4 sm:$0xff]   ;;  %v5106_v0 = vld [vmem:[%s7258_s3 + $0x2c4] ss:$16 sps:$4 sm:$0xff]  }
 0x142   :  { %v680_v3 = vpop.f32.mrf.mxu0  ;;  %v865_v4 = vpop.f32.mrf.mxu1 }
 0x143   :  { %v991_v8 = vmax.f32 %v935_v1, %v963_v2  ;;  %v1053_v23 = vmax.f32 %v1025_v7, 0.0  ;;  %v5109_v1 = vld [vmem:[%s7258_s3 + $0x2cc] ss:$16 sps:$4 sm:$0xff]  }
 0x144   :  { %v682_v12 = vpop.f32.mrf.mxu0  ;;  %v867_v13 = vpop.f32.mrf.mxu1 }
 0x145   :  { %v1026_v14 = vadd.f32 %v5770_v60, %v991_v8  ;;  %v936_v15 = vmax.f32 %v680_v3, %v682_v12  ;;  %v964_v20 = vmax.f32 %v865_v4, %v867_v13 }
 0x146   :  { %v684_v21 = vpop.f32.mrf.mxu0  ;;  %v869_v22 = vpop.f32.mrf.mxu1 }
 0x147   :  { %v1054_v24 = vmax.f32 %v1026_v14, 0.0  ;;  %v992_v25 = vmax.f32 %v936_v15, %v964_v20  ;;  %v5104_v14 = vld [vmem:[%s7258_s3 + $0x2c0] ss:$16 sps:$4 sm:$0xff]   ;;  %v5107_v15 = vld [vmem:[%s7258_s3 + $0x2c8] ss:$16 sps:$4 sm:$0xff]  }
 0x148   :  { %v686_v26 = vpop.f32.mrf.mxu0  ;;  %v871_v27 = vpop.f32.mrf.mxu1 }
 0x149   :  { %v5942_v28 = vpack.c.bf16 %v1054_v24, %v1053_v23  ;;  %v1027_v29 = vadd.f32 %v5770_v60, %v992_v25  ;;  %v937_v31 = vmax.f32 %v684_v21, %v686_v26  ;;  %v965_v32 = vmax.f32 %v869_v22, %v871_v27  ;;  %v5112_v22 = vld [vmem:[%s7258_s3 + $0x2a4] ss:$16 sps:$4 sm:$0xff]  }
 0x14a   :  { %v690_v33 = vpop.f32.mrf.mxu0  ;;  %v875_v34 = vpop.f32.mrf.mxu1 }
 0x14b   :  { %1371 = vmatmul.mubr.bf16.gmra.mxu0 %v5942_v28  ;;  %1454 = vmatmul.mubr.bf16.gmra.mxu1 %v5942_v28  ;;  %v993_v37 = vmax.f32 %v937_v31, %v965_v32  ;;  %v1055_v44 = vmax.f32 %v1027_v29, 0.0 }
 0x14c   :  { %1656 = vmatprep.mubr.bf16.mxu0 %v5338_v48  ;;  %1739 = vmatprep.mubr.bf16.mxu1 %v5338_v48  ;;  %v692_v38 = vpop.f32.mrf.mxu0  ;;  %v877_v41 = vpop.f32.mrf.mxu1 }
 0x14d   :  { %v1028_v45 = vadd.f32 %v5770_v60, %v993_v37  ;;  %v938_v50 = vmax.f32 %v690_v33, %v692_v38  ;;  %v966_v51 = vmax.f32 %v875_v34, %v877_v41  ;;  %v929_v33 = vmax.f32 %v5893_v10, %v5903_v16  ;;  %v5110_v37 = vld [vmem:[%s7258_s3 + $0x2a0] ss:$16 sps:$4 sm:$0xff]   ;;  %v5113_v38 = vld [vmem:[%s7258_s3 + $0x2a8] ss:$16 sps:$4 sm:$0xff]   ;;  %v5118_v10 = vld [vmem:[%s7258_s3 + $0x284] ss:$16 sps:$4 sm:$0xff]  }
 0x14e   :  { %v694_v52 = vpop.f32.mrf.mxu0  ;;  %v879_v53 = vpop.f32.mrf.mxu1  ;;  %v957_v34 = vmax.f32 %v5895_v11, %v5905_v18  ;;  %v5121_v11 = vld [vmem:[%s7258_s3 + $0x28c] ss:$16 sps:$4 sm:$0xff]  }
 0x14f   :  { %v1056_v54 = vmax.f32 %v1028_v45, 0.0  ;;  %v994_v55 = vmax.f32 %v938_v50, %v966_v51  ;;  %v928_v45 = vmax.f32 %v5871_v62, %v5885_v5  ;;  %v956_v50 = vmax.f32 %v5873_v63, %v5887_v6  ;;  %v5116_v62 = vld [vmem:[%s7258_s3 + $0x280] ss:$16 sps:$4 sm:$0xff]   ;;  %v5119_v63 = vld [vmem:[%s7258_s3 + $0x288] ss:$16 sps:$4 sm:$0xff]  }
 0x150   :  { %v696_v59 = vpop.f32.mrf.mxu0  ;;  %v881_v61 = vpop.f32.mrf.mxu1 }
 0x151   :  { %v5962_v2 = vpack.c.bf16 %v1056_v54, %v1055_v44  ;;  %v939_v3 = vmax.f32 %v694_v52, %v696_v59  ;;  %v967_v4 = vmax.f32 %v879_v53, %v881_v61  ;;  %v1029_v7 = vadd.f32 %v5770_v60, %v994_v55  ;;  %v5127_v59 = vld [vmem:[%s7258_s3 + $0x26c] ss:$16 sps:$4 sm:$0xff]  }
 0x152   :  { %v700_v8 = vpop.f32.mrf.mxu0  ;;  %v885_v12 = vpop.f32.mrf.mxu1 }
 0x153   :  { %1657 = vmatmul.mubr.bf16.vlgmr.msra.gmra.mxu0 %v5774_v17  ;;  %1740 = vmatmul.mubr.bf16.vlgmr.msra.gmra.mxu1 %v5774_v17  ;;  %v995_v13 = vmax.f32 %v939_v3, %v967_v4  ;;  %v5115_v17 = vld [vmem:[%s7258_s3 + $0x2ac] ss:$16 sps:$4 sm:$0xff]   ;;  %v1057_v26 = vmax.f32 %v1029_v7, 0.0  ;;  %v984_v3 = vmax.f32 %v928_v45, %v956_v50 }
 0x154   :  { %1985 = vmatpush1.bf16.msra.mxu0 %v5098_v56  ;;  %2068 = vmatpush1.bf16.msra.mxu1 %v5101_v58  ;;  %v702_v20 = vpop.f32.mrf.mxu0  ;;  %v887_v21 = vpop.f32.mrf.mxu1  ;;  %v985_v56 = vmax.f32 %v929_v33, %v957_v34  ;;  %v5124_v58 = vld [vmem:[%s7258_s3 + $0x264] ss:$16 sps:$4 sm:$0xff]   ;;  %v5128_v34 = vld [vmem:[%s7258_s3 + $0x240] ss:$16 sps:$4 sm:$0xff]  }
 0x155   :  { %1986 = vmatprep.subr.bf16.mxu0 %v5106_v0  ;;  %2069 = vmatprep.subr.bf16.mxu1 %v5109_v1  ;;  %v1030_v23 = vadd.f32 %v5770_v60, %v995_v13  ;;  %v940_v24 = vmax.f32 %v700_v8, %v702_v20  ;;  %v968_v25 = vmax.f32 %v885_v12, %v887_v21  ;;  %v5122_v21 = vld [vmem:[%s7258_s3 + $0x260] ss:$16 sps:$4 sm:$0xff]  }
 0x156   :  { %1666 = vmatprep.mubr.bf16.mxu0 %v5338_v48  ;;  %1749 = vmatprep.mubr.bf16.mxu1 %v5338_v48  ;;  %v704_v27 = vpop.f32.mrf.mxu0  ;;  %v889_v29 = vpop.f32.mrf.mxu1  ;;  %v961_v20 = vmax.f32 %v5928_v43, %v5932_v47  ;;  %v1019_v43 = vadd.f32 %v5770_v60, %v984_v3  ;;  %v5130_v47 = vld [vmem:[%s7258_s3 + $0x244] ss:$16 sps:$4 sm:$0xff]  }
 0x157   :  { %v1058_v31 = vmax.f32 %v1030_v23, 0.0  ;;  %v996_v32 = vmax.f32 %v940_v24, %v968_v25  ;;  %v5133_v25 = vld [vmem:[%s7258_s3 + $0x24c] ss:$16 sps:$4 sm:$0xff]  }
 0x158   :  { %1987 = vmatpush1.bf16.msra.mxu0 %v5104_v14  ;;  %2070 = vmatpush1.bf16.msra.mxu1 %v5107_v15  ;;  %v706_v41 = vpop.f32.mrf.mxu0  ;;  %v891_v44 = vpop.f32.mrf.mxu1  ;;  %v1020_v14 = vadd.f32 %v5770_v60, %v985_v56  ;;  %v933_v15 = vmax.f32 %v5926_v42, %v5930_v46 }
 0x159   :  { %1988 = vmatprep.subr.bf16.mxu0 %v5112_v22  ;;  %2071 = vmatprep.subr.bf16.mxu1 %v5115_v17  ;;  %v941_v16 = vmax.f32 %v704_v27, %v706_v41  ;;  %v969_v18 = vmax.f32 %v889_v29, %v891_v44  ;;  %v1031_v51 = vadd.f32 %v5770_v60, %v996_v32  ;;  %v5125_v22 = vld [vmem:[%s7258_s3 + $0x268] ss:$16 sps:$4 sm:$0xff]  }
 0x15a   :  { %v710_v52 = vpop.f32.mrf.mxu0  ;;  %v895_v53 = vpop.f32.mrf.mxu1  ;;  %v6003_v54 = vpack.c.bf16 %v1058_v31, %v1057_v26  ;;  %v932_v31 = vmax.f32 %v5916_v35, %v5921_v39  ;;  %v960_v32 = vmax.f32 %v5918_v36, %v5923_v40  ;;  %v1048_v39 = vmax.f32 %v1020_v14, 0.0  ;;  %v5136_v36 = vld [vmem:[%s7258_s3 + $0x224] ss:$16 sps:$4 sm:$0xff]   ;;  %v5139_v40 = vld [vmem:[%s7258_s3 + $0x22c] ss:$16 sps:$4 sm:$0xff]  }
 0x15b   :  { %1667 = vmatmul.mubr.bf16.gmra.mxu0 %v5818_v9  ;;  %1750 = vmatmul.mubr.bf16.gmra.mxu1 %v5818_v9  ;;  %v997_v55 = vmax.f32 %v941_v16, %v969_v18  ;;  %v1059_v4 = vmax.f32 %v1031_v51, 0.0  ;;  %v989_v41 = vmax.f32 %v933_v15, %v961_v20  ;;  %v1047_v18 = vmax.f32 %v1019_v43, 0.0  ;;  %v5134_v51 = vld [vmem:[%s7258_s3 + $0x220] ss:$16 sps:$4 sm:$0xff]   ;;  %v5160_v43 = vld [vmem:[%s7258_s3 + $0x3a4] ss:$16 sps:$4 sm:$0xff]  }
 0x15c   :  { %1989 = vmatpush1.bf16.msra.mxu0 %v5110_v37  ;;  %2072 = vmatpush1.bf16.msra.mxu1 %v5113_v38  ;;  %v712_v5 = vpop.f32.mrf.mxu0  ;;  %v897_v6 = vpop.f32.mrf.mxu1  ;;  %v5131_v37 = vld [vmem:[%s7258_s3 + $0x248] ss:$16 sps:$4 sm:$0xff]   ;;  %v988_v45 = vmax.f32 %v932_v31, %v960_v32  ;;  %v5164_v31 = vld [vmem:[%s7258_s3 + $0x380] ss:$16 sps:$4 sm:$0xff]  }
 0x15d   :  { %1990 = vmatprep.subr.bf16.mxu0 %v5118_v10  ;;  %2073 = vmatprep.subr.bf16.mxu1 %v5121_v11  ;;  %v1032_v61 = vadd.f32 %v5770_v60, %v997_v55  ;;  %v942_v0 = vmax.f32 %v710_v52, %v712_v5  ;;  %v970_v1 = vmax.f32 %v895_v53, %v897_v6  ;;  %v5137_v52 = vld [vmem:[%s7258_s3 + $0x228] ss:$16 sps:$4 sm:$0xff]   ;;  %v5142_v5 = vld [vmem:[%s7258_s3 + $0x204] ss:$16 sps:$4 sm:$0xff]   ;;  %v5145_v6 = vld [vmem:[%s7258_s3 + $0x20c] ss:$16 sps:$4 sm:$0xff]  }
 0x15e   :  { %1676 = vmatprep.mubr.bf16.mxu0 %v5338_v48  ;;  %1759 = vmatprep.mubr.bf16.mxu1 %v5338_v48  ;;  %v714_v7 = vpop.f32.mrf.mxu0  ;;  %v899_v8 = vpop.f32.mrf.mxu1  ;;  %v6070_v56 = vpack.c.bf16 %v1048_v39, %v1047_v18  ;;  %v5167_v32 = vld [vmem:[%s7258_s3 + $0x388] ss:$16 sps:$4 sm:$0xff]   ;;  %v5181_v39 = vld [vmem:[%s7258_s3 + $0x34c] ss:$16 sps:$4 sm:$0xff]  }
 0x15f   :  { %v1060_v12 = vmax.f32 %v1032_v61, 0.0  ;;  %v998_v13 = vmax.f32 %v942_v0, %v970_v1  ;;  %v1023_v61 = vadd.f32 %v5770_v60, %v988_v45  ;;  %v5140_v0 = vld [vmem:[%s7258_s3 + $0x200] ss:$16 sps:$4 sm:$0xff]   ;;  %v5143_v1 = vld [vmem:[%s7258_s3 + $0x208] ss:$16 sps:$4 sm:$0xff]  }
 0x160   :  { %1991 = vmatpush1.bf16.msra.mxu0 %v5116_v62  ;;  %2074 = vmatpush1.bf16.msra.mxu1 %v5119_v63  ;;  %v716_v17 = vpop.f32.mrf.mxu0  ;;  %v901_v23 = vpop.f32.mrf.mxu1  ;;  %v1024_v62 = vadd.f32 %v5770_v60, %v989_v41  ;;  %v5176_v41 = vld [vmem:[%s7258_s3 + $0x340] ss:$16 sps:$4 sm:$0xff]   ;;  %v5193_v18 = vld [vmem:[%s7258_s3 + $0x30c] ss:$16 sps:$4 sm:$0xff]  }
 0x161   :  { %1992 = vmatprep.subr.bf16.mxu0 %v5124_v58  ;;  %2075 = vmatprep.subr.bf16.mxu1 %v5127_v59  ;;  %v1033_v24 = vadd.f32 %v5770_v60, %v998_v13  ;;  %v943_v42 = vmax.f32 %v714_v7, %v716_v17  ;;  %v971_v46 = vmax.f32 %v899_v8, %v901_v23  ;;  %v5151_v8 = vld [vmem:[%s7258_s3 + $0x3ec] ss:$16 sps:$4 sm:$0xff]   ;;  %v1051_v14 = vmax.f32 %v1023_v61, 0.0  ;;  %v5149_v17 = vld [vmem:[%s7258_s3 + $0x3e8] ss:$16 sps:$4 sm:$0xff]  }
 0x162   :  { %v720_v26 = vpop.f32.mrf.mxu0  ;;  %v905_v27 = vpop.f32.mrf.mxu1  ;;  %v6041_v29 = vpack.c.bf16 %v1060_v12, %v1059_v4  ;;  %v1052_v7 = vmax.f32 %v1024_v62, 0.0  ;;  %v5154_v23 = vld [vmem:[%s7258_s3 + $0x3c4] ss:$16 sps:$4 sm:$0xff]   ;;  %v5188_v45 = vld [vmem:[%s7258_s3 + $0x300] ss:$16 sps:$4 sm:$0xff]  }
 0x163   :  { %1677 = vmatmul.mubr.bf16.gmra.mxu0 %v5866_v57  ;;  %1760 = vmatmul.mubr.bf16.gmra.mxu1 %v5866_v57  ;;  %v999_v33 = vmax.f32 %v943_v42, %v971_v46  ;;  %v1061_v44 = vmax.f32 %v1033_v24, 0.0  ;;  %v5157_v24 = vld [vmem:[%s7258_s3 + $0x3cc] ss:$16 sps:$4 sm:$0xff]   ;;  %v5152_v42 = vld [vmem:[%s7258_s3 + $0x3c0] ss:$16 sps:$4 sm:$0xff]  }
 0x164   :  { %1993 = vmatpush1.bf16.msra.mxu0 %v5122_v21  ;;  %2076 = vmatpush1.bf16.msra.mxu1 %v5125_v22  ;;  %v721_v38 = vpop.f32.mrf.mxu0  ;;  %v906_v35 = vpop.f32.mrf.mxu1  ;;  %v6098_v21 = vpack.c.bf16 %v1052_v7, %v1051_v14  ;;  %v5146_v22 = vld [vmem:[%s7258_s3 + $0x3e0] ss:$16 sps:$4 sm:$0xff]   ;;  %v5155_v46 = vld [vmem:[%s7258_s3 + $0x3c8] ss:$16 sps:$4 sm:$0xff]   ;;  %v5166_v26 = vld [vmem:[%s7258_s3 + $0x384] ss:$16 sps:$4 sm:$0xff]  }
 0x165   :  { %1686 = vmatprep.mubr.bf16.mxu0 %v5338_v48  ;;  %1769 = vmatprep.mubr.bf16.mxu1 %v5338_v48  ;;  %v1034_v10 = vadd.f32 %v5770_v60, %v999_v33  ;;  %v5148_v60 = vld [vmem:[%s7258_s3 + $0x3e4] ss:$16 sps:$4 sm:$0xff]   ;;  %v5169_v27 = vld [vmem:[%s7258_s3 + $0x38c] ss:$16 sps:$4 sm:$0xff]   ;;  %v5173_v38 = vld [vmem:[%s7258_s3 + $0x368] ss:$16 sps:$4 sm:$0xff]  }
 0x166   :  { %1994 = vmatprep.subr.bf16.mxu0 %v5130_v47  ;;  %2077 = vmatprep.subr.bf16.mxu1 %v5133_v25  ;;  %v722_v11 = vpop.f32.mrf.mxu0  ;;  %v907_v16 = vpop.f32.mrf.mxu1  ;;  %v5158_v47 = vld [vmem:[%s7258_s3 + $0x3a0] ss:$16 sps:$4 sm:$0xff]   ;;  %v5161_v25 = vld [vmem:[%s7258_s3 + $0x3a8] ss:$16 sps:$4 sm:$0xff]   ;;  %v5172_v33 = vld [vmem:[%s7258_s3 + $0x364] ss:$16 sps:$4 sm:$0xff]  }
 0x167   :  { %v1062_v50 = vmax.f32 %v1034_v10, 0.0  ;;  %v5178_v35 = vld [vmem:[%s7258_s3 + $0x344] ss:$16 sps:$4 sm:$0xff]   ;;  %v5182_v10 = vld [vmem:[%s7258_s3 + $0x320] ss:$16 sps:$4 sm:$0xff]  }
 0x168   :  { %1995 = vmatpush1.bf16.msra.mxu0 %v5128_v34  ;;  %2078 = vmatpush1.bf16.msra.mxu1 %v5131_v37  ;;  %v723_v53 = vpop.f32.mrf.mxu0  ;;  %v908_v55 = vpop.f32.mrf.mxu1  ;;  %v5175_v34 = vld [vmem:[%s7258_s3 + $0x36c] ss:$16 sps:$4 sm:$0xff]   ;;  %v5170_v37 = vld [vmem:[%s7258_s3 + $0x360] ss:$16 sps:$4 sm:$0xff]   ;;  %v5185_v11 = vld [vmem:[%s7258_s3 + $0x328] ss:$16 sps:$4 sm:$0xff]  }
 0x169   :  { %1996 = vmatprep.subr.bf16.mxu0 %v5136_v36  ;;  %2079 = vmatprep.subr.bf16.mxu1 %v5139_v40  ;;  %v6073_v63 = vpack.c.bf16 %v1062_v50, %v1061_v44  ;;  %v5179_v36 = vld [vmem:[%s7258_s3 + $0x348] ss:$16 sps:$4 sm:$0xff]   ;;  %v5184_v40 = vld [vmem:[%s7258_s3 + $0x324] ss:$16 sps:$4 sm:$0xff]   ;;  %v5187_v44 = vld [vmem:[%s7258_s3 + $0x32c] ss:$16 sps:$4 sm:$0xff]  }
 0x16a   :  { %v726_v58 = vpop.f32.mrf.mxu0  ;;  %v911_v59 = vpop.f32.mrf.mxu1  ;;  %v5190_v16 = vld [vmem:[%s7258_s3 + $0x304] ss:$16 sps:$4 sm:$0xff]   ;;  %v5191_v50 = vld [vmem:[%s7258_s3 + $0x308] ss:$16 sps:$4 sm:$0xff]   ;;  %v5194_v53 = vld [vmem:[%s7258_s3 + $0x4e0] ss:$16 sps:$4 sm:$0xff]  }
 0x16b   :  { %1687 = vmatmul.mubr.bf16.gmra.mxu0 %v6070_v56  ;;  %1770 = vmatmul.mubr.bf16.gmra.mxu1 %v6070_v56  ;;  %v5197_v55 = vld [vmem:[%s7258_s3 + $0x4e8] ss:$16 sps:$4 sm:$0xff]   ;;  %v5202_v62 = vld [vmem:[%s7258_s3 + $0x4c4] ss:$16 sps:$4 sm:$0xff]   ;;  %v5206_v61 = vld [vmem:[%s7258_s3 + $0x4a0] ss:$16 sps:$4 sm:$0xff]  }
 0x16c   :  { %1997 = vmatpush1.bf16.msra.mxu0 %v5134_v51  ;;  %2080 = vmatpush1.bf16.msra.mxu1 %v5137_v52  ;;  %v727_v3 = vpop.f32.mrf.mxu0  ;;  %v912_v4 = vpop.f32.mrf.mxu1  ;;  %v5196_v51 = vld [vmem:[%s7258_s3 + $0x4e4] ss:$16 sps:$4 sm:$0xff]   ;;  %v5199_v52 = vld [vmem:[%s7258_s3 + $0x4ec] ss:$16 sps:$4 sm:$0xff]   ;;  %v5203_v58 = vld [vmem:[%s7258_s3 + $0x4c8] ss:$16 sps:$4 sm:$0xff]  }
 0x16d   :  { %1696 = vmatprep.mubr.bf16.mxu0 %v5338_v48  ;;  %1779 = vmatprep.mubr.bf16.mxu1 %v5338_v48  ;;  %v5208_v59 = vld [vmem:[%s7258_s3 + $0x4a4] ss:$16 sps:$4 sm:$0xff]   ;;  %v5217_v3 = vld [vmem:[%s7258_s3 + $0x48c] ss:$16 sps:$4 sm:$0xff]   ;;  %v5212_v4 = vld [vmem:[%s7258_s3 + $0x480] ss:$16 sps:$4 sm:$0xff]  }
 0x16e   :  { %1998 = vmatprep.subr.bf16.mxu0 %v5142_v5  ;;  %2081 = vmatprep.subr.bf16.mxu1 %v5145_v6  ;;  %v728_v12 = vpop.f32.mrf.mxu0  ;;  %v913_v13 = vpop.f32.mrf.mxu1  ;;  %v5205_v5 = vld [vmem:[%s7258_s3 + $0x4cc] ss:$16 sps:$4 sm:$0xff]   ;;  %v5200_v6 = vld [vmem:[%s7258_s3 + $0x4c0] ss:$16 sps:$4 sm:$0xff]   ;;  %v5215_v7 = vld [vmem:[%s7258_s3 + $0x488] ss:$16 sps:$4 sm:$0xff]  }
 0x16f   :  { %v5218_v12 = vld [vmem:[%s7258_s3 + $0x460] ss:$16 sps:$4 sm:$0xff]   ;;  %v5221_v13 = vld [vmem:[%s7258_s3 + $0x468] ss:$16 sps:$4 sm:$0xff]   ;;  %v5226_v14 = vld [vmem:[%s7258_s3 + $0x444] ss:$16 sps:$4 sm:$0xff]  }
 0x170   :  { %1999 = vmatpush1.bf16.msra.mxu0 %v5140_v0  ;;  %2082 = vmatpush1.bf16.msra.mxu1 %v5143_v1  ;;  %v729_v15 = vpop.f32.mrf.mxu0  ;;  %v914_v20 = vpop.f32.mrf.mxu1  ;;  %v5209_v0 = vld [vmem:[%s7258_s3 + $0x4a8] ss:$16 sps:$4 sm:$0xff]   ;;  %v5214_v1 = vld [vmem:[%s7258_s3 + $0x484] ss:$16 sps:$4 sm:$0xff]  }
 0x171   :  { %2384 = vmatprep.subr.bf16.mxu0 %v5148_v60  ;;  %2467 = vmatprep.subr.bf16.mxu1 %v5151_v8  ;;  %v5220_v60 = vld [vmem:[%s7258_s3 + $0x464] ss:$16 sps:$4 sm:$0xff]   ;;  %v5223_v8 = vld [vmem:[%s7258_s3 + $0x46c] ss:$16 sps:$4 sm:$0xff]   ;;  %v5224_v20 = vld [vmem:[%s7258_s3 + $0x440] ss:$16 sps:$4 sm:$0xff]  }
 0x172   :  { %v5229_v15 = vld [vmem:[%s7258_s3 + $0x44c] ss:$16 sps:$4 sm:$0xff]  }
 0x173   :  { %1697 = vmatmul.mubr.bf16.gmra.mxu0 %v6098_v21  ;;  %1780 = vmatmul.mubr.bf16.gmra.mxu1 %v6098_v21 }
 0x174   :  { %2016 = vmatprep.mubr.bf16.mxu0 %v5338_v48  ;;  %2099 = vmatprep.mubr.bf16.mxu1 %v5338_v48 }
 0x17b   :  { %2017 = vmatmul.mubr.bf16.vlgmr.msra.gmra.mxu0 %v5818_v9  ;;  %2100 = vmatmul.mubr.bf16.vlgmr.msra.gmra.mxu1 %v5818_v9  ;;  %v5163_v9 = vld [vmem:[%s7258_s3 + $0x3ac] ss:$16 sps:$4 sm:$0xff]  }
 0x17c   :  { %2385 = vmatpush1.bf16.msra.mxu0 %v5146_v22  ;;  %2468 = vmatpush1.bf16.msra.mxu1 %v5149_v17  ;;  %v5227_v22 = vld [vmem:[%s7258_s3 + $0x448] ss:$16 sps:$4 sm:$0xff]   ;;  %v5232_v17 = vld [vmem:[%s7258_s3 + $0x424] ss:$16 sps:$4 sm:$0xff]  }
 0x17d   :  { %2386 = vmatprep.subr.bf16.mxu0 %v5154_v23  ;;  %2469 = vmatprep.subr.bf16.mxu1 %v5157_v24  ;;  %v5235_v23 = vld [vmem:[%s7258_s3 + $0x42c] ss:$16 sps:$4 sm:$0xff]   ;;  %v5230_v24 = vld [vmem:[%s7258_s3 + $0x420] ss:$16 sps:$4 sm:$0xff]  }
 0x17e   :  { %2026 = vmatprep.mubr.bf16.mxu0 %v5338_v48  ;;  %2109 = vmatprep.mubr.bf16.mxu1 %v5338_v48 }
 0x180   :  { %2387 = vmatpush1.bf16.msra.mxu0 %v5152_v42  ;;  %2470 = vmatpush1.bf16.msra.mxu1 %v5155_v46  ;;  %v5233_v42 = vld [vmem:[%s7258_s3 + $0x428] ss:$16 sps:$4 sm:$0xff]   ;;  %v5238_v46 = vld [vmem:[%s7258_s3 + $0x404] ss:$16 sps:$4 sm:$0xff]  }
 0x181   :  { %2388 = vmatprep.subr.bf16.mxu0 %v5160_v43  ;;  %2471 = vmatprep.subr.bf16.mxu1 %v5163_v9  ;;  %v5241_v43 = vld [vmem:[%s7258_s3 + $0x40c] ss:$16 sps:$4 sm:$0xff]   ;;  %v5236_v9 = vld [vmem:[%s7258_s3 + $0x400] ss:$16 sps:$4 sm:$0xff]  }
 0x183   :  { %2027 = vmatmul.mubr.bf16.gmra.mxu0 %v5866_v57  ;;  %2110 = vmatmul.mubr.bf16.gmra.mxu1 %v5866_v57 }
 0x184   :  { %2389 = vmatpush1.bf16.msra.mxu0 %v5158_v47  ;;  %2472 = vmatpush1.bf16.msra.mxu1 %v5161_v25  ;;  %v5239_v47 = vld [vmem:[%s7258_s3 + $0x408] ss:$16 sps:$4 sm:$0xff]   ;;  %v5244_v25 = vld [vmem:[%s7258_s3 + $0x5e4] ss:$16 sps:$4 sm:$0xff]  }
 0x185   :  { %2390 = vmatprep.subr.bf16.mxu0 %v5166_v26  ;;  %2473 = vmatprep.subr.bf16.mxu1 %v5169_v27  ;;  %v5247_v26 = vld [vmem:[%s7258_s3 + $0x5ec] ss:$16 sps:$4 sm:$0xff]   ;;  %v5242_v27 = vld [vmem:[%s7258_s3 + $0x5e0] ss:$16 sps:$4 sm:$0xff]  }
 0x186   :  { %2036 = vmatprep.mubr.bf16.mxu0 %v5338_v48  ;;  %2119 = vmatprep.mubr.bf16.mxu1 %v5338_v48 }
 0x188   :  { %2391 = vmatpush1.bf16.msra.mxu0 %v5164_v31  ;;  %2474 = vmatpush1.bf16.msra.mxu1 %v5167_v32  ;;  %v5245_v31 = vld [vmem:[%s7258_s3 + $0x5e8] ss:$16 sps:$4 sm:$0xff]   ;;  %v5250_v32 = vld [vmem:[%s7258_s3 + $0x5c4] ss:$16 sps:$4 sm:$0xff]  }
 0x189   :  { %2392 = vmatprep.subr.bf16.mxu0 %v5172_v33  ;;  %2475 = vmatprep.subr.bf16.mxu1 %v5175_v34  ;;  %v5253_v33 = vld [vmem:[%s7258_s3 + $0x5cc] ss:$16 sps:$4 sm:$0xff]   ;;  %v5248_v34 = vld [vmem:[%s7258_s3 + $0x5c0] ss:$16 sps:$4 sm:$0xff]  }
 0x18b   :  { %2037 = vmatmul.mubr.bf16.gmra.mxu0 %v6070_v56  ;;  %2120 = vmatmul.mubr.bf16.gmra.mxu1 %v6070_v56 }
 0x18c   :  { %2393 = vmatpush1.bf16.msra.mxu0 %v5170_v37  ;;  %2476 = vmatpush1.bf16.msra.mxu1 %v5173_v38  ;;  %v5251_v37 = vld [vmem:[%s7258_s3 + $0x5c8] ss:$16 sps:$4 sm:$0xff]   ;;  %v5256_v38 = vld [vmem:[%s7258_s3 + $0x5a4] ss:$16 sps:$4 sm:$0xff]  }
 0x18d   :  { %2046 = vmatprep.mubr.bf16.mxu0 %v5338_v48  ;;  %2129 = vmatprep.mubr.bf16.mxu1 %v5338_v48 }
 0x18e   :  { %2394 = vmatprep.subr.bf16.mxu0 %v5178_v35  ;;  %2477 = vmatprep.subr.bf16.mxu1 %v5181_v39  ;;  %v5254_v35 = vld [vmem:[%s7258_s3 + $0x5a0] ss:$16 sps:$4 sm:$0xff]   ;;  %v5257_v39 = vld [vmem:[%s7258_s3 + $0x5a8] ss:$16 sps:$4 sm:$0xff]  }
 0x190   :  { %2395 = vmatpush1.bf16.msra.mxu0 %v5176_v41  ;;  %2478 = vmatpush1.bf16.msra.mxu1 %v5179_v36  ;;  %v5262_v41 = vld [vmem:[%s7258_s3 + $0x584] ss:$16 sps:$4 sm:$0xff]   ;;  %v5265_v36 = vld [vmem:[%s7258_s3 + $0x58c] ss:$16 sps:$4 sm:$0xff]  }
 0x191   :  { %2396 = vmatprep.subr.bf16.mxu0 %v5184_v40  ;;  %2479 = vmatprep.subr.bf16.mxu1 %v5187_v44 }
 0x193   :  { %2047 = vmatmul.mubr.bf16.gmra.mxu0 %v6098_v21  ;;  %2130 = vmatmul.mubr.bf16.gmra.mxu1 %v6098_v21 }
 0x194   :  { %2397 = vmatpush1.bf16.msra.mxu0 %v5182_v10  ;;  %2480 = vmatpush1.bf16.msra.mxu1 %v5185_v11  ;;  %v5260_v10 = vld [vmem:[%s7258_s3 + $0x580] ss:$16 sps:$4 sm:$0xff]   ;;  %v5263_v11 = vld [vmem:[%s7258_s3 + $0x588] ss:$16 sps:$4 sm:$0xff]  }
 0x195   :  { %2056 = vmatprep.mubr.bf16.mxu0 %v5338_v48  ;;  %2139 = vmatprep.mubr.bf16.mxu1 %v5338_v48 }
 0x196   :  { %2398 = vmatprep.subr.bf16.mxu0 %v5190_v16  ;;  %2481 = vmatprep.subr.bf16.mxu1 %v5193_v18  ;;  %v5268_v16 = vld [vmem:[%s7258_s3 + $0x564] ss:$16 sps:$4 sm:$0xff]  }
 0x198   :  { %2399 = vmatpush1.bf16.msra.mxu0 %v5188_v45  ;;  %2482 = vmatpush1.bf16.msra.mxu1 %v5191_v50  ;;  %v5266_v50 = vld [vmem:[%s7258_s3 + $0x560] ss:$16 sps:$4 sm:$0xff]  }
 0x199   :  { %2784 = vmatprep.subr.bf16.mxu0 %v5196_v51  ;;  %2867 = vmatprep.subr.bf16.mxu1 %v5199_v52  ;;  %v5269_v51 = vld [vmem:[%s7258_s3 + $0x568] ss:$16 sps:$4 sm:$0xff]   ;;  %v5274_v52 = vld [vmem:[%s7258_s3 + $0x544] ss:$16 sps:$4 sm:$0xff]  }
 0x19b   :  { %2057 = vmatmul.mubr.bf16.gmra.mxu0 %v5962_v2  ;;  %2140 = vmatmul.mubr.bf16.gmra.mxu1 %v5962_v2 }
 0x19c   :  { %2416 = vmatprep.mubr.bf16.mxu0 %v5338_v48  ;;  %2499 = vmatprep.mubr.bf16.mxu1 %v5338_v48 }
 0x1a3   :  { %2417 = vmatmul.mubr.bf16.vlgmr.msra.gmra.mxu0 %v5831_v30  ;;  %2500 = vmatmul.mubr.bf16.vlgmr.msra.gmra.mxu1 %v5831_v30  ;;  %v5211_v30 = vld [vmem:[%s7258_s3 + $0x4ac] ss:$16 sps:$4 sm:$0xff]  }
 0x1a4   :  { %2785 = vmatpush1.bf16.msra.mxu0 %v5194_v53  ;;  %2868 = vmatpush1.bf16.msra.mxu1 %v5197_v55  ;;  %v5277_v53 = vld [vmem:[%s7258_s3 + $0x54c] ss:$16 sps:$4 sm:$0xff]  }
 0x1a5   :  { %2786 = vmatprep.subr.bf16.mxu0 %v5202_v62  ;;  %2869 = vmatprep.subr.bf16.mxu1 %v5205_v5  ;;  %v5272_v5 = vld [vmem:[%s7258_s3 + $0x540] ss:$16 sps:$4 sm:$0xff]  }
 0x1a6   :  { %2426 = vmatprep.mubr.bf16.mxu0 %v5338_v48  ;;  %2509 = vmatprep.mubr.bf16.mxu1 %v5338_v48 }
 0x1a8   :  { %2787 = vmatpush1.bf16.msra.mxu0 %v5200_v6  ;;  %2870 = vmatpush1.bf16.msra.mxu1 %v5203_v58  ;;  %v5275_v6 = vld [vmem:[%s7258_s3 + $0x548] ss:$16 sps:$4 sm:$0xff]   ;;  %v5280_v58 = vld [vmem:[%s7258_s3 + $0x524] ss:$16 sps:$4 sm:$0xff]  }
 0x1a9   :  { %2788 = vmatprep.subr.bf16.mxu0 %v5208_v59  ;;  %2871 = vmatprep.subr.bf16.mxu1 %v5211_v30 }
 0x1ab   :  { %2427 = vmatmul.mubr.bf16.gmra.mxu0 %v5907_v19  ;;  %2510 = vmatmul.mubr.bf16.gmra.mxu1 %v5907_v19 }
 0x1ac   :  { %2789 = vmatpush1.bf16.msra.mxu0 %v5206_v61  ;;  %2872 = vmatpush1.bf16.msra.mxu1 %v5209_v0  ;;  %v5278_v61 = vld [vmem:[%s7258_s3 + $0x520] ss:$16 sps:$4 sm:$0xff]   ;;  %v5281_v0 = vld [vmem:[%s7258_s3 + $0x528] ss:$16 sps:$4 sm:$0xff]  }
 0x1ad   :  { %2790 = vmatprep.subr.bf16.mxu0 %v5214_v1  ;;  %2873 = vmatprep.subr.bf16.mxu1 %v5217_v3 }
 0x1ae   :  { %2436 = vmatprep.mubr.bf16.mxu0 %v5338_v48  ;;  %2519 = vmatprep.mubr.bf16.mxu1 %v5338_v48 }
 0x1b0   :  { %2791 = vmatpush1.bf16.msra.mxu0 %v5212_v4  ;;  %2874 = vmatpush1.bf16.msra.mxu1 %v5215_v7  ;;  %v5286_v4 = vld [vmem:[%s7258_s3 + $0x504] ss:$16 sps:$4 sm:$0xff]   ;;  %v5289_v7 = vld [vmem:[%s7258_s3 + $0x50c] ss:$16 sps:$4 sm:$0xff]  }
 0x1b1   :  { %2792 = vmatprep.subr.bf16.mxu0 %v5220_v60  ;;  %2875 = vmatprep.subr.bf16.mxu1 %v5223_v8  ;;  %v5284_v60 = vld [vmem:[%s7258_s3 + $0x500] ss:$16 sps:$4 sm:$0xff]   ;;  %v5287_v8 = vld [vmem:[%s7258_s3 + $0x508] ss:$16 sps:$4 sm:$0xff]  }
 0x1b3   :  { %2437 = vmatmul.mubr.bf16.gmra.mxu0 %v5934_v49  ;;  %2520 = vmatmul.mubr.bf16.gmra.mxu1 %v5934_v49 }
 0x1b4   :  { %2793 = vmatpush1.bf16.msra.mxu0 %v5218_v12  ;;  %2876 = vmatpush1.bf16.msra.mxu1 %v5221_v13 }
 0x1b5   :  { %2446 = vmatprep.mubr.bf16.mxu0 %v5338_v48  ;;  %2529 = vmatprep.mubr.bf16.mxu1 %v5338_v48 }
 0x1b6   :  { %2794 = vmatprep.subr.bf16.mxu0 %v5226_v14  ;;  %2877 = vmatprep.subr.bf16.mxu1 %v5229_v15 }
 0x1b8   :  { %2795 = vmatpush1.bf16.msra.mxu0 %v5224_v20  ;;  %2878 = vmatpush1.bf16.msra.mxu1 %v5227_v22 }
 0x1b9   :  { %2796 = vmatprep.subr.bf16.mxu0 %v5232_v17  ;;  %2879 = vmatprep.subr.bf16.mxu1 %v5235_v23 }
 0x1bb   :  { %2447 = vmatmul.mubr.bf16.gmra.mxu0 %v5942_v28  ;;  %2530 = vmatmul.mubr.bf16.gmra.mxu1 %v5942_v28 }
 0x1bc   :  { %2797 = vmatpush1.bf16.msra.mxu0 %v5230_v24  ;;  %2880 = vmatpush1.bf16.msra.mxu1 %v5233_v42 }
 0x1bd   :  { %2456 = vmatprep.mubr.bf16.mxu0 %v5338_v48  ;;  %2539 = vmatprep.mubr.bf16.mxu1 %v5338_v48 }
 0x1be   :  { %2798 = vmatprep.subr.bf16.mxu0 %v5238_v46  ;;  %2881 = vmatprep.subr.bf16.mxu1 %v5241_v43 }
 0x1c0   :  { %2799 = vmatpush1.bf16.msra.mxu0 %v5236_v9  ;;  %2882 = vmatpush1.bf16.msra.mxu1 %v5239_v47 }
 0x1c1   :  { %3184 = vmatprep.subr.bf16.mxu0 %v5244_v25  ;;  %3267 = vmatprep.subr.bf16.mxu1 %v5247_v26 }
 0x1c3   :  { %2457 = vmatmul.mubr.bf16.gmra.mxu0 %v6003_v54  ;;  %2540 = vmatmul.mubr.bf16.gmra.mxu1 %v6003_v54 }
 0x1c4   :  { %2816 = vmatprep.mubr.bf16.mxu0 %v5338_v48  ;;  %2899 = vmatprep.mubr.bf16.mxu1 %v5338_v48 }
 0x1cb   :  { %2817 = vmatmul.mubr.bf16.vlgmr.msra.gmra.mxu0 %v5866_v57  ;;  %2900 = vmatmul.mubr.bf16.vlgmr.msra.gmra.mxu1 %v5866_v57  ;;  %v5259_v57 = vld [vmem:[%s7258_s3 + $0x5ac] ss:$16 sps:$4 sm:$0xff]   ;;  %v6376_v40 = vpop.f32.mrf.mxu0  ;;  %v6378_v44 = vpop.f32.mrf.mxu1 }
 0x1cc   :  { %3185 = vmatpush1.bf16.msra.mxu0 %v5242_v27  ;;  %3268 = vmatpush1.bf16.msra.mxu1 %v5245_v31 }
 0x1cd   :  { %3186 = vmatprep.subr.bf16.mxu0 %v5250_v32  ;;  %3269 = vmatprep.subr.bf16.mxu1 %v5253_v33  ;;  %v6396_v18 = vpop.f32.mrf.mxu0  ;;  %v6398_v45 = vpop.f32.mrf.mxu1 }
 0x1ce   :  { %2826 = vmatprep.mubr.bf16.mxu0 %v5338_v48  ;;  %2909 = vmatprep.mubr.bf16.mxu1 %v5338_v48 }
 0x1cf   :  { %v6412_v55 = vpop.f32.mrf.mxu0  ;;  %v6414_v62 = vpop.f32.mrf.mxu1 }
 0x1d0   :  { %3187 = vmatpush1.bf16.msra.mxu0 %v5248_v34  ;;  %3270 = vmatpush1.bf16.msra.mxu1 %v5251_v37 }
 0x1d1   :  { %3188 = vmatprep.subr.bf16.mxu0 %v5256_v38  ;;  %3271 = vmatprep.subr.bf16.mxu1 %v5259_v57  ;;  %v6432_v59 = vpop.f32.mrf.mxu0  ;;  %v6434_v30 = vpop.f32.mrf.mxu1 }
 0x1d3   :  { %2827 = vmatmul.mubr.bf16.gmra.mxu0 %v6070_v56  ;;  %2910 = vmatmul.mubr.bf16.gmra.mxu1 %v6070_v56  ;;  %v5271_v56 = vld [vmem:[%s7258_s3 + $0x56c] ss:$16 sps:$4 sm:$0xff]  }
 0x1d4   :  { %3189 = vmatpush1.bf16.msra.mxu0 %v5254_v35  ;;  %3272 = vmatpush1.bf16.msra.mxu1 %v5257_v39 }
 0x1d5   :  { %3190 = vmatprep.subr.bf16.mxu0 %v5262_v41  ;;  %3273 = vmatprep.subr.bf16.mxu1 %v5265_v36 }
 0x1d6   :  { %2836 = vmatprep.mubr.bf16.mxu0 %v5338_v48  ;;  %2919 = vmatprep.mubr.bf16.mxu1 %v5338_v48 }
 0x1d8   :  { %3191 = vmatpush1.bf16.msra.mxu0 %v5260_v10  ;;  %3274 = vmatpush1.bf16.msra.mxu1 %v5263_v11 }
 0x1d9   :  { %3192 = vmatprep.subr.bf16.mxu0 %v5268_v16  ;;  %3275 = vmatprep.subr.bf16.mxu1 %v5271_v56 }
 0x1db   :  { %2837 = vmatmul.mubr.bf16.gmra.mxu0 %v6098_v21  ;;  %2920 = vmatmul.mubr.bf16.gmra.mxu1 %v6098_v21  ;;  %v5283_v21 = vld [vmem:[%s7258_s3 + $0x52c] ss:$16 sps:$4 sm:$0xff]   ;;  %v6442_v1 = vpop.f32.mrf.mxu0  ;;  %v6444_v3 = vpop.f32.mrf.mxu1 }
 0x1dc   :  { %3193 = vmatpush1.bf16.msra.mxu0 %v5266_v50  ;;  %3276 = vmatpush1.bf16.msra.mxu1 %v5269_v51 }
 0x1dd   :  { %2846 = vmatprep.mubr.bf16.mxu0 %v5338_v48  ;;  %2929 = vmatprep.mubr.bf16.mxu1 %v5338_v48  ;;  %v6460_v12 = vpop.f32.mrf.mxu0  ;;  %v6462_v13 = vpop.f32.mrf.mxu1 }
 0x1de   :  { %3194 = vmatprep.subr.bf16.mxu0 %v5274_v52  ;;  %3277 = vmatprep.subr.bf16.mxu1 %v5277_v53 }
 0x1df   :  { %v6468_v14 = vpop.f32.mrf.mxu1 }
 0x1e0   :  { %3195 = vmatpush1.bf16.msra.mxu0 %v5272_v5  ;;  %3278 = vmatpush1.bf16.msra.mxu1 %v5275_v6 }
 0x1e1   :  { %3196 = vmatprep.subr.bf16.mxu0 %v5280_v58  ;;  %3279 = vmatprep.subr.bf16.mxu1 %v5283_v21  ;;  %v6476_v20 = vpop.f32.mrf.mxu1 }
 0x1e3   :  { %2847 = vmatmul.mubr.bf16.gmra.mxu0 %v5962_v2  ;;  %2930 = vmatmul.mubr.bf16.gmra.mxu1 %v5962_v2  ;;  %v6466_v2 = vpop.f32.mrf.mxu0 }
 0x1e4   :  { %3197 = vmatpush1.bf16.msra.mxu0 %v5278_v61  ;;  %3280 = vmatpush1.bf16.msra.mxu1 %v5281_v0 }
 0x1e5   :  { %2856 = vmatprep.mubr.bf16.mxu0 %v5338_v48  ;;  %2939 = vmatprep.mubr.bf16.mxu1 %v5338_v48  ;;  %v6474_v15 = vpop.f32.mrf.mxu0 }
 0x1e6   :  { %3198 = vmatprep.subr.bf16.mxu0 %v5286_v4  ;;  %3281 = vmatprep.subr.bf16.mxu1 %v5289_v7 }
 0x1e8   :  { %3199 = vmatpush1.bf16.msra.mxu0 %v5284_v60  ;;  %3282 = vmatpush1.bf16.msra.mxu1 %v5287_v8 }
 0x1eb   :  { %2857 = vmatmul.mubr.bf16.gmra.mxu0 %v6041_v29  ;;  %2940 = vmatmul.mubr.bf16.gmra.mxu1 %v6041_v29  ;;  %v6478_v22 = vpop.f32.mrf.mxu0  ;;  %v6480_v17 = vpop.f32.mrf.mxu1 }
 0x1ec   :  { %3216 = vmatprep.mubr.bf16.mxu0 %v5338_v48  ;;  %3299 = vmatprep.mubr.bf16.mxu1 %v5338_v48 }
 0x1ed   :  { %v6482_v23 = vpop.f32.mrf.mxu0  ;;  %v6484_v24 = vpop.f32.mrf.mxu1 }
 0x1ef   :  { %v6490_v29 = vpop.f32.mrf.mxu0  ;;  %v6492_v42 = vpop.f32.mrf.mxu1 }
 0x1f1   :  { %v6494_v46 = vpop.f32.mrf.mxu0  ;;  %v6496_v43 = vpop.f32.mrf.mxu1 }
 0x1f3   :  { %3217 = vmatmul.mubr.bf16.vlgmr.msra.gmra.mxu0 %v5907_v19  ;;  %3300 = vmatmul.mubr.bf16.vlgmr.msra.gmra.mxu1 %v5907_v19 }
 0x1f4   :  { %3226 = vmatprep.mubr.bf16.mxu0 %v5338_v48  ;;  %3309 = vmatprep.mubr.bf16.mxu1 %v5338_v48 }
 0x1fb   :  { %3227 = vmatmul.mubr.bf16.gmra.mxu0 %v5934_v49  ;;  %3310 = vmatmul.mubr.bf16.gmra.mxu1 %v5934_v49  ;;  %v6502_v19 = vpop.f32.mrf.mxu0  ;;  %v6504_v9 = vpop.f32.mrf.mxu1 }
 0x1fc   :  { %3236 = vmatprep.mubr.bf16.mxu0 %v5338_v48  ;;  %3319 = vmatprep.mubr.bf16.mxu1 %v5338_v48 }
 0x1fd   :  { %v6506_v47 = vpop.f32.mrf.mxu0  ;;  %v6508_v25 = vpop.f32.mrf.mxu1 }
 0x1ff   :  { %v6514_v49 = vpop.f32.mrf.mxu0  ;;  %v6516_v26 = vpop.f32.mrf.mxu1 }
 0x201   :  { %v6518_v27 = vpop.f32.mrf.mxu0  ;;  %v6520_v31 = vpop.f32.mrf.mxu1 }
 0x203   :  { %3237 = vmatmul.mubr.bf16.gmra.mxu0 %v5942_v28  ;;  %3320 = vmatmul.mubr.bf16.gmra.mxu1 %v5942_v28 }
 0x204   :  { %3246 = vmatprep.mubr.bf16.mxu0 %v5338_v48  ;;  %3329 = vmatprep.mubr.bf16.mxu1 %v5338_v48 }
 0x20b   :  { %v6522_v32 = vpop.f32.mrf.mxu0  ;;  %v6524_v33 = vpop.f32.mrf.mxu1  ;;  %3247 = vmatmul.mubr.bf16.gmra.mxu0 %v6003_v54  ;;  %3330 = vmatmul.mubr.bf16.gmra.mxu1 %v6003_v54 }
 0x20c   :  { %3256 = vmatprep.mubr.bf16.mxu0 %v5338_v48  ;;  %3339 = vmatprep.mubr.bf16.mxu1 %v5338_v48 }
 0x20d   :  { %v6530_v28 = vpop.f32.mrf.mxu0  ;;  %v6532_v34 = vpop.f32.mrf.mxu1 }
 0x20f   :  { %v6534_v37 = vpop.f32.mrf.mxu0  ;;  %v6536_v38 = vpop.f32.mrf.mxu1 }
 0x211   :  { %v6538_v57 = vpop.f32.mrf.mxu0  ;;  %v6540_v35 = vpop.f32.mrf.mxu1 }
 0x213   :  { %v6542_v39 = vpop.f32.mrf.mxu0  ;;  %v6544_v41 = vpop.f32.mrf.mxu1  ;;  %3257 = vmatmul.mubr.bf16.gmra.mxu0 %v6073_v63  ;;  %3340 = vmatmul.mubr.bf16.gmra.mxu1 %v6073_v63 }
 0x215   :  { %v6548_v48 = vpop.f32.mrf.mxu0  ;;  %v6550_v54 = vpop.f32.mrf.mxu1 }
 0x217   :  { %v6552_v36 = vpop.f32.mrf.mxu0  ;;  %v6554_v10 = vpop.f32.mrf.mxu1 }
 0x219   :  { %v1664_v11 = vpop.f32.mrf.mxu0  ;;  %v1747_v16 = vpop.f32.mrf.mxu1 }
 0x21a   :  { %v6557_v56 = vadd.f32 %v1664_v11, %v6432_v59  ;;  %v6560_v50 = vadd.f32 %v1747_v16, %v6434_v30  ;;  %v7266_v16 = vmov 0.0  }
 0x21b   :  { %v1668_v51 = vpop.f32.mrf.mxu0  ;;  %v1751_v52 = vpop.f32.mrf.mxu1  ;;  %4759 = vmatprep.subr.bf16.mxu0 %v7266_v16  ;;  %4779 = vmatprep.subr.bf16.mxu1 %v7266_v16 }
 0x21c   :  { %v6563_v63 = vadd.f32 %v1668_v51, %v6442_v1  ;;  %v6566_v53 = vadd.f32 %v1751_v52, %v6444_v3  ;;  %4795 = vmatprep.mubr.msk.bf16.mxu1 %vm5340_vm1, %v7266_v16  ;;  %4775 = vmatprep.mubr.msk.bf16.mxu0 %vm5340_vm1, %v7266_v16 }
 0x21d   :  { %v1670_v5 = vpop.f32.mrf.mxu0  ;;  %v1753_v6 = vpop.f32.mrf.mxu1 }
 0x21e   :  { %v6569_v58 = vadd.f32 %v1670_v5, %v6460_v12  ;;  %v6572_v21 = vadd.f32 %v1753_v6, %v6462_v13  ;;  %v5292_v6 = vld [vmem:[%s7260_s5 + $0x30] sm:$0xff]  }
 0x21f   :  { %v1672_v59 = vpop.f32.mrf.mxu0  ;;  %v1755_v61 = vpop.f32.mrf.mxu1 }
 0x220   :  { %v6575_v30 = vadd.f32 %v1672_v59, %v6466_v2  ;;  %v6578_v0 = vadd.f32 %v1755_v61, %v6468_v14  ;;  %v5291_v14 = vld [vmem:[%s7260_s5 + $0x38] sm:$0xff]  }
 0x221   :  { %v1674_v1 = vpop.f32.mrf.mxu0  ;;  %v1757_v4 = vpop.f32.mrf.mxu1  ;;  %4780 = vmatpush3.bf16.msra.mxu1 %v5291_v14 }
 0x222   :  { %v6581_v3 = vadd.f32 %v1674_v1, %v6474_v15  ;;  %v6584_v7 = vadd.f32 %v1757_v4, %v6476_v20  ;;  %4781 = vmatprep.subr.bf16.mxu1 %v7266_v16  ;;  %v5293_v1 = vld [vmem:[%s7260_s5 + $0x70] sm:$0xff]  }
 0x223   :  { %v1678_v60 = vpop.f32.mrf.mxu0  ;;  %v1761_v8 = vpop.f32.mrf.mxu1 }
 0x224   :  { %v6587_v12 = vadd.f32 %v1678_v60, %v6478_v22  ;;  %v6590_v13 = vadd.f32 %v1761_v8, %v6480_v17  ;;  %v5290_v22 = vld [vmem:[%s7260_s5 + $0x78] sm:$0xff]   ;;  %v5294_v8 = vld [vmem:[%s7260_s5 + $0x28] sm:$0xff]  }
 0x225   :  { %v1680_v2 = vpop.f32.mrf.mxu0  ;;  %v1763_v11 = vpop.f32.mrf.mxu1  ;;  %4760 = vmatpush3.bf16.msra.mxu0 %v5290_v22  ;;  %4782 = vmatpush3.bf16.msra.mxu1 %v5292_v6 }
 0x226   :  { %v6596_v15 = vadd.f32 %v1680_v2, %v6482_v23  ;;  %v6599_v20 = vadd.f32 %v1763_v11, %v6484_v24  ;;  %4761 = vmatprep.subr.bf16.mxu0 %v7266_v16  ;;  %4783 = vmatprep.subr.bf16.mxu1 %v7266_v16 }
 0x227   :  { %v1682_v17 = vpop.f32.mrf.mxu0  ;;  %v1765_v51 = vpop.f32.mrf.mxu1 }
 0x228   :  { %v6607_v52 = vadd.f32 %v1682_v17, %v6490_v29  ;;  %v6610_v23 = vadd.f32 %v1765_v51, %v6492_v42  ;;  %v5296_v51 = vld [vmem:[%s7260_s5 + $0x20] sm:$0xff]  }
 0x229   :  { %v6613_v24 = vpop.f32.mrf.mxu0  ;;  %v6615_v5 = vpop.f32.mrf.mxu1  ;;  %4762 = vmatpush3.bf16.msra.mxu0 %v5293_v1  ;;  %4784 = vmatpush3.bf16.msra.mxu1 %v5294_v8 }
 0x22a   :  { %4763 = vmatprep.subr.bf16.mxu0 %v7266_v16  ;;  %4785 = vmatprep.subr.bf16.mxu1 %v7266_v16 }
 0x22b   :  { %v1688_v59 = vpop.f32.mrf.mxu0  ;;  %v1771_v61 = vpop.f32.mrf.mxu1 }
 0x22c   :  { %v6622_v29 = vadd.f32 %v1688_v59, %v6502_v19  ;;  %v6625_v42 = vadd.f32 %v1771_v61, %v6504_v9 }
 0x22d   :  { %v1690_v4 = vpop.f32.mrf.mxu0  ;;  %v1773_v60 = vpop.f32.mrf.mxu1  ;;  %4786 = vmatpush3.bf16.msra.mxu1 %v5296_v51 }
 0x22e   :  { %v6635_v2 = vadd.f32 %v1690_v4, %v6506_v47  ;;  %v6638_v19 = vadd.f32 %v1773_v60, %v6508_v25  ;;  %v5295_v47 = vld [vmem:[%s7260_s5 + $0x68] sm:$0xff]   ;;  %4787 = vmatprep.subr.bf16.mxu1 %v7266_v16  ;;  %v5298_v4 = vld [vmem:[%s7260_s5 + $0x18] sm:$0xff]  }
 0x22f   :  { %v1692_v9 = vpop.f32.mrf.mxu0  ;;  %v1775_v11 = vpop.f32.mrf.mxu1  ;;  %4764 = vmatpush3.bf16.msra.mxu0 %v5295_v47 }
 0x230   :  { %v6642_v14 = vadd.f32 %v1692_v9, %v6514_v49  ;;  %v6645_v22 = vadd.f32 %v1775_v11, %v6516_v26  ;;  %4765 = vmatprep.subr.bf16.mxu0 %v7266_v16 }
 0x231   :  { %v6651_v25 = vpop.f32.mrf.mxu0  ;;  %v6653_v17 = vpop.f32.mrf.mxu1  ;;  %4788 = vmatpush3.bf16.msra.mxu1 %v5298_v4 }
 0x232   :  { %4789 = vmatprep.subr.bf16.mxu1 %v7266_v16 }
 0x233   :  { %v1698_v49 = vpop.f32.mrf.mxu0  ;;  %v1781_v6 = vpop.f32.mrf.mxu1 }
 0x234   :  { %v6660_v26 = vadd.f32 %v1698_v49, %v6522_v32  ;;  %v6663_v59 = vadd.f32 %v1781_v6, %v6524_v33  ;;  %v1661_v49 = vadd.f32 %v6548_v48, %v6396_v18  ;;  %v5299_v18 = vld [vmem:[%s7260_s5 + $0x58] sm:$0xff]  }
 0x235   :  { %v1700_v61 = vpop.f32.mrf.mxu0  ;;  %v1783_v1 = vpop.f32.mrf.mxu1 }
 0x236   :  { %v6670_v60 = vadd.f32 %v1700_v61, %v6530_v28  ;;  %v6673_v8 = vadd.f32 %v1783_v1, %v6532_v34  ;;  %v5297_v28 = vld [vmem:[%s7260_s5 + $0x60] sm:$0xff]   ;;  %v5300_v34 = vld [vmem:[%s7260_s5 + $0x10] sm:$0xff]   ;;  %v1744_v1 = vadd.f32 %v6550_v54, %v6398_v45  ;;  %v1663_v45 = vadd.f32 %v6552_v36, %v6412_v55 }
 0x237   :  { %v1702_v9 = vpop.f32.mrf.mxu0  ;;  %v1785_v32 = vpop.f32.mrf.mxu1  ;;  %4766 = vmatpush3.bf16.msra.mxu0 %v5297_v28  ;;  %4790 = vmatpush3.bf16.msra.mxu1 %v5300_v34 }
 0x238   :  { %v6676_v33 = vadd.f32 %v1702_v9, %v6534_v37  ;;  %v6679_v11 = vadd.f32 %v1785_v32, %v6536_v38  ;;  %v1659_v37 = vadd.f32 %v6542_v39, %v6376_v40  ;;  %v1742_v38 = vadd.f32 %v6544_v41, %v6378_v44  ;;  %4767 = vmatprep.subr.bf16.mxu0 %v7266_v16  ;;  %v5301_v39 = vld [vmem:[%s7260_s5 + $0x8] sm:$0xff]  }
 0x239   :  { %v6682_v47 = vpop.f32.mrf.mxu0  ;;  %v6684_v51 = vpop.f32.mrf.mxu1  ;;  %4791 = vmatprep.subr.bf16.mxu1 %v7266_v16  ;;  %v1746_v41 = vadd.f32 %v6554_v10, %v6414_v62  ;;  %v5302_v62 = vld [vmem:[%s7260_s5 + $0x50] sm:$0xff]   ;;  %v5303_v10 = vld [vmem:[%s7260_s5] sm:$0xff]  }
 0x23b   :  { %v2018_v6 = vpop.f32.mrf.mxu0  ;;  %v2101_v61 = vpop.f32.mrf.mxu1  ;;  %4768 = vmatpush3.bf16.msra.mxu0 %v5299_v18  ;;  %4792 = vmatpush3.bf16.msra.mxu1 %v5301_v39 }
 0x23c   :  { %v6700_v4 = vadd.f32 %v2018_v6, %v1659_v37  ;;  %v6702_v9 = vadd.f32 %v2101_v61, %v1742_v38  ;;  %4769 = vmatprep.subr.bf16.mxu0 %v7266_v16  ;;  %4793 = vmatprep.subr.bf16.mxu1 %v7266_v16 }
 0x23d   :  { %v2020_v40 = vpop.f32.mrf.mxu0  ;;  %v2103_v44 = vpop.f32.mrf.mxu1 }
 0x23e   :  { %v6716_v48 = vadd.f32 %v2020_v40, %v1661_v49  ;;  %v6718_v54 = vadd.f32 %v2103_v44, %v1744_v1 }
 0x23f   :  { %v2022_v32 = vpop.f32.mrf.mxu0  ;;  %v2105_v28 = vpop.f32.mrf.mxu1  ;;  %4770 = vmatpush3.bf16.msra.mxu0 %v5302_v62  ;;  %4794 = vmatpush3.bf16.msra.mxu1 %v5303_v10 }
 0x240   :  { %v6720_v34 = vadd.f32 %v2022_v32, %v1663_v45  ;;  %v6722_v37 = vadd.f32 %v2105_v28, %v1746_v41  ;;  %4771 = vmatprep.subr.bf16.mxu0 %v7266_v16  ;;  %4819 = vmatprep.subr.bf16.mxu1 %v7266_v16  ;;  %v5306_v32 = vld [vmem:[%s7260_s5 + $0x40] sm:$0xff]  }
 0x241   :  { %v2024_v55 = vpop.f32.mrf.mxu0  ;;  %v2107_v36 = vpop.f32.mrf.mxu1 }
 0x242   :  { %v6733_v38 = vadd.f32 %v2024_v55, %v6557_v56  ;;  %v6736_v49 = vadd.f32 %v2107_v36, %v6560_v50  ;;  %v5304_v50 = vld [vmem:[%s7260_s5 + $0x48] sm:$0xff]  }
 0x243   :  { %v2028_v6 = vpop.f32.mrf.mxu0  ;;  %v2111_v61 = vpop.f32.mrf.mxu1  ;;  %4772 = vmatpush3.bf16.msra.mxu0 %v5304_v50 }
 0x244   :  { %v6739_v1 = vadd.f32 %v2028_v6, %v6563_v63  ;;  %v6742_v40 = vadd.f32 %v2111_v61, %v6566_v53  ;;  %4773 = vmatprep.subr.bf16.mxu0 %v7266_v16 }
 0x245   :  { %v2030_v44 = vpop.f32.mrf.mxu0  ;;  %v2113_v56 = vpop.f32.mrf.mxu1 }
 0x246   :  { %v6750_v18 = vadd.f32 %v2030_v44, %v6569_v58  ;;  %v6753_v39 = vadd.f32 %v2113_v56, %v6572_v21  ;;  %v1685_v56 = vadd.f32 %v6613_v24, %v6494_v46 }
 0x247   :  { %v2032_v63 = vpop.f32.mrf.mxu0  ;;  %v2115_v53 = vpop.f32.mrf.mxu1  ;;  %4774 = vmatpush3.bf16.msra.mxu0 %v5306_v32 }
 0x248   :  { %v6760_v45 = vadd.f32 %v2032_v63, %v6575_v30  ;;  %v6763_v41 = vadd.f32 %v2115_v53, %v6578_v0  ;;  %4799 = vmatprep.subr.bf16.mxu0 %v7266_v16 }
 0x249   :  { %v2034_v58 = vpop.f32.mrf.mxu0  ;;  %v2117_v21 = vpop.f32.mrf.mxu1 }
 0x24a   :  { %v6770_v28 = vadd.f32 %v2034_v58, %v6581_v3  ;;  %v6773_v55 = vadd.f32 %v2117_v21, %v6584_v7 }
 0x24b   :  { %v2038_v36 = vpop.f32.mrf.mxu0  ;;  %v2121_v30 = vpop.f32.mrf.mxu1 }
 0x24c   :  { %v6776_v0 = vadd.f32 %v2038_v36, %v6587_v12  ;;  %v6779_v62 = vadd.f32 %v2121_v30, %v6590_v13  ;;  %v1768_v12 = vadd.f32 %v6615_v5, %v6496_v43  ;;  %v1695_v30 = vadd.f32 %v6651_v25, %v6518_v27 }
 0x24d   :  { %v2040_v10 = vpop.f32.mrf.mxu0  ;;  %v2123_v6 = vpop.f32.mrf.mxu1 }
 0x24e   :  { %v6783_v61 = vadd.f32 %v2040_v10, %v6596_v15  ;;  %v6786_v3 = vadd.f32 %v2123_v6, %v6599_v20 }
 0x24f   :  { %v2042_v7 = vpop.f32.mrf.mxu0  ;;  %v2125_v44 = vpop.f32.mrf.mxu1 }
 0x250   :  { %v6793_v13 = vadd.f32 %v2042_v7, %v6607_v52  ;;  %v6796_v50 = vadd.f32 %v2125_v44, %v6610_v23 }
 0x251   :  { %v2044_v63 = vpop.f32.mrf.mxu0  ;;  %v2127_v15 = vpop.f32.mrf.mxu1 }
 0x252   :  { %v6798_v53 = vadd.f32 %v2044_v63, %v1685_v56  ;;  %v6800_v20 = vadd.f32 %v2127_v15, %v1768_v12  ;;  %v1705_v15 = vadd.f32 %v6682_v47, %v6538_v57 }
 0x253   :  { %v2048_v58 = vpop.f32.mrf.mxu0  ;;  %v2131_v21 = vpop.f32.mrf.mxu1 }
 0x254   :  { %v6803_v32 = vadd.f32 %v2048_v58, %v6622_v29  ;;  %v6806_v46 = vadd.f32 %v2131_v21, %v6625_v42  ;;  %v1778_v29 = vadd.f32 %v6653_v17, %v6520_v31 }
 0x255   :  { %v2050_v43 = vpop.f32.mrf.mxu0  ;;  %v2133_v52 = vpop.f32.mrf.mxu1 }
 0x256   :  { %v6809_v24 = vadd.f32 %v2050_v43, %v6635_v2  ;;  %v6812_v23 = vadd.f32 %v2133_v52, %v6638_v19 }
 0x257   :  { %v2052_v5 = vpop.f32.mrf.mxu0  ;;  %v2135_v36 = vpop.f32.mrf.mxu1 }
 0x258   :  { %v6819_v10 = vadd.f32 %v2052_v5, %v6642_v14  ;;  %v6822_v42 = vadd.f32 %v2135_v36, %v6645_v22 }
 0x259   :  { %v2054_v6 = vpop.f32.mrf.mxu0  ;;  %v2137_v2 = vpop.f32.mrf.mxu1 }
 0x25a   :  { %v6824_v7 = vadd.f32 %v2054_v6, %v1695_v30  ;;  %v6826_v19 = vadd.f32 %v2137_v2, %v1778_v29 }
 0x25b   :  { %v2058_v44 = vpop.f32.mrf.mxu0  ;;  %v2141_v56 = vpop.f32.mrf.mxu1 }
 0x25c   :  { %v6829_v12 = vadd.f32 %v2058_v44, %v6660_v26  ;;  %v6832_v27 = vadd.f32 %v2141_v56, %v6663_v59  ;;  %v1788_v26 = vadd.f32 %v6684_v51, %v6540_v35 }
 0x25d   :  { %v2060_v31 = vpop.f32.mrf.mxu0  ;;  %v2143_v14 = vpop.f32.mrf.mxu1 }
 0x25e   :  { %v6835_v25 = vadd.f32 %v2060_v31, %v6670_v60  ;;  %v6838_v22 = vadd.f32 %v2143_v14, %v6673_v8 }
 0x25f   :  { %v2062_v17 = vpop.f32.mrf.mxu0  ;;  %v2145_v63 = vpop.f32.mrf.mxu1 }
 0x260   :  { %v6845_v58 = vadd.f32 %v2062_v17, %v6676_v33  ;;  %v6848_v59 = vadd.f32 %v2145_v63, %v6679_v11 }
 0x261   :  { %v2064_v21 = vpop.f32.mrf.mxu0  ;;  %v2147_v60 = vpop.f32.mrf.mxu1 }
 0x262   :  { %v6850_v43 = vadd.f32 %v2064_v21, %v1705_v15  ;;  %v6852_v8 = vadd.f32 %v2147_v60, %v1788_v26 }
 0x263   :  { %v2418_v52 = vpop.f32.mrf.mxu0  ;;  %v2501_v5 = vpop.f32.mrf.mxu1 }
 0x264   :  { %v6855_v36 = vadd.f32 %v2418_v52, %v6700_v4  ;;  %v6858_v57 = vadd.f32 %v2501_v5, %v6702_v9 }
 0x265   :  { %v2420_v35 = vpop.f32.mrf.mxu0  ;;  %v2503_v33 = vpop.f32.mrf.mxu1 }
 0x266   :  { %v6861_v47 = vadd.f32 %v2420_v35, %v6716_v48  ;;  %v6864_v11 = vadd.f32 %v2503_v33, %v6718_v54 }
 0x267   :  { %v2422_v51 = vpop.f32.mrf.mxu0  ;;  %v2505_v30 = vpop.f32.mrf.mxu1 }
 0x268   :  { %v6867_v29 = vadd.f32 %v2422_v51, %v6720_v34  ;;  %v6870_v6 = vadd.f32 %v2505_v30, %v6722_v37 }
 0x269   :  { %v2424_v4 = vpop.f32.mrf.mxu0  ;;  %v2507_v2 = vpop.f32.mrf.mxu1 }
 0x26a   :  { %v6873_v9 = vadd.f32 %v2424_v4, %v6733_v38  ;;  %v6876_v44 = vadd.f32 %v2507_v2, %v6736_v49 }
 0x26b   :  { %v2428_v48 = vpop.f32.mrf.mxu0  ;;  %v2511_v56 = vpop.f32.mrf.mxu1 }
 0x26c   :  { %v6879_v54 = vadd.f32 %v2428_v48, %v6739_v1  ;;  %v6882_v31 = vadd.f32 %v2511_v56, %v6742_v40 }
 0x26d   :  { %v2430_v34 = vpop.f32.mrf.mxu0  ;;  %v2513_v14 = vpop.f32.mrf.mxu1 }
 0x26e   :  { %v6885_v37 = vadd.f32 %v2430_v34, %v6750_v18  ;;  %v6888_v17 = vadd.f32 %v2513_v14, %v6753_v39 }
 0x26f   :  { %v2432_v38 = vpop.f32.mrf.mxu0  ;;  %v2515_v63 = vpop.f32.mrf.mxu1 }
 0x270   :  { %v6891_v49 = vadd.f32 %v2432_v38, %v6760_v45  ;;  %v6894_v15 = vadd.f32 %v2515_v63, %v6763_v41 }
 0x271   :  { %v2434_v1 = vpop.f32.mrf.mxu0  ;;  %v2517_v26 = vpop.f32.mrf.mxu1 }
 0x272   :  { %v6897_v40 = vadd.f32 %v2434_v1, %v6770_v28  ;;  %v6900_v21 = vadd.f32 %v2517_v26, %v6773_v55 }
 0x273   :  { %v2438_v18 = vpop.f32.mrf.mxu0  ;;  %v2521_v60 = vpop.f32.mrf.mxu1 }
 0x274   :  { %v6903_v39 = vadd.f32 %v2438_v18, %v6776_v0  ;;  %v6906_v52 = vadd.f32 %v2521_v60, %v6779_v62 }
 0x275   :  { %v2440_v45 = vpop.f32.mrf.mxu0  ;;  %v2523_v5 = vpop.f32.mrf.mxu1 }
 0x276   :  { %v6909_v41 = vadd.f32 %v2440_v45, %v6783_v61  ;;  %v6912_v35 = vadd.f32 %v2523_v5, %v6786_v3 }
 0x277   :  { %v2442_v28 = vpop.f32.mrf.mxu0  ;;  %v2525_v33 = vpop.f32.mrf.mxu1 }
 0x278   :  { %v6915_v55 = vadd.f32 %v2442_v28, %v6793_v13  ;;  %v6918_v51 = vadd.f32 %v2525_v33, %v6796_v50 }
 0x279   :  { %v2444_v0 = vpop.f32.mrf.mxu0  ;;  %v2527_v30 = vpop.f32.mrf.mxu1 }
 0x27a   :  { %v6921_v62 = vadd.f32 %v2444_v0, %v6798_v53  ;;  %v6924_v4 = vadd.f32 %v2527_v30, %v6800_v20 }
 0x27b   :  { %v2448_v61 = vpop.f32.mrf.mxu0  ;;  %v2531_v2 = vpop.f32.mrf.mxu1 }
 0x27c   :  { %v6927_v3 = vadd.f32 %v2448_v61, %v6803_v32  ;;  %v6930_v48 = vadd.f32 %v2531_v2, %v6806_v46 }
 0x27d   :  { %v2450_v13 = vpop.f32.mrf.mxu0  ;;  %v2533_v56 = vpop.f32.mrf.mxu1 }
 0x27e   :  { %7268 = vst [vmem:[#allocation2_spill] sm:$0xff] %v6927_v3  ;;  %7269 = vst [vmem:[#allocation3_spill] sm:$0xff] %v6930_v48  ;;  %v6933_v50 = vadd.f32 %v2450_v13, %v6809_v24  ;;  %v6936_v34 = vadd.f32 %v2533_v56, %v6812_v23 }
 0x27f   :  { %v2452_v53 = vpop.f32.mrf.mxu0  ;;  %v2535_v14 = vpop.f32.mrf.mxu1 }
 0x280   :  { %7270 = vst [vmem:[#allocation4_spill] sm:$0xff] %v6933_v50  ;;  %7271 = vst [vmem:[#allocation5_spill] sm:$0xff] %v6936_v34  ;;  %v6939_v20 = vadd.f32 %v2452_v53, %v6819_v10  ;;  %v6942_v38 = vadd.f32 %v2535_v14, %v6822_v42 }
 0x281   :  { %v2454_v32 = vpop.f32.mrf.mxu0  ;;  %v2537_v63 = vpop.f32.mrf.mxu1 }
 0x282   :  { %7272 = vst [vmem:[#allocation6_spill] sm:$0xff] %v6939_v20  ;;  %7273 = vst [vmem:[#allocation7_spill] sm:$0xff] %v6942_v38  ;;  %v6945_v46 = vadd.f32 %v2454_v32, %v6824_v7  ;;  %v6948_v1 = vadd.f32 %v2537_v63, %v6826_v19 }
 0x283   :  { %v2458_v24 = vpop.f32.mrf.mxu0  ;;  %v2541_v26 = vpop.f32.mrf.mxu1 }
 0x284   :  { %7274 = vst [vmem:[#allocation8_spill] sm:$0xff] %v6945_v46  ;;  %7275 = vst [vmem:[#allocation9_spill] sm:$0xff] %v6948_v1  ;;  %v2582_v23 = vadd.f32 %v2458_v24, %v6829_v12  ;;  %v2584_v18 = vadd.f32 %v2541_v26, %v6832_v27 }
 0x285   :  { %v2460_v60 = vpop.f32.mrf.mxu0  ;;  %v2543_v10 = vpop.f32.mrf.mxu1 }
 0x286   :  { %v2583_v45 = vadd.f32 %v2460_v60, %v6835_v25  ;;  %v2585_v42 = vadd.f32 %v2543_v10, %v6838_v22 }
 0x287   :  { %v2462_v5 = vpop.f32.mrf.mxu0  ;;  %v2545_v28 = vpop.f32.mrf.mxu1 }
 0x288   :  { %v2586_v7 = vadd.f32 %v2462_v5, %v6845_v58  ;;  %v2588_v33 = vadd.f32 %v2545_v28, %v6848_v59 }
 0x289   :  { %v2464_v19 = vpop.f32.mrf.mxu0  ;;  %v2547_v0 = vpop.f32.mrf.mxu1 }
 0x28a   :  { %v2587_v30 = vadd.f32 %v2464_v19, %v6850_v43  ;;  %v2589_v12 = vadd.f32 %v2547_v0, %v6852_v8 }
 0x28b   :  { %v2818_v61 = vpop.f32.mrf.mxu0  ;;  %v2901_v27 = vpop.f32.mrf.mxu1 }
 0x28d   :  { %v2820_v2 = vpop.f32.mrf.mxu0  ;;  %v2903_v13 = vpop.f32.mrf.mxu1 }
 0x28f   :  { %v2822_v56 = vpop.f32.mrf.mxu0  ;;  %v2905_v25 = vpop.f32.mrf.mxu1 }
 0x291   :  { %v6958_v53 = vpop.f32.mrf.mxu0  ;;  %v6960_v22 = vpop.f32.mrf.mxu1 }
 0x293   :  { %v6962_v14 = vpop.f32.mrf.mxu0  ;;  %v6964_v58 = vpop.f32.mrf.mxu1 }
 0x295   :  { %v6966_v59 = vpop.f32.mrf.mxu0  ;;  %v6968_v32 = vpop.f32.mrf.mxu1 }
 0x297   :  { %v6970_v43 = vpop.f32.mrf.mxu0  ;;  %v6972_v8 = vpop.f32.mrf.mxu1 }
 0x299   :  { %v6974_v63 = vpop.f32.mrf.mxu0  ;;  %v6976_v24 = vpop.f32.mrf.mxu1 }
 0x29b   :  { %v2838_v26 = vpop.f32.mrf.mxu0  ;;  %v2921_v60 = vpop.f32.mrf.mxu1 }
 0x29c   :  { %v6979_v10 = vadd.f32 %v2838_v26, %v6903_v39  ;;  %v6982_v5 = vadd.f32 %v2921_v60, %v6906_v52 }
 0x29d   :  { %v2840_v28 = vpop.f32.mrf.mxu0  ;;  %v2923_v19 = vpop.f32.mrf.mxu1 }
 0x29e   :  { %v6985_v0 = vadd.f32 %v2840_v28, %v6909_v41  ;;  %v6988_v16 = vadd.f32 %v2923_v19, %v6912_v35 }
 0x29f   :  { %v2842_v1 = vpop.f32.mrf.mxu0  ;;  %v2925_v46 = vpop.f32.mrf.mxu1 }
 0x2a0   :  { %v6991_v38 = vadd.f32 %v2842_v1, %v6915_v55  ;;  %v6994_v20 = vadd.f32 %v2925_v46, %v6918_v51 }
 0x2a1   :  { %v6996_v39 = vpop.f32.mrf.mxu0  ;;  %v6998_v52 = vpop.f32.mrf.mxu1 }
 0x2a2   :  { %7276 = vst [vmem:[#allocation10_spill] sm:$0xff] %v6994_v20 }
 0x2a3   :  { %v7000_v26 = vpop.f32.mrf.mxu0  ;;  %v7002_v60 = vpop.f32.mrf.mxu1 }
 0x2a4   :  { %7277 = vst [vmem:[#allocation11_spill] sm:$0xff] %v7000_v26  ;;  %7278 = vst [vmem:[#allocation12_spill] sm:$0xff] %v7002_v60 }
 0x2a5   :  { %v7004_v41 = vpop.f32.mrf.mxu0  ;;  %v7006_v35 = vpop.f32.mrf.mxu1 }
 0x2a6   :  { %7279 = vst [vmem:[#allocation13_spill] sm:$0xff] %v7004_v41  ;;  %7280 = vst [vmem:[#allocation14_spill] sm:$0xff] %v7006_v35 }
 0x2a7   :  { %v7008_v28 = vpop.f32.mrf.mxu0  ;;  %v7010_v19 = vpop.f32.mrf.mxu1 }
 0x2a8   :  { %7281 = vst [vmem:[#allocation15_spill] sm:$0xff] %v7008_v28  ;;  %7282 = vst [vmem:[#allocation16_spill] sm:$0xff] %v7010_v19 }
 0x2a9   :  { %v7012_v55 = vpop.f32.mrf.mxu0  ;;  %v7014_v51 = vpop.f32.mrf.mxu1 }
 0x2aa   :  { %7283 = vst [vmem:[#allocation17_spill] sm:$0xff] %v7012_v55  ;;  %7284 = vst [vmem:[#allocation18_spill] sm:$0xff] %v7014_v51 }
 0x2ab   :  { %v2858_v46 = vpop.f32.mrf.mxu0  ;;  %v2941_v1 = vpop.f32.mrf.mxu1 }
 0x2ac   :  { %v7016_v34 = vadd.f32 %v2858_v46, %v2582_v23  ;;  %v7018_v50 = vadd.f32 %v2941_v1, %v2584_v18  ;;  %v2950_v1 = vadd.f32 %v2818_v61, %v6855_v36  ;;  %v2955_v36 = vadd.f32 %v6958_v53, %v6873_v9 }
 0x2ad   :  { %v2860_v48 = vpop.f32.mrf.mxu0  ;;  %v2943_v60 = vpop.f32.mrf.mxu1  ;;  %v2958_v9 = vadd.f32 %v6962_v14, %v6879_v54 }
 0x2ae   :  { %v7020_v26 = vadd.f32 %v2860_v48, %v2583_v45  ;;  %v7022_v41 = vadd.f32 %v2943_v60, %v2585_v42  ;;  %v2952_v48 = vadd.f32 %v2901_v27, %v6858_v57  ;;  %v2951_v45 = vadd.f32 %v2820_v2, %v6861_v47 }
 0x2af   :  { %v2862_v35 = vpop.f32.mrf.mxu0  ;;  %v2945_v28 = vpop.f32.mrf.mxu1  ;;  %v2953_v42 = vadd.f32 %v2903_v13, %v6864_v11  ;;  %v2957_v57 = vadd.f32 %v6960_v22, %v6876_v44  ;;  %v2960_v44 = vadd.f32 %v6964_v58, %v6882_v31  ;;  %v2962_v31 = vadd.f32 %v6970_v43, %v6891_v49 }
 0x2b0   :  { %v7024_v3 = vadd.f32 %v2862_v35, %v2586_v7  ;;  %v7026_v19 = vadd.f32 %v2945_v28, %v2588_v33 }
 0x2b1   :  { %v2864_v55 = vpop.f32.mrf.mxu0  ;;  %v2947_v51 = vpop.f32.mrf.mxu1 }
 0x2b2   :  { %7285 = vst [vmem:[#allocation19_spill] sm:$0xff] %v7026_v19  ;;  %v7028_v20 = vadd.f32 %v2864_v55, %v2587_v30  ;;  %v7030_v23 = vadd.f32 %v2947_v51, %v2589_v12  ;;  %v2954_v30 = vadd.f32 %v2822_v56, %v6867_v29  ;;  %v2956_v12 = vadd.f32 %v2905_v25, %v6870_v6  ;;  %v7045_v29 = vld [vmem:[%s7261_s4] ss:$0 sm:$0xff] }
 0x2b3   :  { %v3218_v18 = vpop.f32.mrf.mxu0  ;;  %v3301_v46 = vpop.f32.mrf.mxu1 }
 0x2b4   :  { %v3350_v33 = vadd.f32 %v3218_v18, %v2950_v1  ;;  %v3352_v35 = vadd.f32 %v3301_v46, %v2952_v48  ;;  %v2961_v18 = vadd.f32 %v6968_v32, %v6888_v17  ;;  %v2963_v17 = vadd.f32 %v6974_v63, %v6897_v40  ;;  %v5305_v63 = vld [vmem:[%s7260_s5 + $0xf8] sm:$0xff]  }
 0x2b5   :  { %v3220_v7 = vpop.f32.mrf.mxu0  ;;  %v3303_v60 = vpop.f32.mrf.mxu1  ;;  %v2965_v32 = vadd.f32 %v6976_v24, %v6900_v21 }
 0x2b6   :  { %v3351_v28 = vadd.f32 %v3220_v7, %v2951_v45  ;;  %v3353_v19 = vadd.f32 %v3303_v60, %v2953_v42 }
 0x2b7   :  { %v3222_v55 = vpop.f32.mrf.mxu0  ;;  %v3305_v51 = vpop.f32.mrf.mxu1 }
 0x2b8   :  { %v3390_v47 = vmax.f32 %v3350_v33, %v3351_v28  ;;  %v3400_v11 = vmax.f32 %v3352_v35, %v3353_v19  ;;  %v3354_v61 = vadd.f32 %v3222_v55, %v2954_v30  ;;  %v3356_v6 = vadd.f32 %v3305_v51, %v2956_v12 }
 0x2b9   :  { %v3224_v27 = vpop.f32.mrf.mxu0  ;;  %v3307_v2 = vpop.f32.mrf.mxu1  ;;  %v2959_v19 = vadd.f32 %v6966_v59, %v6885_v37  ;;  %v2964_v37 = vadd.f32 %v6972_v8, %v6894_v15 }
 0x2ba   :  { %v3410_v13 = vmax.f32 %v3390_v47, %v3400_v11  ;;  %v3355_v56 = vadd.f32 %v3224_v27, %v2955_v36  ;;  %v3357_v25 = vadd.f32 %v3307_v2, %v2957_v57 }
 0x2bb   :  { %v3228_v53 = vpop.f32.mrf.mxu0  ;;  %v3311_v22 = vpop.f32.mrf.mxu1 }
 0x2bc   :  { %v3391_v46 = vmax.f32 %v3354_v61, %v3355_v56  ;;  %v3401_v1 = vmax.f32 %v3356_v6, %v3357_v25  ;;  %v3427_v48 = vadd.f32 %v7045_v29, %v3410_v13  ;;  %v3358_v45 = vadd.f32 %v3228_v53, %v2958_v9 }
 0x2bd   :  { %v3230_v42 = vpop.f32.mrf.mxu0  ;;  %v3313_v7 = vpop.f32.mrf.mxu1  ;;  %v3360_v54 = vadd.f32 %v3311_v22, %v2960_v44  ;;  %v2971_v44 = vadd.f32 %v6996_v39, %v6921_v62 }
 0x2be   :  { %v3411_v60 = vmax.f32 %v3391_v46, %v3401_v1  ;;  %v3359_v14 = vadd.f32 %v3230_v42, %v2959_v19  ;;  %v3361_v33 = vadd.f32 %v3313_v7, %v2961_v18  ;;  %v3437_v12 = vmax.f32 %v3427_v48, 0.0  ;;  %v7287_v46 = vld [vmem:[#allocation10_spill] sm:$0xff] }
 0x2bf   :  { %v3232_v58 = vpop.f32.mrf.mxu0  ;;  %v3315_v59 = vpop.f32.mrf.mxu1  ;;  %v7286_v19 = vmov 0.0  }
 0x2c0   :  { %v3428_v35 = vadd.f32 %v7045_v29, %v3411_v60  ;;  %v3392_v28 = vmax.f32 %v3358_v45, %v3359_v14  ;;  %v3402_v30 = vmax.f32 %v3360_v54, %v3361_v33  ;;  %v3362_v55 = vadd.f32 %v3232_v58, %v2962_v31  ;;  %v7288_v14 = vld [vmem:[#allocation2_spill] sm:$0xff]  ;;  %v7289_v33 = vld [vmem:[#allocation11_spill] sm:$0xff]  ;;  %v7291_v31 = vld [vmem:[#allocation12_spill] sm:$0xff] }
 0x2c1   :  { %v3364_v51 = vadd.f32 %v3315_v59, %v2964_v37  ;;  %v3234_v36 = vpop.f32.mrf.mxu0  ;;  %v3317_v49 = vpop.f32.mrf.mxu1  ;;  %v7293_v58 = vld [vmem:[#allocation13_spill] sm:$0xff] }
 0x2c2   :  { %v3438_v43 = vmax.f32 %v3428_v35, 0.0  ;;  %v3412_v57 = vmax.f32 %v3392_v28, %v3402_v30  ;;  %v3363_v15 = vadd.f32 %v3234_v36, %v2963_v17  ;;  %v3365_v8 = vadd.f32 %v3317_v49, %v2965_v32  ;;  %v7292_v17 = vld [vmem:[#allocation4_spill] sm:$0xff]  ;;  %v5308_v35 = vld [vmem:[%s7260_s5 + $0xb8] sm:$0xff]   ;;  %v5309_v28 = vld [vmem:[%s7260_s5 + $0xe8] sm:$0xff]  }
 0x2c3   :  { %v3238_v47 = vpop.f32.mrf.mxu0  ;;  %v3321_v40 = vpop.f32.mrf.mxu1  ;;  %v2975_v59 = vadd.f32 %v7293_v58, %v7292_v17  ;;  %v7294_v30 = vld [vmem:[#allocation5_spill] sm:$0xff] }
 0x2c4   :  { %v3447_v21 = vpack.c.bf16 %v3438_v43, %v3437_v12  ;;  %v3393_v24 = vmax.f32 %v3362_v55, %v3363_v15  ;;  %v3403_v11 = vmax.f32 %v3364_v51, %v3365_v8  ;;  %v3429_v61 = vadd.f32 %v7045_v29, %v3412_v57  ;;  %v7295_v12 = vld [vmem:[#allocation14_spill] sm:$0xff] }
 0x2c5   :  { %v3366_v27 = vadd.f32 %v3238_v47, %v6979_v10  ;;  %v3240_v2 = vpop.f32.mrf.mxu0  ;;  %v3323_v13 = vpop.f32.mrf.mxu1  ;;  %v3368_v56 = vadd.f32 %v3321_v40, %v6982_v5  ;;  %v5307_v10 = vld [vmem:[%s7260_s5 + $0xf0] sm:$0xff]   ;;  %v2973_v5 = vadd.f32 %v6998_v52, %v6924_v4  ;;  %v2974_v4 = vadd.f32 %v7289_v33, %v7288_v14  ;;  %v7290_v52 = vld [vmem:[#allocation3_spill] sm:$0xff] }
 0x2c6   :  { %v3413_v6 = vmax.f32 %v3393_v24, %v3403_v11  ;;  %v3367_v25 = vadd.f32 %v3240_v2, %v6985_v0  ;;  %v3369_v9 = vadd.f32 %v3323_v13, %v6988_v16  ;;  %4796 = vmatmul.mubr.bf16.vlgmr.msra.gmra.mxu1 %v3447_v21  ;;  %v3439_v62 = vmax.f32 %v3429_v61, 0.0  ;;  %v7296_v24 = vld [vmem:[#allocation6_spill] sm:$0xff]  ;;  %v7297_v11 = vld [vmem:[#allocation15_spill] sm:$0xff]  ;;  %v7299_v2 = vld [vmem:[#allocation16_spill] sm:$0xff] }
 0x2c7   :  { %4820 = vmatpush3.bf16.msra.mxu1 %v5305_v63  ;;  %v3242_v53 = vpop.f32.mrf.mxu0  ;;  %v3325_v22 = vpop.f32.mrf.mxu1  ;;  %4835 = vmatprep.mubr.msk.bf16.mxu1 %vm5340_vm1, %v7286_v19  ;;  %v2976_v37 = vadd.f32 %v7291_v31, %v7290_v52  ;;  %v2977_v55 = vadd.f32 %v7295_v12, %v7294_v30  ;;  %v2978_v61 = vadd.f32 %v7297_v11, %v7296_v24  ;;  %v5313_v52 = vld [vmem:[%s7260_s5 + $0xd8] sm:$0xff]  }
 0x2c8   :  { %v3430_v0 = vadd.f32 %v7045_v29, %v3413_v6  ;;  %v3394_v16 = vmax.f32 %v3366_v27, %v3367_v25  ;;  %v3404_v18 = vmax.f32 %v3368_v56, %v3369_v9  ;;  %4821 = vmatprep.subr.bf16.mxu1 %v7286_v19  ;;  %v3370_v39 = vadd.f32 %v3242_v53, %v6991_v38  ;;  %v7298_v27 = vld [vmem:[#allocation7_spill] sm:$0xff]  ;;  %v7300_v6 = vld [vmem:[#allocation8_spill] sm:$0xff]  ;;  %v7301_v56 = vld [vmem:[#allocation17_spill] sm:$0xff] }
 0x2c9   :  { %v3372_v1 = vadd.f32 %v3325_v22, %v7287_v46  ;;  %v3244_v48 = vpop.f32.mrf.mxu0  ;;  %v3327_v45 = vpop.f32.mrf.mxu1  ;;  %v2980_v13 = vadd.f32 %v7299_v2, %v7298_v27  ;;  %v2979_v25 = vadd.f32 %v7301_v56, %v7300_v6  ;;  %v5310_v53 = vld [vmem:[%s7260_s5 + $0xb0] sm:$0xff]   ;;  %v5311_v22 = vld [vmem:[%s7260_s5 + $0xe0] sm:$0xff]   ;;  %v5316_v11 = vld [vmem:[%s7260_s5 + $0x98] sm:$0xff]  }
 0x2ca   :  { %v3440_v42 = vmax.f32 %v3430_v0, 0.0  ;;  %v3414_v7 = vmax.f32 %v3394_v16, %v3404_v18  ;;  %v3371_v60 = vadd.f32 %v3244_v48, %v2971_v44  ;;  %v3373_v54 = vadd.f32 %v3327_v45, %v2973_v5  ;;  %v7303_v5 = vld [vmem:[#allocation18_spill] sm:$0xff] }
 0x2cb   :  { %4822 = vmatpush3.bf16.msra.mxu1 %v5307_v10  ;;  %v3248_v32 = vpop.f32.mrf.mxu0  ;;  %v3331_v38 = vpop.f32.mrf.mxu1  ;;  %v7302_v10 = vld [vmem:[#allocation9_spill] sm:$0xff]  ;;  %v5319_v6 = vld [vmem:[%s7260_s5 + $0xc0] sm:$0xff]  }
 0x2cc   :  { %v3464_v51 = vpack.c.bf16 %v3440_v42, %v3439_v62  ;;  %v3395_v36 = vmax.f32 %v3370_v39, %v3371_v60  ;;  %v3405_v49 = vmax.f32 %v3372_v1, %v3373_v54  ;;  %4823 = vmatprep.subr.bf16.mxu1 %v7286_v19  ;;  %v3431_v43 = vadd.f32 %v7045_v29, %v3414_v7 }
 0x2cd   :  { %v3374_v57 = vadd.f32 %v3248_v32, %v2974_v4  ;;  %v3250_v15 = vpop.f32.mrf.mxu0  ;;  %v3333_v8 = vpop.f32.mrf.mxu1  ;;  %v3376_v40 = vadd.f32 %v3331_v38, %v2976_v37  ;;  %v2981_v0 = vadd.f32 %v7303_v5, %v7302_v10  ;;  %v5312_v4 = vld [vmem:[%s7260_s5 + $0xa8] sm:$0xff]   ;;  %v5323_v10 = vld [vmem:[%s7260_s5 + $0x130] sm:$0xff]  }
 0x2ce   :  { %v3415_v47 = vmax.f32 %v3395_v36, %v3405_v49  ;;  %v3375_v63 = vadd.f32 %v3250_v15, %v2975_v59  ;;  %v3377_v21 = vadd.f32 %v3333_v8, %v2977_v55  ;;  %4776 = vmatmul.mubr.bf16.vlgmr.msra.gmra.mxu0 %v3464_v51  ;;  %v3441_v39 = vmax.f32 %v3431_v43, 0.0  ;;  %v5314_v36 = vld [vmem:[%s7260_s5 + $0xa0] sm:$0xff]   ;;  %v5324_v5 = vld [vmem:[%s7260_s5 + $0x128] sm:$0xff]  }
 0x2cf   :  { %4800 = vmatpush3.bf16.msra.mxu0 %v5308_v35  ;;  %4824 = vmatpush3.bf16.msra.mxu1 %v5309_v28  ;;  %v3252_v9 = vpop.f32.mrf.mxu0  ;;  %v3335_v44 = vpop.f32.mrf.mxu1 }
 0x2d0   :  { %v3432_v16 = vadd.f32 %v7045_v29, %v3415_v47  ;;  %v3396_v18 = vmax.f32 %v3374_v57, %v3375_v63  ;;  %v3406_v62 = vmax.f32 %v3376_v40, %v3377_v21  ;;  %4801 = vmatprep.subr.bf16.mxu0 %v7286_v19  ;;  %v3378_v46 = vadd.f32 %v3252_v9, %v2978_v61  ;;  %v7304_v57 = vld [vmem:[#allocation19_spill] sm:$0xff] }
 0x2d1   :  { %v3380_v1 = vadd.f32 %v3335_v44, %v2980_v13  ;;  %v3254_v48 = vpop.f32.mrf.mxu0  ;;  %v3337_v45 = vpop.f32.mrf.mxu1  ;;  %4825 = vmatprep.subr.bf16.mxu1 %v7286_v19  ;;  %4815 = vmatprep.mubr.msk.bf16.mxu0 %vm5340_vm1, %v7286_v19  ;;  %v5320_v44 = vld [vmem:[%s7260_s5 + $0x88] sm:$0xff]  }
 0x2d2   :  { %v3442_v42 = vmax.f32 %v3432_v16, 0.0  ;;  %v3416_v7 = vmax.f32 %v3396_v18, %v3406_v62  ;;  %v3379_v60 = vadd.f32 %v3254_v48, %v2979_v25  ;;  %v3381_v54 = vadd.f32 %v3337_v45, %v2981_v0  ;;  %v5325_v0 = vld [vmem:[%s7260_s5 + $0x120] sm:$0xff]   ;;  %v5326_v16 = vld [vmem:[%s7260_s5 + $0x118] sm:$0xff]   ;;  %v5327_v18 = vld [vmem:[%s7260_s5 + $0x110] sm:$0xff]  }
 0x2d3   :  { %4802 = vmatpush3.bf16.msra.mxu0 %v5310_v53  ;;  %4826 = vmatpush3.bf16.msra.mxu1 %v5311_v22  ;;  %v3258_v14 = vpop.f32.mrf.mxu0  ;;  %v3341_v33 = vpop.f32.mrf.mxu1  ;;  %v5322_v22 = vld [vmem:[%s7260_s5 + $0x138] sm:$0xff]   ;;  %v5328_v62 = vld [vmem:[%s7260_s5 + $0x108] sm:$0xff]   ;;  %v5331_v48 = vld [vmem:[%s7262_s7 + $0x30] sm:$0xff]  }
 0x2d4   :  { %v7127_v31 = vpack.c.bf16 %v3442_v42, %v3441_v39  ;;  %v3397_v37 = vmax.f32 %v3378_v46, %v3379_v60  ;;  %v3407_v17 = vmax.f32 %v3380_v1, %v3381_v54  ;;  %4803 = vmatprep.subr.bf16.mxu0 %v7286_v19  ;;  %v3433_v58 = vadd.f32 %v7045_v29, %v3416_v7  ;;  %v5329_v39 = vld [vmem:[%s7260_s5 + $0x100] sm:$0xff]   ;;  %v5330_v46 = vld [vmem:[%s7262_s7 + $0x38] ss:$0 sps:$4 sm:$0xff]   ;;  %v5332_v45 = vld [vmem:[%s7262_s7 + $0x28] sm:$0xff]  }
 0x2d5   :  { %v3382_v59 = vadd.f32 %v3258_v14, %v7016_v34  ;;  %v3260_v32 = vpop.f32.mrf.mxu0  ;;  %v3343_v38 = vpop.f32.mrf.mxu1  ;;  %4827 = vmatprep.subr.bf16.mxu1 %v7286_v19  ;;  %v3384_v28 = vadd.f32 %v3341_v33, %v7018_v50  ;;  %v5315_v34 = vld [vmem:[%s7260_s5 + $0xd0] sm:$0xff]   ;;  %v4072_v1 = vsel %vm4070_vm2, %v5330_v46, 0  ;;  %v5333_v42 = vld [vmem:[%s7262_s7 + $0x20] sm:$0xff]   ;;  %v5334_v7 = vld [vmem:[%s7262_s7 + $0x18] sm:$0xff]  }
 0x2d6   :  { %v3417_v35 = vmax.f32 %v3397_v37, %v3407_v17  ;;  %v3383_v30 = vadd.f32 %v3260_v32, %v7020_v26  ;;  %v3385_v12 = vadd.f32 %v3343_v38, %v7022_v41  ;;  %v3443_v26 = vmax.f32 %v3433_v58, 0.0  ;;  %v5335_v60 = vld [vmem:[%s7262_s7 + $0x10] sm:$0xff]   ;;  %v5336_v54 = vld [vmem:[%s7262_s7 + $0x8] sm:$0xff]   ;;  %v5337_v14 = vld [vmem:[%s7262_s7] sm:$0xff]  }
 0x2d7   :  { %4804 = vmatpush3.bf16.msra.mxu0 %v5312_v4  ;;  %4828 = vmatpush3.bf16.msra.mxu1 %v5313_v52  ;;  %v3262_v55 = vpop.f32.mrf.mxu0  ;;  %v3345_v51 = vpop.f32.mrf.mxu1 }
 0x2d8   :  { %v3434_v49 = vadd.f32 %v7045_v29, %v3417_v35  ;;  %v3398_v43 = vmax.f32 %v3382_v59, %v3383_v30  ;;  %v3408_v50 = vmax.f32 %v3384_v28, %v3385_v12  ;;  %4805 = vmatprep.subr.bf16.mxu0 %v7286_v19  ;;  %v3386_v41 = vadd.f32 %v3262_v55, %v7024_v3  ;;  %v5317_v3 = vld [vmem:[%s7260_s5 + $0xc8] sm:$0xff]  }
 0x2d9   :  { %v3388_v15 = vadd.f32 %v3345_v51, %v7304_v57  ;;  %v3264_v8 = vpop.f32.mrf.mxu0  ;;  %v3347_v47 = vpop.f32.mrf.mxu1  ;;  %4829 = vmatprep.subr.bf16.mxu1 %v7286_v19 }
 0x2da   :  { %v3444_v40 = vmax.f32 %v3434_v49, 0.0  ;;  %v3418_v63 = vmax.f32 %v3398_v43, %v3408_v50  ;;  %v3387_v21 = vadd.f32 %v3264_v8, %v7028_v20  ;;  %v3389_v24 = vadd.f32 %v3347_v47, %v7030_v23  ;;  %v5318_v23 = vld [vmem:[%s7260_s5 + $0x90] sm:$0xff]  }
 0x2db   :  { %4806 = vmatpush3.bf16.msra.mxu0 %v5314_v36  ;;  %4830 = vmatpush3.bf16.msra.mxu1 %v5315_v34 }
 0x2dc   :  { %v3769_v61 = vpack.c.bf16 %v3444_v40, %v3443_v26  ;;  %v3435_v27 = vadd.f32 %v7045_v29, %v3418_v63  ;;  %v3399_v2 = vmax.f32 %v3386_v41, %v3387_v21  ;;  %v3409_v13 = vmax.f32 %v3388_v15, %v3389_v24  ;;  %4807 = vmatprep.subr.bf16.mxu0 %v7286_v19  ;;  %v4694_v41 = vld [vmem:[%s7263_s6] ss:$0 sm:$0xff] }
 0x2dd   :  { %4831 = vmatprep.subr.bf16.mxu1 %v7286_v19 }
 0x2de   :  { %v3419_v20 = vmax.f32 %v3399_v2, %v3409_v13  ;;  %v3445_v25 = vmax.f32 %v3435_v27, 0.0 }
 0x2df   :  { %4808 = vmatpush3.bf16.msra.mxu0 %v5316_v11  ;;  %4832 = vmatpush3.bf16.msra.mxu1 %v5317_v3 }
 0x2e0   :  { %v3436_v56 = vadd.f32 %v7045_v29, %v3419_v20  ;;  %4809 = vmatprep.subr.bf16.mxu0 %v7286_v19  ;;  %4833 = vmatprep.subr.bf16.mxu1 %v7286_v19  ;;  %v5321_v29 = vld [vmem:[%s7260_s5 + $0x80] sm:$0xff]  }
 0x2e2   :  { %v3446_v9 = vmax.f32 %v3436_v56, 0.0 }
 0x2e3   :  { %4810 = vmatpush3.bf16.msra.mxu0 %v5318_v23  ;;  %4834 = vmatpush3.bf16.msra.mxu1 %v5319_v6 }
 0x2e4   :  { %v3878_v53 = vpack.c.bf16 %v3446_v9, %v3445_v25  ;;  %4811 = vmatprep.subr.bf16.mxu0 %v7286_v19  ;;  %4859 = vmatprep.subr.bf16.mxu1 %v7286_v19 }
 0x2e6   :  { %4836 = vmatmul.mubr.bf16.vlgmr.msra.gmra.mxu1 %v3769_v61  ;;  %v4695_v61 = vld [vmem:[%s7264_s8] ss:$0 sm:$0xff] }
 0x2e7   :  { %4812 = vmatpush3.bf16.msra.mxu0 %v5320_v44  ;;  %4875 = vmatprep.mubr.msk.bf16.mxu1 %vm5340_vm1, %v7286_v19 }
 0x2e8   :  { %4813 = vmatprep.subr.bf16.mxu0 %v7286_v19  ;;  %4860 = vmatpush3.bf16.msra.mxu1 %v4072_v1 }
 0x2e9   :  { %4861 = vmatprep.subr.bf16.mxu1 %v7286_v19 }
 0x2eb   :  { %4814 = vmatpush3.bf16.msra.mxu0 %v5321_v29 }
 0x2ec   :  { %4839 = vmatprep.subr.bf16.mxu0 %v7286_v19  ;;  %4862 = vmatpush3.bf16.msra.mxu1 %v5331_v48 }
 0x2ed   :  { %4863 = vmatprep.subr.bf16.mxu1 %v7286_v19 }
 0x2ee   :  { %4816 = vmatmul.mubr.bf16.vlgmr.msra.gmra.mxu0 %v7127_v31 }
 0x2ef   :  { %4840 = vmatpush3.bf16.msra.mxu0 %v5322_v22  ;;  %4855 = vmatprep.mubr.msk.bf16.mxu0 %vm5340_vm1, %v7286_v19 }
 0x2f0   :  { %4841 = vmatprep.subr.bf16.mxu0 %v7286_v19  ;;  %4864 = vmatpush3.bf16.msra.mxu1 %v5332_v45 }
 0x2f1   :  { %4865 = vmatprep.subr.bf16.mxu1 %v7286_v19 }
 0x2f3   :  { %4842 = vmatpush3.bf16.msra.mxu0 %v5323_v10 }
 0x2f4   :  { %4843 = vmatprep.subr.bf16.mxu0 %v7286_v19  ;;  %4866 = vmatpush3.bf16.msra.mxu1 %v5333_v42 }
 0x2f5   :  { %4867 = vmatprep.subr.bf16.mxu1 %v7286_v19 }
 0x2f7   :  { %4844 = vmatpush3.bf16.msra.mxu0 %v5324_v5 }
 0x2f8   :  { %4845 = vmatprep.subr.bf16.mxu0 %v7286_v19  ;;  %4868 = vmatpush3.bf16.msra.mxu1 %v5334_v7 }
 0x2f9   :  { %4869 = vmatprep.subr.bf16.mxu1 %v7286_v19 }
 0x2fb   :  { %4846 = vmatpush3.bf16.msra.mxu0 %v5325_v0 }
 0x2fc   :  { %4847 = vmatprep.subr.bf16.mxu0 %v7286_v19  ;;  %4870 = vmatpush3.bf16.msra.mxu1 %v5335_v60 }
 0x2fd   :  { %4871 = vmatprep.subr.bf16.mxu1 %v7286_v19 }
 0x2ff   :  { %4848 = vmatpush3.bf16.msra.mxu0 %v5326_v16 }
 0x300   :  { %4849 = vmatprep.subr.bf16.mxu0 %v7286_v19  ;;  %4872 = vmatpush3.bf16.msra.mxu1 %v5336_v54 }
 0x301   :  { %4873 = vmatprep.subr.bf16.mxu1 %v7286_v19 }
 0x303   :  { %4850 = vmatpush3.bf16.msra.mxu0 %v5327_v18 }
 0x304   :  { %4851 = vmatprep.subr.bf16.mxu0 %v7286_v19  ;;  %4874 = vmatpush3.bf16.msra.mxu1 %v5337_v14 }
 0x307   :  { %4852 = vmatpush3.bf16.msra.mxu0 %v5328_v62 }
 0x308   :  { %4853 = vmatprep.subr.bf16.mxu0 %v7286_v19 }
 0x30b   :  { %4854 = vmatpush3.bf16.msra.mxu0 %v5329_v39 }
 0x30e   :  { %4856 = vmatmul.mubr.bf16.vlgmr.msra.gmra.mxu0 %v3878_v53 }
 0x386   :  { %v3653_v33 = vpop.f32.mrf.mxu1 }
 0x388   :  { %v4797_v4 = vpop.f32.mrf.mxu1 }
 0x38a   :  { %v3656_v52 = vpop.f32.mrf.mxu1 }
 0x38c   :  { %v4798_v31 = vpop.f32.mrf.mxu1 }
 0x38e   :  { %v3564_v37 = vpop.f32.mrf.mxu0 }
 0x38f   :  { %v3654_v51 = vadd.f32 %v3653_v33, %v3564_v37 }
 0x390   :  { %v4777_v17 = vpop.f32.mrf.mxu0 }
 0x392   :  { %v3567_v58 = vpop.f32.mrf.mxu0 }
 0x393   :  { %v3657_v34 = vadd.f32 %v3656_v52, %v3567_v58 }
 0x394   :  { %v4778_v59 = vpop.f32.mrf.mxu0 }
 0x3a6   :  { %v3869_v32 = vpop.f32.mrf.mxu1 }
 0x3a8   :  { %v4837_v38 = vpop.f32.mrf.mxu1 }
 0x3aa   :  { %v3872_v35 = vpop.f32.mrf.mxu1 }
 0x3ac   :  { %v4838_v28 = vpop.f32.mrf.mxu1 }
 0x3ae   :  { %v3760_v30 = vpop.f32.mrf.mxu0 }
 0x3af   :  { %v3767_v36 = vadd.f32 %v3760_v30, %v3654_v51 }
 0x3b0   :  { %v4817_v12 = vpop.f32.mrf.mxu0 }
 0x3b1   :  { %v3876_v43 = vadd.f32 %v3869_v32, %v3767_v36 }
 0x3b2   :  { %v3763_v19 = vpop.f32.mrf.mxu0 }
 0x3b3   :  { %v3768_v49 = vadd.f32 %v3763_v19, %v3657_v34 }
 0x3b4   :  { %v4818_v55 = vpop.f32.mrf.mxu0 }
 0x3b5   :  { %v3877_v15 = vadd.f32 %v3872_v35, %v3768_v49 }
 0x3ce   :  { %v3978_v50 = vpop.f32.mrf.mxu0 }
 0x3cf   :  { %v3985_v26 = vadd.f32 %v3978_v50, %v3876_v43 }
 0x3d0   :  { %v4857_v57 = vpop.f32.mrf.mxu0 }
 0x3d1   :  { %v3994_v47 = vadd.f32 %v4694_v41, %v3985_v26 }
 0x3d2   :  { %v3981_v8 = vpop.f32.mrf.mxu0 }
 0x3d3   :  { %v3986_v40 = vadd.f32 %v3981_v8, %v3877_v15  ;;  %v3996_v24 = vmax.f32 %v3994_v47, 0.0 }
 0x3d4   :  { %v4858_v63 = vpop.f32.mrf.mxu0 }
 0x3d5   :  { %v3995_v21 = vadd.f32 %v4694_v41, %v3986_v40 }
 0x3d7   :  { %v3997_v11 = vmax.f32 %v3995_v21, 0.0 }
 0x3d9   :  { %v3998_v3 = vpack.c.bf16 %v3997_v11, %v3996_v24 }
 0x3db   :  { %4876 = vmatmul.mubr.msk.bf16.vlgmr.msra.gmra.mxu1 %vm4066_vm3, %v3998_v3 }
 0x49b   :  { %v4108_v27 = vpop.f32.mrf.mxu1 }
 0x49c   :  { %v4109_v2 = vadd.f32 %v4695_v61, %v4108_v27 }
 0x49d   :  { %v4877_v13 = vpop.f32.mrf.mxu1 }
 0x49e   :  { %v4115_v20 = vmax.f32 %v4109_v2, 0.0 }
 0x49f   :  { %v4111_v23 = vpop.f32.mrf.mxu1 }
 0x4a0   :  { %4118 = vst.msk [vmem:[%s7265_s9] sm:$0xff] %vm4117_vm4, %v4115_v20  ;;  %v4112_v6 = vadd.f32 %v4695_v61, %v4111_v23 }
 0x4a1   :  { %v4878_v56 = vpop.f32.mrf.mxu1 }
 0x4a2   :  { %v4116_v25 = vmax.f32 %v4112_v6, 0.0 }
 0x4a4   :  { %4119 = vst.msk [vmem:[%s7265_s9 + $0x8] sm:$0xff] %vm4117_vm4, %v4116_v25 }

</bundles_post_ra>
